<compile_context>
chip_gen: v6e
topology: v6e:2x2x1
jax: 0.10.0
libtpu: 0.0.40
codegen_flags: <defaults>
</compile_context>

<pallas_src>
import functools
from math import ceil

import jax
import jax.numpy as jnp
import numpy as np
from jax import lax
from jax.experimental import pallas as pl
from jax.experimental.pallas import tpu as pltpu

_WKEYS = ("w1", "b1", "w2", "b2", "wla", "wlb", "bl")


# ----------------------------------------------------------------------------
# Fused per-level kernel: pool Block + embed Block + dense_diff_pool
# ----------------------------------------------------------------------------
def _level_kernel(x_ref, adj_ref, mask_ref,
                  pw1, pb1, pw2, pb2, pwla, pwlb, pbl,
                  ew1, eb1, ew2, eb2, ewla, ewlb, ebl,
                  xm_ref, xp_ref, ap_ref, *, mxu_dtype, apply_mask):
    """One grid step = BG graphs of one DiffPool level.

      s      = pool_block(x, adj, mask)               (no relu)
      xe     = relu(embed_block(x, adj, mask))
      xm     = mean_over_nodes(xe)                    -> (BG, 1, He) output
      xp, ap = dense_diff_pool(xe, adj, s, mask)      -> pooled features / adjacency
    """
    BG, N, _ = adj_ref.shape

    # add_loop=True: set diagonal to 1; degree with clamp(min=1).  Done ONCE per
    # level (shared by both Blocks); `a_c` / `inv_deg` stay VMEM/vreg-resident.
    adj = adj_ref[...]
    eye = (lax.broadcasted_iota(jnp.int32, (N, N), 0)
           == lax.broadcasted_iota(jnp.int32, (N, N), 1))
    a = jnp.where(eye[None, :, :], jnp.float32(1.0), adj)
    deg = jnp.sum(a, axis=-1, keepdims=True)
    inv_deg = pl.reciprocal(jnp.maximum(deg, 1.0), approx=True)     # EUP, (BG,N,1)
    a_c = a.astype(mxu_dtype)
    mask = mask_ref[...] if apply_mask else None                    # (BG, N, 1)
    x0 = x_ref[...]

    def agg(t):  # mean aggregation: (a @ t) * inv_deg (per-graph batched matmul)
        return jnp.einsum('bnm,bmf->bnf', a_c, t.astype(mxu_dtype),
                          preferred_element_type=jnp.float32) * inv_deg

    def sage(h, w_ref, b_ref):  # Linear on flattened (BG*N, K) slab, mask, relu
        k = h.shape[-1]
        hout = w_ref.shape[1]
        y = jnp.dot(h.reshape(BG * N, k).astype(mxu_dtype),
                    w_ref[...].astype(mxu_dtype),
                    preferred_element_type=jnp.float32) + b_ref[...]
        y = y.reshape(BG, N, hout)
        if apply_mask:
            y = y * mask
        return jnp.maximum(y, 0.0)

    def block(w1, b1, w2, b2, wla, wlb, bl):
        x1 = sage(agg(x0), w1, b1)
        x2 = sage(agg(x1), w2, b2)
        # lin(cat([x1, x2], -1)) == x1 @ wla + x2 @ wlb + bl.  Kept as two
        # matmuls: a single K=(H+O) matmul would need an unaligned minor-dim
        # concatenate; at H,O <= 128 both forms issue identical MXU work.
        o = wla.shape[1]
        out = (jnp.dot(x1.reshape(BG * N, x1.shape[-1]).astype(mxu_dtype),
                       wla[...].astype(mxu_dtype),
                       preferred_element_type=jnp.float32)
               + jnp.dot(x2.reshape(BG * N, x2.shape[-1]).astype(mxu_dtype),
                         wlb[...].astype(mxu_dtype),
                         preferred_element_type=jnp.float32)
               + bl[...])
        return out.reshape(BG, N, o)

    s = block(pw1, pb1, pw2, pb2, pwla, pwlb, pbl)                     # (BG, N, C)
    xe = jnp.maximum(block(ew1, eb1, ew2, eb2, ewla, ewlb, ebl), 0.0)  # (BG, N, He)

    # torch x.mean(dim=1): plain mean over all (padded) nodes, reduced in-kernel
    # so the (BG, N, He) embed tensor never hits HBM.
    xm_ref[...] = jnp.sum(xe, axis=1, keepdims=True) * jnp.float32(1.0 / N)

    # dense_diff_pool: softmax over clusters, mask, s^T x and s^T adj s.
    z = s - jnp.max(s, axis=-1, keepdims=True)
    e = jnp.exp(z)
    p = e * pl.reciprocal(jnp.sum(e, axis=-1, keepdims=True), approx=True)
    if apply_mask:
        p = p * mask
        xm = xe * mask
    else:
        xm = xe
    p_c = p.astype(mxu_dtype)
    pT = jnp.swapaxes(p_c, 1, 2)                                     # one (N,C)->(C,N)
    xp_ref[...] = jnp.einsum('bcn,bnh->bch', pT, xm.astype(mxu_dtype),
                             preferred_element_type=jnp.float32)     # (BG, C, He)
    t = jnp.einsum('bcn,bnm->bcm', pT, adj.astype(mxu_dtype),
                   preferred_element_type=jnp.float32)               # (BG, C, N)
    ap_ref[...] = jnp.einsum('bcm,bmk->bck', t.astype(mxu_dtype), p_c,
                             preferred_element_type=jnp.float32)     # (BG, C, C)
    # TODO(synk): dense_diff_pool's link/entropy regularization losses are not
    # computed since DiffPool.forward does not use them in its returned output.


# ----------------------------------------------------------------------------
# Wrappers
# ----------------------------------------------------------------------------
def _pick_batch_group(B, max_bg=8):
    """Largest divisor of B (<= max_bg) that still leaves >= 2 grid steps."""
    divs = [d for d in range(1, min(B, max_bg) + 1) if B % d == 0]
    two_step = [d for d in divs if B // d >= 2]   # keep both v7x TensorCores busy
    return max(two_step) if two_step else max(divs)


def _compiler_params(block_shapes):
    # Rough per-step VMEM footprint (f32, double-buffered).  For large graphs
    # request more scoped VMEM; beyond ~half of v7x's 64 MiB physical VMEM the
    # adjacency should instead be row-tiled (extra grid axis + accumulator).
    est = 2 * sum(int(np.prod(s)) * 4 for s in block_shapes)
    vmem_limit = None
    if est > 16 * 1024 * 1024:
        vmem_limit = min(2 * est, 56 * 1024 * 1024)
    return pltpu.CompilerParams(dimension_semantics=("parallel",),
                                vmem_limit_bytes=vmem_limit)


def level_forward(x, adj, mask3, pool_p, embed_p, *,
                  apply_mask=True, mxu_dtype=jnp.bfloat16, batch_group=None):
    """One fused DiffPool level.  Returns (node_mean, pooled_x, pooled_adj)."""
    B, N, Fin = x.shape
    C = pool_p["w2"].shape[1]
    He = embed_p["w2"].shape[1]
    BG = _pick_batch_group(B) if batch_group is None else batch_group
    assert B % BG == 0
    G = B // BG

    def bspec(*dims):
        return pl.BlockSpec((BG,) + dims, lambda g: (g, 0, 0))

    def wspec(arr):
        nd = arr.ndim
        return pl.BlockSpec(arr.shape, lambda g, _n=nd: (0,) * _n)

    in_specs = ([bspec(N, Fin), bspec(N, N), bspec(N, 1)]
                + [wspec(pool_p[k]) for k in _WKEYS]
                + [wspec(embed_p[k]) for k in _WKEYS])
    out_specs = (bspec(1, He), bspec(C, He), bspec(C, C))
    block_shapes = ([(BG, N, Fin), (BG, N, N), (BG, N, 1)]
                    + [pool_p[k].shape for k in _WKEYS]
                    + [embed_p[k].shape for k in _WKEYS]
                    + [(BG, 1, He), (BG, C, He), (BG, C, C)])

    kern = functools.partial(_level_kernel, mxu_dtype=mxu_dtype,
                             apply_mask=apply_mask)
    xmean, xp, ap = pl.pallas_call(
        kern,
        out_shape=(jax.ShapeDtypeStruct((B, 1, He), jnp.float32),
                   jax.ShapeDtypeStruct((B, C, He), jnp.float32),
                   jax.ShapeDtypeStruct((B, C, C), jnp.float32)),
        grid=(G,),
        in_specs=in_specs,
        out_specs=out_specs,
        compiler_params=_compiler_params(block_shapes),
    )(x, adj, mask3,
      *(pool_p[k] for k in _WKEYS), *(embed_p[k] for k in _WKEYS))
    return xmean[:, 0, :], xp, ap


# ----------------------------------------------------------------------------
# Parameters (deterministic synthetic init; shapes follow DiffPool.__init__)
# ----------------------------------------------------------------------------
def _linear_params(key, fin, fout):
    kw, kb = jax.random.split(key)
    bound = 1.0 / np.sqrt(fin)
    w = jax.random.uniform(kw, (fin, fout), jnp.float32, -bound, bound)
    b = jax.random.uniform(kb, (1, fout), jnp.float32, -bound, bound)
    return w, b


def _block_params(key, fin, hidden, fout):
    k1, k2, k3 = jax.random.split(key, 3)
    w1, b1 = _linear_params(k1, fin, hidden)          # conv1: Linear(fin, hidden)
    w2, b2 = _linear_params(k2, hidden, fout)         # conv2: Linear(hidden, fout)
    wl, bl = _linear_params(k3, hidden + fout, fout)  # lin:   Linear(hidden+fout, fout)
    return dict(w1=w1, b1=b1, w2=w2, b2=b2,
                wla=wl[:hidden], wlb=wl[hidden:], bl=bl)


def init_diffpool_params(key, num_features, num_nodes_in, num_layers, hidden, num_classes):
    n_extra = num_layers // 2 - 1
    keys = jax.random.split(key, 4 + 2 * n_extra)
    num_nodes = ceil(0.25 * num_nodes_in)
    params = {
        "embed_block1": _block_params(keys[0], num_features, hidden, hidden),
        "pool_block1": _block_params(keys[1], num_features, hidden, num_nodes),
    }
    embeds, pools = [], []
    ki = 2
    for _ in range(n_extra):
        num_nodes = ceil(0.25 * num_nodes)
        embeds.append(_block_params(keys[ki], hidden, hidden, hidden)); ki += 1
        pools.append(_block_params(keys[ki], hidden, hidden, num_nodes)); ki += 1
    params["embed_blocks"] = embeds
    params["pool_blocks"] = pools
    params["lin1_w"], params["lin1_b"] = _linear_params(keys[ki], (n_extra + 1) * hidden, hidden); ki += 1
    params["lin2_w"], params["lin2_b"] = _linear_params(keys[ki], hidden, num_classes)
    return params


# ----------------------------------------------------------------------------
# Full DiffPool forward
# ----------------------------------------------------------------------------
def diffpool_forward(params, x, adj, mask, *, mxu_dtype=jnp.bfloat16):
    B = x.shape[0]
    mask3 = mask[:, :, None].astype(jnp.float32)

    level_params = ([(params["pool_block1"], params["embed_block1"])]
                    + list(zip(params["pool_blocks"], params["embed_blocks"])))
    xs = []
    for li, (pool_p, embed_p) in enumerate(level_params):
        apply_mask = (li == 0)
        # Levels >= 1 have no mask in the PyTorch reference; a dummy ones mask is
        # passed to keep the kernel signature uniform (its use is statically gated).
        m3 = mask3 if apply_mask else jnp.ones((B, x.shape[1], 1), jnp.float32)
        xmean, x, adj = level_forward(x, adj, m3, pool_p, embed_p,
                                      apply_mask=apply_mask, mxu_dtype=mxu_dtype)
        xs.append(xmean)

    xcat = jnp.concatenate(xs, axis=-1)               # JumpingKnowledge(mode='cat')
    # MLP head in plain JAX: a (B, 2*hidden) matmul chain is cheaper as fused
    # XLA ops than a standalone pallas_call.
    h = jax.nn.relu(xcat @ params["lin1_w"] + params["lin1_b"])
    # TODO(synk): F.dropout(p=0.5) is identity in eval mode (training=False).
    logits = h @ params["lin2_w"] + params["lin2_b"]
    return jax.nn.log_softmax(logits, axis=-1)


# ----------------------------------------------------------------------------
# Pure-JAX f32 reference (same math) for a sanity check
# ----------------------------------------------------------------------------
def _sage_ref(x, adj, mask3, w, b):
    N = x.shape[1]
    idx = jnp.arange(N)
    a = adj.at[:, idx, idx].set(1.0)
    deg = jnp.clip(jnp.sum(a, -1, keepdims=True), 1.0, None)
    out = jnp.einsum("bnm,bmf->bnf", a, x, precision="highest") / deg
    out = jnp.einsum("bnf,fo->bno", out, w, precision="highest") + b
    return out * mask3


def _block_ref(x, adj, mask3, p):
    x1 = jax.nn.relu(_sage_ref(x, adj, mask3, p["w1"], p["b1"]))
    x2 = jax.nn.relu(_sage_ref(x1, adj, mask3, p["w2"], p["b2"]))
    cat = jnp.concatenate([x1, x2], -1)
    wl = jnp.concatenate([p["wla"], p["wlb"]], 0)
    return jnp.einsum("bno,oc->bnc", cat, wl, precision="highest") + p["bl"]


def _diff_pool_ref(x, adj, s, mask3):
    s = jax.nn.softmax(s, axis=-1)
    x = x * mask3
    s = s * mask3
    xo = jnp.einsum("bnc,bnh->bch", s, x, precision="highest")
    ao = jnp.einsum("bnc,bnm,bmk->bck", s, adj, s, precision="highest")
    return xo, ao


def diffpool_ref(params, x, adj, mask):
    B = x.shape[0]
    mask3 = mask[:, :, None].astype(jnp.float32)
    s = _block_ref(x, adj, mask3, params["pool_block1"])
    x = jax.nn.relu(_block_ref(x, adj, mask3, params["embed_block1"]))
    xs = [x.mean(axis=1)]
    x, adj = _diff_pool_ref(x, adj, s, mask3)
    for embed_p, pool_p in zip(params["embed_blocks"], params["pool_blocks"]):
        ones = jnp.ones((B, x.shape[1], 1), jnp.float32)
        s = _block_ref(x, adj, ones, pool_p)
        x = jax.nn.relu(_block_ref(x, adj, ones, embed_p))
        xs.append(x.mean(axis=1))
        x, adj = _diff_pool_ref(x, adj, s, ones)
    xcat = jnp.concatenate(xs, -1)
    h = jax.nn.relu(xcat @ params["lin1_w"] + params["lin1_b"])
    logits = h @ params["lin2_w"] + params["lin2_b"]
    return jax.nn.log_softmax(logits, axis=-1)


# ----------------------------------------------------------------------------
if __name__ == "__main__":
    B, N, F = 4, 32, 16            # batch, padded nodes per graph, node features
    hidden, num_classes, num_layers = 32, 4, 4

    key = jax.random.PRNGKey(0)
    kx, ka, kp = jax.random.split(key, 3)

    x = jax.random.normal(kx, (B, N, F), jnp.float32)
    a0 = (jax.random.uniform(ka, (B, N, N)) < 0.3).astype(jnp.float32)
    adj = jnp.maximum(a0, jnp.swapaxes(a0, 1, 2))                      # symmetric 0/1
    valid = jnp.array([24, 32, 28, 30])
    mask = (jnp.arange(N)[None, :] < valid[:, None]).astype(jnp.float32)   # (B, N)
    adj = adj * mask[:, :, None] * mask[:, None, :]

    params = init_diffpool_params(kp, F, N, num_layers, hidden, num_classes)

    out = jax.jit(diffpool_forward)(params, x, adj, mask)
    out = jax.block_until_ready(out)

    ref = diffpool_ref(params, x, adj, mask)
    np.testing.assert_allclose(np.asarray(out), np.asarray(ref), atol=5e-2, rtol=5e-2)
    assert out.shape == (B, num_classes)
    print("KERNEL_OK")
</pallas_src>

<mosaic_0001>
module attributes {stable_mosaic.version = 11 : i64} {
  func.func @_level_kernel(%arg0: i32, %arg1: memref<2x32x16xf32, #tpu.memory_space<vmem>>, %arg2: memref<2x32x32xf32, #tpu.memory_space<vmem>>, %arg3: memref<2x32x1xf32, #tpu.memory_space<vmem>>, %arg4: memref<16x32xf32, #tpu.memory_space<vmem>>, %arg5: memref<1x32xf32, #tpu.memory_space<vmem>>, %arg6: memref<32x8xf32, #tpu.memory_space<vmem>>, %arg7: memref<1x8xf32, #tpu.memory_space<vmem>>, %arg8: memref<32x8xf32, #tpu.memory_space<vmem>>, %arg9: memref<8x8xf32, #tpu.memory_space<vmem>>, %arg10: memref<1x8xf32, #tpu.memory_space<vmem>>, %arg11: memref<16x32xf32, #tpu.memory_space<vmem>>, %arg12: memref<1x32xf32, #tpu.memory_space<vmem>>, %arg13: memref<32x32xf32, #tpu.memory_space<vmem>>, %arg14: memref<1x32xf32, #tpu.memory_space<vmem>>, %arg15: memref<32x32xf32, #tpu.memory_space<vmem>>, %arg16: memref<32x32xf32, #tpu.memory_space<vmem>>, %arg17: memref<1x32xf32, #tpu.memory_space<vmem>>, %arg18: memref<2x1x32xf32, #tpu.memory_space<vmem>>, %arg19: memref<2x8x32xf32, #tpu.memory_space<vmem>>, %arg20: memref<2x8x8xf32, #tpu.memory_space<vmem>>) attributes {dimension_semantics = [#tpu.dimension_semantics<parallel>], iteration_bounds = array<i64: 2>, scalar_prefetch = 0 : i64, scratch_operands = 0 : i64, tpu.core_type = #tpu.core_type<tc>, window_params = [{transform_indices = @transform_0, window_bounds = array<i64: 2, 32, 16>}, {transform_indices = @transform_1, window_bounds = array<i64: 2, 32, 32>}, {transform_indices = @transform_2, window_bounds = array<i64: 2, 32, 1>}, {pipeline_mode = #tpu.pipeline_mode<synchronous>, transform_indices = @transform_3, window_bounds = array<i64: 16, 32>}, {pipeline_mode = #tpu.pipeline_mode<synchronous>, transform_indices = @transform_4, window_bounds = array<i64: 1, 32>}, {pipeline_mode = #tpu.pipeline_mode<synchronous>, transform_indices = @transform_5, window_bounds = array<i64: 32, 8>}, {pipeline_mode = #tpu.pipeline_mode<synchronous>, transform_indices = @transform_6, window_bounds = array<i64: 1, 8>}, {pipeline_mode = #tpu.pipeline_mode<synchronous>, transform_indices = @transform_7, window_bounds = array<i64: 32, 8>}, {pipeline_mode = #tpu.pipeline_mode<synchronous>, transform_indices = @transform_8, window_bounds = array<i64: 8, 8>}, {pipeline_mode = #tpu.pipeline_mode<synchronous>, transform_indices = @transform_9, window_bounds = array<i64: 1, 8>}, {pipeline_mode = #tpu.pipeline_mode<synchronous>, transform_indices = @transform_10, window_bounds = array<i64: 16, 32>}, {pipeline_mode = #tpu.pipeline_mode<synchronous>, transform_indices = @transform_11, window_bounds = array<i64: 1, 32>}, {pipeline_mode = #tpu.pipeline_mode<synchronous>, transform_indices = @transform_12, window_bounds = array<i64: 32, 32>}, {pipeline_mode = #tpu.pipeline_mode<synchronous>, transform_indices = @transform_13, window_bounds = array<i64: 1, 32>}, {pipeline_mode = #tpu.pipeline_mode<synchronous>, transform_indices = @transform_14, window_bounds = array<i64: 32, 32>}, {pipeline_mode = #tpu.pipeline_mode<synchronous>, transform_indices = @transform_15, window_bounds = array<i64: 32, 32>}, {pipeline_mode = #tpu.pipeline_mode<synchronous>, transform_indices = @transform_16, window_bounds = array<i64: 1, 32>}, {transform_indices = @transform_17, window_bounds = array<i64: 2, 1, 32>}, {transform_indices = @transform_18, window_bounds = array<i64: 2, 8, 32>}, {transform_indices = @transform_19, window_bounds = array<i64: 2, 8, 8>}]} {
    %c0 = arith.constant 0 : index
    %c0_0 = arith.constant 0 : index
    %c0_1 = arith.constant 0 : index
    %0 = vector.load %arg2[%c0, %c0_0, %c0_1] : memref<2x32x32xf32, #tpu.memory_space<vmem>>, vector<2x32x32xf32>
    %1 = tpu.iota {dimensions = array<i32: 0>} : vector<32x32xi32>
    %2 = tpu.iota {dimensions = array<i32: 1>} : vector<32x32xi32>
    %3 = arith.cmpi eq, %1, %2 : vector<32x32xi32>
    %4 = vector.shape_cast %3 : vector<32x32xi1> to vector<1x32x32xi1>
    %cst = arith.constant 1.000000e+00 : f32
    %5 = vector.shape_cast %4 : vector<1x32x32xi1> to vector<1x32x32xi1>
    %6 = vector.broadcast %5 : vector<1x32x32xi1> to vector<2x32x32xi1>
    %7 = vector.broadcast %cst : f32 to vector<2x32x32xf32>
    %8 = arith.select %6, %7, %0 : vector<2x32x32xi1>, vector<2x32x32xf32>
    %cst_2 = arith.constant dense<0.000000e+00> : vector<2x32xf32>
    %9 = vector.multi_reduction <add>, %8, %cst_2 [2] : vector<2x32x32xf32> to vector<2x32xf32>
    %10 = vector.shape_cast %9 : vector<2x32xf32> to vector<2x32x1xf32>
    %cst_3 = arith.constant 1.000000e+00 : f32
    %11 = vector.broadcast %cst_3 : f32 to vector<2x32x1xf32>
    %12 = arith.maximumf %10, %11 : vector<2x32x1xf32>
    %13 = tpu.reciprocal %12 {approx = true} : vector<2x32x1xf32> -> vector<2x32x1xf32>
    %14 = arith.truncf %8 : vector<2x32x32xf32> to vector<2x32x32xbf16>
    %c0_4 = arith.constant 0 : index
    %c0_5 = arith.constant 0 : index
    %c0_6 = arith.constant 0 : index
    %15 = vector.load %arg3[%c0_4, %c0_5, %c0_6] : memref<2x32x1xf32, #tpu.memory_space<vmem>>, vector<2x32x1xf32>
    %c0_7 = arith.constant 0 : index
    %c0_8 = arith.constant 0 : index
    %c0_9 = arith.constant 0 : index
    %16 = vector.load %arg1[%c0_7, %c0_8, %c0_9] : memref<2x32x16xf32, #tpu.memory_space<vmem>>, vector<2x32x16xf32>
    %17 = arith.truncf %16 : vector<2x32x16xf32> to vector<2x32x16xbf16>
    "tpu.trace_start"() <{level = 10 : i32, message = "bnm,bmf->bnf"}> : () -> ()
    %cst_10 = arith.constant dense<0.000000e+00> : vector<2x32x16xf32>
    %18 = tpu.matmul %14, %17, %cst_10 {dimension_numbers = #tpu.dot_dimension_numbers<[2], [1], [1], [2], [0, 0, 0, 1, 1, 2], [0], [0]>} : vector<2x32x32xbf16>, vector<2x32x16xbf16>, vector<2x32x16xf32> -> vector<2x32x16xf32>
    "tpu.trace_stop"() : () -> ()
    %19 = vector.broadcast %13 : vector<2x32x1xf32> to vector<2x32x16xf32>
    %20 = arith.mulf %18, %19 : vector<2x32x16xf32>
    %21 = vector.shape_cast %20 : vector<2x32x16xf32> to vector<64x16xf32>
    %22 = arith.truncf %21 : vector<64x16xf32> to vector<64x16xbf16>
    %c0_11 = arith.constant 0 : index
    %c0_12 = arith.constant 0 : index
    %23 = vector.load %arg4[%c0_11, %c0_12] : memref<16x32xf32, #tpu.memory_space<vmem>>, vector<16x32xf32>
    %24 = arith.truncf %23 : vector<16x32xf32> to vector<16x32xbf16>
    %cst_13 = arith.constant dense<0.000000e+00> : vector<64x32xf32>
    %25 = tpu.matmul %22, %24, %cst_13 {dimension_numbers = #tpu.dot_dimension_numbers<[1], [0], [0], [1], [0, 0, 1, 1], [], []>} : vector<64x16xbf16>, vector<16x32xbf16>, vector<64x32xf32> -> vector<64x32xf32>
    %c0_14 = arith.constant 0 : index
    %c0_15 = arith.constant 0 : index
    %26 = vector.load %arg5[%c0_14, %c0_15] : memref<1x32xf32, #tpu.memory_space<vmem>>, vector<1x32xf32>
    %27 = vector.broadcast %26 : vector<1x32xf32> to vector<64x32xf32>
    %28 = arith.addf %25, %27 : vector<64x32xf32>
    %29 = vector.shape_cast %28 : vector<64x32xf32> to vector<2x32x32xf32>
    %30 = vector.broadcast %15 : vector<2x32x1xf32> to vector<2x32x32xf32>
    %31 = arith.mulf %29, %30 : vector<2x32x32xf32>
    %cst_16 = arith.constant 0.000000e+00 : f32
    %32 = vector.broadcast %cst_16 : f32 to vector<2x32x32xf32>
    %33 = arith.maximumf %31, %32 : vector<2x32x32xf32>
    %34 = arith.truncf %33 : vector<2x32x32xf32> to vector<2x32x32xbf16>
    "tpu.trace_start"() <{level = 10 : i32, message = "bnm,bmf->bnf"}> : () -> ()
    %cst_17 = arith.constant dense<0.000000e+00> : vector<2x32x32xf32>
    %35 = tpu.matmul %14, %34, %cst_17 {dimension_numbers = #tpu.dot_dimension_numbers<[2], [1], [1], [2], [0, 0, 0, 1, 1, 2], [0], [0]>} : vector<2x32x32xbf16>, vector<2x32x32xbf16>, vector<2x32x32xf32> -> vector<2x32x32xf32>
    "tpu.trace_stop"() : () -> ()
    %36 = vector.broadcast %13 : vector<2x32x1xf32> to vector<2x32x32xf32>
    %37 = arith.mulf %35, %36 : vector<2x32x32xf32>
    %38 = vector.shape_cast %37 : vector<2x32x32xf32> to vector<64x32xf32>
    %39 = arith.truncf %38 : vector<64x32xf32> to vector<64x32xbf16>
    %c0_18 = arith.constant 0 : index
    %c0_19 = arith.constant 0 : index
    %40 = vector.load %arg6[%c0_18, %c0_19] : memref<32x8xf32, #tpu.memory_space<vmem>>, vector<32x8xf32>
    %41 = arith.truncf %40 : vector<32x8xf32> to vector<32x8xbf16>
    %cst_20 = arith.constant dense<0.000000e+00> : vector<64x8xf32>
    %42 = tpu.matmul %39, %41, %cst_20 {dimension_numbers = #tpu.dot_dimension_numbers<[1], [0], [0], [1], [0, 0, 1, 1], [], []>} : vector<64x32xbf16>, vector<32x8xbf16>, vector<64x8xf32> -> vector<64x8xf32>
    %c0_21 = arith.constant 0 : index
    %c0_22 = arith.constant 0 : index
    %43 = vector.load %arg7[%c0_21, %c0_22] : memref<1x8xf32, #tpu.memory_space<vmem>>, vector<1x8xf32>
    %44 = vector.broadcast %43 : vector<1x8xf32> to vector<64x8xf32>
    %45 = arith.addf %42, %44 : vector<64x8xf32>
    %46 = vector.shape_cast %45 : vector<64x8xf32> to vector<2x32x8xf32>
    %47 = vector.broadcast %15 : vector<2x32x1xf32> to vector<2x32x8xf32>
    %48 = arith.mulf %46, %47 : vector<2x32x8xf32>
    %cst_23 = arith.constant 0.000000e+00 : f32
    %49 = vector.broadcast %cst_23 : f32 to vector<2x32x8xf32>
    %50 = arith.maximumf %48, %49 : vector<2x32x8xf32>
    %51 = vector.shape_cast %33 : vector<2x32x32xf32> to vector<64x32xf32>
    %52 = arith.truncf %51 : vector<64x32xf32> to vector<64x32xbf16>
    %c0_24 = arith.constant 0 : index
    %c0_25 = arith.constant 0 : index
    %53 = vector.load %arg8[%c0_24, %c0_25] : memref<32x8xf32, #tpu.memory_space<vmem>>, vector<32x8xf32>
    %54 = arith.truncf %53 : vector<32x8xf32> to vector<32x8xbf16>
    %cst_26 = arith.constant dense<0.000000e+00> : vector<64x8xf32>
    %55 = tpu.matmul %52, %54, %cst_26 {dimension_numbers = #tpu.dot_dimension_numbers<[1], [0], [0], [1], [0, 0, 1, 1], [], []>} : vector<64x32xbf16>, vector<32x8xbf16>, vector<64x8xf32> -> vector<64x8xf32>
    %56 = vector.shape_cast %50 : vector<2x32x8xf32> to vector<64x8xf32>
    %57 = arith.truncf %56 : vector<64x8xf32> to vector<64x8xbf16>
    %c0_27 = arith.constant 0 : index
    %c0_28 = arith.constant 0 : index
    %58 = vector.load %arg9[%c0_27, %c0_28] : memref<8x8xf32, #tpu.memory_space<vmem>>, vector<8x8xf32>
    %59 = arith.truncf %58 : vector<8x8xf32> to vector<8x8xbf16>
    %cst_29 = arith.constant dense<0.000000e+00> : vector<64x8xf32>
    %60 = tpu.matmul %57, %59, %cst_29 {dimension_numbers = #tpu.dot_dimension_numbers<[1], [0], [0], [1], [0, 0, 1, 1], [], []>} : vector<64x8xbf16>, vector<8x8xbf16>, vector<64x8xf32> -> vector<64x8xf32>
    %61 = arith.addf %55, %60 : vector<64x8xf32>
    %c0_30 = arith.constant 0 : index
    %c0_31 = arith.constant 0 : index
    %62 = vector.load %arg10[%c0_30, %c0_31] : memref<1x8xf32, #tpu.memory_space<vmem>>, vector<1x8xf32>
    %63 = vector.broadcast %62 : vector<1x8xf32> to vector<64x8xf32>
    %64 = arith.addf %61, %63 : vector<64x8xf32>
    %65 = vector.shape_cast %64 : vector<64x8xf32> to vector<2x32x8xf32>
    %66 = arith.truncf %16 : vector<2x32x16xf32> to vector<2x32x16xbf16>
    "tpu.trace_start"() <{level = 10 : i32, message = "bnm,bmf->bnf"}> : () -> ()
    %cst_32 = arith.constant dense<0.000000e+00> : vector<2x32x16xf32>
    %67 = tpu.matmul %14, %66, %cst_32 {dimension_numbers = #tpu.dot_dimension_numbers<[2], [1], [1], [2], [0, 0, 0, 1, 1, 2], [0], [0]>} : vector<2x32x32xbf16>, vector<2x32x16xbf16>, vector<2x32x16xf32> -> vector<2x32x16xf32>
    "tpu.trace_stop"() : () -> ()
    %68 = vector.broadcast %13 : vector<2x32x1xf32> to vector<2x32x16xf32>
    %69 = arith.mulf %67, %68 : vector<2x32x16xf32>
    %70 = vector.shape_cast %69 : vector<2x32x16xf32> to vector<64x16xf32>
    %71 = arith.truncf %70 : vector<64x16xf32> to vector<64x16xbf16>
    %c0_33 = arith.constant 0 : index
    %c0_34 = arith.constant 0 : index
    %72 = vector.load %arg11[%c0_33, %c0_34] : memref<16x32xf32, #tpu.memory_space<vmem>>, vector<16x32xf32>
    %73 = arith.truncf %72 : vector<16x32xf32> to vector<16x32xbf16>
    %cst_35 = arith.constant dense<0.000000e+00> : vector<64x32xf32>
    %74 = tpu.matmul %71, %73, %cst_35 {dimension_numbers = #tpu.dot_dimension_numbers<[1], [0], [0], [1], [0, 0, 1, 1], [], []>} : vector<64x16xbf16>, vector<16x32xbf16>, vector<64x32xf32> -> vector<64x32xf32>
    %c0_36 = arith.constant 0 : index
    %c0_37 = arith.constant 0 : index
    %75 = vector.load %arg12[%c0_36, %c0_37] : memref<1x32xf32, #tpu.memory_space<vmem>>, vector<1x32xf32>
    %76 = vector.broadcast %75 : vector<1x32xf32> to vector<64x32xf32>
    %77 = arith.addf %74, %76 : vector<64x32xf32>
    %78 = vector.shape_cast %77 : vector<64x32xf32> to vector<2x32x32xf32>
    %79 = vector.broadcast %15 : vector<2x32x1xf32> to vector<2x32x32xf32>
    %80 = arith.mulf %78, %79 : vector<2x32x32xf32>
    %cst_38 = arith.constant 0.000000e+00 : f32
    %81 = vector.broadcast %cst_38 : f32 to vector<2x32x32xf32>
    %82 = arith.maximumf %80, %81 : vector<2x32x32xf32>
    %83 = arith.truncf %82 : vector<2x32x32xf32> to vector<2x32x32xbf16>
    "tpu.trace_start"() <{level = 10 : i32, message = "bnm,bmf->bnf"}> : () -> ()
    %cst_39 = arith.constant dense<0.000000e+00> : vector<2x32x32xf32>
    %84 = tpu.matmul %14, %83, %cst_39 {dimension_numbers = #tpu.dot_dimension_numbers<[2], [1], [1], [2], [0, 0, 0, 1, 1, 2], [0], [0]>} : vector<2x32x32xbf16>, vector<2x32x32xbf16>, vector<2x32x32xf32> -> vector<2x32x32xf32>
    "tpu.trace_stop"() : () -> ()
    %85 = vector.broadcast %13 : vector<2x32x1xf32> to vector<2x32x32xf32>
    %86 = arith.mulf %84, %85 : vector<2x32x32xf32>
    %87 = vector.shape_cast %86 : vector<2x32x32xf32> to vector<64x32xf32>
    %88 = arith.truncf %87 : vector<64x32xf32> to vector<64x32xbf16>
    %c0_40 = arith.constant 0 : index
    %c0_41 = arith.constant 0 : index
    %89 = vector.load %arg13[%c0_40, %c0_41] : memref<32x32xf32, #tpu.memory_space<vmem>>, vector<32x32xf32>
    %90 = arith.truncf %89 : vector<32x32xf32> to vector<32x32xbf16>
    %cst_42 = arith.constant dense<0.000000e+00> : vector<64x32xf32>
    %91 = tpu.matmul %88, %90, %cst_42 {dimension_numbers = #tpu.dot_dimension_numbers<[1], [0], [0], [1], [0, 0, 1, 1], [], []>} : vector<64x32xbf16>, vector<32x32xbf16>, vector<64x32xf32> -> vector<64x32xf32>
    %c0_43 = arith.constant 0 : index
    %c0_44 = arith.constant 0 : index
    %92 = vector.load %arg14[%c0_43, %c0_44] : memref<1x32xf32, #tpu.memory_space<vmem>>, vector<1x32xf32>
    %93 = vector.broadcast %92 : vector<1x32xf32> to vector<64x32xf32>
    %94 = arith.addf %91, %93 : vector<64x32xf32>
    %95 = vector.shape_cast %94 : vector<64x32xf32> to vector<2x32x32xf32>
    %96 = vector.broadcast %15 : vector<2x32x1xf32> to vector<2x32x32xf32>
    %97 = arith.mulf %95, %96 : vector<2x32x32xf32>
    %cst_45 = arith.constant 0.000000e+00 : f32
    %98 = vector.broadcast %cst_45 : f32 to vector<2x32x32xf32>
    %99 = arith.maximumf %97, %98 : vector<2x32x32xf32>
    %100 = vector.shape_cast %82 : vector<2x32x32xf32> to vector<64x32xf32>
    %101 = arith.truncf %100 : vector<64x32xf32> to vector<64x32xbf16>
    %c0_46 = arith.constant 0 : index
    %c0_47 = arith.constant 0 : index
    %102 = vector.load %arg15[%c0_46, %c0_47] : memref<32x32xf32, #tpu.memory_space<vmem>>, vector<32x32xf32>
    %103 = arith.truncf %102 : vector<32x32xf32> to vector<32x32xbf16>
    %cst_48 = arith.constant dense<0.000000e+00> : vector<64x32xf32>
    %104 = tpu.matmul %101, %103, %cst_48 {dimension_numbers = #tpu.dot_dimension_numbers<[1], [0], [0], [1], [0, 0, 1, 1], [], []>} : vector<64x32xbf16>, vector<32x32xbf16>, vector<64x32xf32> -> vector<64x32xf32>
    %105 = vector.shape_cast %99 : vector<2x32x32xf32> to vector<64x32xf32>
    %106 = arith.truncf %105 : vector<64x32xf32> to vector<64x32xbf16>
    %c0_49 = arith.constant 0 : index
    %c0_50 = arith.constant 0 : index
    %107 = vector.load %arg16[%c0_49, %c0_50] : memref<32x32xf32, #tpu.memory_space<vmem>>, vector<32x32xf32>
    %108 = arith.truncf %107 : vector<32x32xf32> to vector<32x32xbf16>
    %cst_51 = arith.constant dense<0.000000e+00> : vector<64x32xf32>
    %109 = tpu.matmul %106, %108, %cst_51 {dimension_numbers = #tpu.dot_dimension_numbers<[1], [0], [0], [1], [0, 0, 1, 1], [], []>} : vector<64x32xbf16>, vector<32x32xbf16>, vector<64x32xf32> -> vector<64x32xf32>
    %110 = arith.addf %104, %109 : vector<64x32xf32>
    %c0_52 = arith.constant 0 : index
    %c0_53 = arith.constant 0 : index
    %111 = vector.load %arg17[%c0_52, %c0_53] : memref<1x32xf32, #tpu.memory_space<vmem>>, vector<1x32xf32>
    %112 = vector.broadcast %111 : vector<1x32xf32> to vector<64x32xf32>
    %113 = arith.addf %110, %112 : vector<64x32xf32>
    %114 = vector.shape_cast %113 : vector<64x32xf32> to vector<2x32x32xf32>
    %cst_54 = arith.constant 0.000000e+00 : f32
    %115 = vector.broadcast %cst_54 : f32 to vector<2x32x32xf32>
    %116 = arith.maximumf %114, %115 : vector<2x32x32xf32>
    %cst_55 = arith.constant dense<0.000000e+00> : vector<2x32xf32>
    %117 = vector.multi_reduction <add>, %116, %cst_55 [1] : vector<2x32x32xf32> to vector<2x32xf32>
    %118 = vector.shape_cast %117 : vector<2x32xf32> to vector<2x1x32xf32>
    %cst_56 = arith.constant 3.125000e-02 : f32
    %119 = vector.broadcast %cst_56 : f32 to vector<2x1x32xf32>
    %120 = arith.mulf %118, %119 : vector<2x1x32xf32>
    %c0_57 = arith.constant 0 : index
    %c0_58 = arith.constant 0 : index
    %c0_59 = arith.constant 0 : index
    %121 = vector.load %arg18[%c0_57, %c0_58, %c0_59] : memref<2x1x32xf32, #tpu.memory_space<vmem>>, vector<2x1x32xf32>
    tpu.vector_store %arg18[%c0_57, %c0_58, %c0_59], %120 {strides = array<i32>} : memref<2x1x32xf32, #tpu.memory_space<vmem>>, vector<2x1x32xf32>,
    %cst_60 = arith.constant dense<0xFF800000> : vector<2x32xf32>
    %122 = vector.multi_reduction <maximumf>, %65, %cst_60 [2] : vector<2x32x8xf32> to vector<2x32xf32>
    %123 = vector.shape_cast %122 : vector<2x32xf32> to vector<2x32x1xf32>
    %124 = vector.broadcast %123 : vector<2x32x1xf32> to vector<2x32x8xf32>
    %125 = arith.subf %65, %124 : vector<2x32x8xf32>
    %126 = math.exp %125 : vector<2x32x8xf32>
    %cst_61 = arith.constant dense<0.000000e+00> : vector<2x32xf32>
    %127 = vector.multi_reduction <add>, %126, %cst_61 [2] : vector<2x32x8xf32> to vector<2x32xf32>
    %128 = vector.shape_cast %127 : vector<2x32xf32> to vector<2x32x1xf32>
    %129 = tpu.reciprocal %128 {approx = true} : vector<2x32x1xf32> -> vector<2x32x1xf32>
    %130 = vector.broadcast %129 : vector<2x32x1xf32> to vector<2x32x8xf32>
    %131 = arith.mulf %126, %130 : vector<2x32x8xf32>
    %132 = vector.broadcast %15 : vector<2x32x1xf32> to vector<2x32x8xf32>
    %133 = arith.mulf %131, %132 : vector<2x32x8xf32>
    %134 = vector.broadcast %15 : vector<2x32x1xf32> to vector<2x32x32xf32>
    %135 = arith.mulf %116, %134 : vector<2x32x32xf32>
    %136 = arith.truncf %133 : vector<2x32x8xf32> to vector<2x32x8xbf16>
    %137 = tpu.transpose %136, [0, 2, 1] : vector<2x32x8xbf16> -> vector<2x8x32xbf16>
    %138 = arith.truncf %135 : vector<2x32x32xf32> to vector<2x32x32xbf16>
    "tpu.trace_start"() <{level = 10 : i32, message = "bcn,bnh->bch"}> : () -> ()
    %cst_62 = arith.constant dense<0.000000e+00> : vector<2x8x32xf32>
    %139 = tpu.matmul %137, %138, %cst_62 {dimension_numbers = #tpu.dot_dimension_numbers<[2], [1], [1], [2], [0, 0, 0, 1, 1, 2], [0], [0]>} : vector<2x8x32xbf16>, vector<2x32x32xbf16>, vector<2x8x32xf32> -> vector<2x8x32xf32>
    "tpu.trace_stop"() : () -> ()
    %c0_63 = arith.constant 0 : index
    %c0_64 = arith.constant 0 : index
    %c0_65 = arith.constant 0 : index
    %140 = vector.load %arg19[%c0_63, %c0_64, %c0_65] : memref<2x8x32xf32, #tpu.memory_space<vmem>>, vector<2x8x32xf32>
    tpu.vector_store %arg19[%c0_63, %c0_64, %c0_65], %139 {strides = array<i32>} : memref<2x8x32xf32, #tpu.memory_space<vmem>>, vector<2x8x32xf32>,
    %141 = arith.truncf %0 : vector<2x32x32xf32> to vector<2x32x32xbf16>
    "tpu.trace_start"() <{level = 10 : i32, message = "bcn,bnm->bcm"}> : () -> ()
    %cst_66 = arith.constant dense<0.000000e+00> : vector<2x8x32xf32>
    %142 = tpu.matmul %137, %141, %cst_66 {dimension_numbers = #tpu.dot_dimension_numbers<[2], [1], [1], [2], [0, 0, 0, 1, 1, 2], [0], [0]>} : vector<2x8x32xbf16>, vector<2x32x32xbf16>, vector<2x8x32xf32> -> vector<2x8x32xf32>
    "tpu.trace_stop"() : () -> ()
    %143 = arith.truncf %142 : vector<2x8x32xf32> to vector<2x8x32xbf16>
    "tpu.trace_start"() <{level = 10 : i32, message = "bcm,bmk->bck"}> : () -> ()
    %cst_67 = arith.constant dense<0.000000e+00> : vector<2x8x8xf32>
    %144 = tpu.matmul %143, %136, %cst_67 {dimension_numbers = #tpu.dot_dimension_numbers<[2], [1], [1], [2], [0, 0, 0, 1, 1, 2], [0], [0]>} : vector<2x8x32xbf16>, vector<2x32x8xbf16>, vector<2x8x8xf32> -> vector<2x8x8xf32>
    "tpu.trace_stop"() : () -> ()
    %c0_68 = arith.constant 0 : index
    %c0_69 = arith.constant 0 : index
    %c0_70 = arith.constant 0 : index
    %145 = vector.load %arg20[%c0_68, %c0_69, %c0_70] : memref<2x8x8xf32, #tpu.memory_space<vmem>>, vector<2x8x8xf32>
    tpu.vector_store %arg20[%c0_68, %c0_69, %c0_70], %144 {strides = array<i32>} : memref<2x8x8xf32, #tpu.memory_space<vmem>>, vector<2x8x8xf32>,
    return
  }
  func.func @transform_0(%arg0: i32) -> (i32, i32, i32) {
    %c0_i32 = arith.constant 0 : i32
    %c0_i32_0 = arith.constant 0 : i32
    %c0_i32_1 = arith.constant 0 : i32
    return %arg0, %c0_i32, %c0_i32_0 : i32, i32, i32
  }
  func.func @transform_1(%arg0: i32) -> (i32, i32, i32) {
    %c0_i32 = arith.constant 0 : i32
    %c0_i32_0 = arith.constant 0 : i32
    %c0_i32_1 = arith.constant 0 : i32
    return %arg0, %c0_i32, %c0_i32_0 : i32, i32, i32
  }
  func.func @transform_2(%arg0: i32) -> (i32, i32, i32) {
    %c0_i32 = arith.constant 0 : i32
    %c0_i32_0 = arith.constant 0 : i32
    %c0_i32_1 = arith.constant 0 : i32
    return %arg0, %c0_i32, %c0_i32_0 : i32, i32, i32
  }
  func.func @transform_3(%arg0: i32) -> (i32, i32) {
    %c0_i32 = arith.constant 0 : i32
    %c0_i32_0 = arith.constant 0 : i32
    %c0_i32_1 = arith.constant 0 : i32
    return %c0_i32, %c0_i32_0 : i32, i32
  }
  func.func @transform_4(%arg0: i32) -> (i32, i32) {
    %c0_i32 = arith.constant 0 : i32
    %c0_i32_0 = arith.constant 0 : i32
    %c0_i32_1 = arith.constant 0 : i32
    return %c0_i32, %c0_i32_0 : i32, i32
  }
  func.func @transform_5(%arg0: i32) -> (i32, i32) {
    %c0_i32 = arith.constant 0 : i32
    %c0_i32_0 = arith.constant 0 : i32
    %c0_i32_1 = arith.constant 0 : i32
    return %c0_i32, %c0_i32_0 : i32, i32
  }
  func.func @transform_6(%arg0: i32) -> (i32, i32) {
    %c0_i32 = arith.constant 0 : i32
    %c0_i32_0 = arith.constant 0 : i32
    %c0_i32_1 = arith.constant 0 : i32
    return %c0_i32, %c0_i32_0 : i32, i32
  }
  func.func @transform_7(%arg0: i32) -> (i32, i32) {
    %c0_i32 = arith.constant 0 : i32
    %c0_i32_0 = arith.constant 0 : i32
    %c0_i32_1 = arith.constant 0 : i32
    return %c0_i32, %c0_i32_0 : i32, i32
  }
  func.func @transform_8(%arg0: i32) -> (i32, i32) {
    %c0_i32 = arith.constant 0 : i32
    %c0_i32_0 = arith.constant 0 : i32
    %c0_i32_1 = arith.constant 0 : i32
    return %c0_i32, %c0_i32_0 : i32, i32
  }
  func.func @transform_9(%arg0: i32) -> (i32, i32) {
    %c0_i32 = arith.constant 0 : i32
    %c0_i32_0 = arith.constant 0 : i32
    %c0_i32_1 = arith.constant 0 : i32
    return %c0_i32, %c0_i32_0 : i32, i32
  }
  func.func @transform_10(%arg0: i32) -> (i32, i32) {
    %c0_i32 = arith.constant 0 : i32
    %c0_i32_0 = arith.constant 0 : i32
    %c0_i32_1 = arith.constant 0 : i32
    return %c0_i32, %c0_i32_0 : i32, i32
  }
  func.func @transform_11(%arg0: i32) -> (i32, i32) {
    %c0_i32 = arith.constant 0 : i32
    %c0_i32_0 = arith.constant 0 : i32
    %c0_i32_1 = arith.constant 0 : i32
    return %c0_i32, %c0_i32_0 : i32, i32
  }
  func.func @transform_12(%arg0: i32) -> (i32, i32) {
    %c0_i32 = arith.constant 0 : i32
    %c0_i32_0 = arith.constant 0 : i32
    %c0_i32_1 = arith.constant 0 : i32
    return %c0_i32, %c0_i32_0 : i32, i32
  }
  func.func @transform_13(%arg0: i32) -> (i32, i32) {
    %c0_i32 = arith.constant 0 : i32
    %c0_i32_0 = arith.constant 0 : i32
    %c0_i32_1 = arith.constant 0 : i32
    return %c0_i32, %c0_i32_0 : i32, i32
  }
  func.func @transform_14(%arg0: i32) -> (i32, i32) {
    %c0_i32 = arith.constant 0 : i32
    %c0_i32_0 = arith.constant 0 : i32
    %c0_i32_1 = arith.constant 0 : i32
    return %c0_i32, %c0_i32_0 : i32, i32
  }
  func.func @transform_15(%arg0: i32) -> (i32, i32) {
    %c0_i32 = arith.constant 0 : i32
    %c0_i32_0 = arith.constant 0 : i32
    %c0_i32_1 = arith.constant 0 : i32
    return %c0_i32, %c0_i32_0 : i32, i32
  }
  func.func @transform_16(%arg0: i32) -> (i32, i32) {
    %c0_i32 = arith.constant 0 : i32
    %c0_i32_0 = arith.constant 0 : i32
    %c0_i32_1 = arith.constant 0 : i32
    return %c0_i32, %c0_i32_0 : i32, i32
  }
  func.func @transform_17(%arg0: i32) -> (i32, i32, i32) {
    %c0_i32 = arith.constant 0 : i32
    %c0_i32_0 = arith.constant 0 : i32
    %c0_i32_1 = arith.constant 0 : i32
    return %arg0, %c0_i32, %c0_i32_0 : i32, i32, i32
  }
  func.func @transform_18(%arg0: i32) -> (i32, i32, i32) {
    %c0_i32 = arith.constant 0 : i32
    %c0_i32_0 = arith.constant 0 : i32
    %c0_i32_1 = arith.constant 0 : i32
    return %arg0, %c0_i32, %c0_i32_0 : i32, i32, i32
  }
  func.func @transform_19(%arg0: i32) -> (i32, i32, i32) {
    %c0_i32 = arith.constant 0 : i32
    %c0_i32_0 = arith.constant 0 : i32
    %c0_i32_1 = arith.constant 0 : i32
    return %arg0, %c0_i32, %c0_i32_0 : i32, i32, i32
  }
}

module attributes {stable_mosaic.version = 11 : i64} {
  func.func @_level_kernel(%arg0: i32, %arg1: memref<2x8x32xf32, #tpu.memory_space<vmem>>, %arg2: memref<2x8x8xf32, #tpu.memory_space<vmem>>, %arg3: memref<2x8x1xf32, #tpu.memory_space<vmem>>, %arg4: memref<32x32xf32, #tpu.memory_space<vmem>>, %arg5: memref<1x32xf32, #tpu.memory_space<vmem>>, %arg6: memref<32x2xf32, #tpu.memory_space<vmem>>, %arg7: memref<1x2xf32, #tpu.memory_space<vmem>>, %arg8: memref<32x2xf32, #tpu.memory_space<vmem>>, %arg9: memref<2x2xf32, #tpu.memory_space<vmem>>, %arg10: memref<1x2xf32, #tpu.memory_space<vmem>>, %arg11: memref<32x32xf32, #tpu.memory_space<vmem>>, %arg12: memref<1x32xf32, #tpu.memory_space<vmem>>, %arg13: memref<32x32xf32, #tpu.memory_space<vmem>>, %arg14: memref<1x32xf32, #tpu.memory_space<vmem>>, %arg15: memref<32x32xf32, #tpu.memory_space<vmem>>, %arg16: memref<32x32xf32, #tpu.memory_space<vmem>>, %arg17: memref<1x32xf32, #tpu.memory_space<vmem>>, %arg18: memref<2x1x32xf32, #tpu.memory_space<vmem>>, %arg19: memref<2x2x32xf32, #tpu.memory_space<vmem>>, %arg20: memref<2x2x2xf32, #tpu.memory_space<vmem>>) attributes {dimension_semantics = [#tpu.dimension_semantics<parallel>], iteration_bounds = array<i64: 2>, scalar_prefetch = 0 : i64, scratch_operands = 0 : i64, tpu.core_type = #tpu.core_type<tc>, window_params = [{transform_indices = @transform_0, window_bounds = array<i64: 2, 8, 32>}, {transform_indices = @transform_1, window_bounds = array<i64: 2, 8, 8>}, {transform_indices = @transform_2, window_bounds = array<i64: 2, 8, 1>}, {pipeline_mode = #tpu.pipeline_mode<synchronous>, transform_indices = @transform_3, window_bounds = array<i64: 32, 32>}, {pipeline_mode = #tpu.pipeline_mode<synchronous>, transform_indices = @transform_4, window_bounds = array<i64: 1, 32>}, {pipeline_mode = #tpu.pipeline_mode<synchronous>, transform_indices = @transform_5, window_bounds = array<i64: 32, 2>}, {pipeline_mode = #tpu.pipeline_mode<synchronous>, transform_indices = @transform_6, window_bounds = array<i64: 1, 2>}, {pipeline_mode = #tpu.pipeline_mode<synchronous>, transform_indices = @transform_7, window_bounds = array<i64: 32, 2>}, {pipeline_mode = #tpu.pipeline_mode<synchronous>, transform_indices = @transform_8, window_bounds = array<i64: 2, 2>}, {pipeline_mode = #tpu.pipeline_mode<synchronous>, transform_indices = @transform_9, window_bounds = array<i64: 1, 2>}, {pipeline_mode = #tpu.pipeline_mode<synchronous>, transform_indices = @transform_10, window_bounds = array<i64: 32, 32>}, {pipeline_mode = #tpu.pipeline_mode<synchronous>, transform_indices = @transform_11, window_bounds = array<i64: 1, 32>}, {pipeline_mode = #tpu.pipeline_mode<synchronous>, transform_indices = @transform_12, window_bounds = array<i64: 32, 32>}, {pipeline_mode = #tpu.pipeline_mode<synchronous>, transform_indices = @transform_13, window_bounds = array<i64: 1, 32>}, {pipeline_mode = #tpu.pipeline_mode<synchronous>, transform_indices = @transform_14, window_bounds = array<i64: 32, 32>}, {pipeline_mode = #tpu.pipeline_mode<synchronous>, transform_indices = @transform_15, window_bounds = array<i64: 32, 32>}, {pipeline_mode = #tpu.pipeline_mode<synchronous>, transform_indices = @transform_16, window_bounds = array<i64: 1, 32>}, {transform_indices = @transform_17, window_bounds = array<i64: 2, 1, 32>}, {transform_indices = @transform_18, window_bounds = array<i64: 2, 2, 32>}, {transform_indices = @transform_19, window_bounds = array<i64: 2, 2, 2>}]} {
    %c0 = arith.constant 0 : index
    %c0_0 = arith.constant 0 : index
    %c0_1 = arith.constant 0 : index
    %0 = vector.load %arg2[%c0, %c0_0, %c0_1] : memref<2x8x8xf32, #tpu.memory_space<vmem>>, vector<2x8x8xf32>
    %1 = tpu.iota {dimensions = array<i32: 0>} : vector<8x8xi32>
    %2 = tpu.iota {dimensions = array<i32: 1>} : vector<8x8xi32>
    %3 = arith.cmpi eq, %1, %2 : vector<8x8xi32>
    %4 = vector.shape_cast %3 : vector<8x8xi1> to vector<1x8x8xi1>
    %cst = arith.constant 1.000000e+00 : f32
    %5 = vector.shape_cast %4 : vector<1x8x8xi1> to vector<1x8x8xi1>
    %6 = vector.broadcast %5 : vector<1x8x8xi1> to vector<2x8x8xi1>
    %7 = vector.broadcast %cst : f32 to vector<2x8x8xf32>
    %8 = arith.select %6, %7, %0 : vector<2x8x8xi1>, vector<2x8x8xf32>
    %cst_2 = arith.constant dense<0.000000e+00> : vector<2x8xf32>
    %9 = vector.multi_reduction <add>, %8, %cst_2 [2] : vector<2x8x8xf32> to vector<2x8xf32>
    %10 = vector.shape_cast %9 : vector<2x8xf32> to vector<2x8x1xf32>
    %cst_3 = arith.constant 1.000000e+00 : f32
    %11 = vector.broadcast %cst_3 : f32 to vector<2x8x1xf32>
    %12 = arith.maximumf %10, %11 : vector<2x8x1xf32>
    %13 = tpu.reciprocal %12 {approx = true} : vector<2x8x1xf32> -> vector<2x8x1xf32>
    %14 = arith.truncf %8 : vector<2x8x8xf32> to vector<2x8x8xbf16>
    %c0_4 = arith.constant 0 : index
    %c0_5 = arith.constant 0 : index
    %c0_6 = arith.constant 0 : index
    %15 = vector.load %arg1[%c0_4, %c0_5, %c0_6] : memref<2x8x32xf32, #tpu.memory_space<vmem>>, vector<2x8x32xf32>
    %16 = arith.truncf %15 : vector<2x8x32xf32> to vector<2x8x32xbf16>
    "tpu.trace_start"() <{level = 10 : i32, message = "bnm,bmf->bnf"}> : () -> ()
    %cst_7 = arith.constant dense<0.000000e+00> : vector<2x8x32xf32>
    %17 = tpu.matmul %14, %16, %cst_7 {dimension_numbers = #tpu.dot_dimension_numbers<[2], [1], [1], [2], [0, 0, 0, 1, 1, 2], [0], [0]>} : vector<2x8x8xbf16>, vector<2x8x32xbf16>, vector<2x8x32xf32> -> vector<2x8x32xf32>
    "tpu.trace_stop"() : () -> ()
    %18 = vector.broadcast %13 : vector<2x8x1xf32> to vector<2x8x32xf32>
    %19 = arith.mulf %17, %18 : vector<2x8x32xf32>
    %20 = vector.shape_cast %19 : vector<2x8x32xf32> to vector<16x32xf32>
    %21 = arith.truncf %20 : vector<16x32xf32> to vector<16x32xbf16>
    %c0_8 = arith.constant 0 : index
    %c0_9 = arith.constant 0 : index
    %22 = vector.load %arg4[%c0_8, %c0_9] : memref<32x32xf32, #tpu.memory_space<vmem>>, vector<32x32xf32>
    %23 = arith.truncf %22 : vector<32x32xf32> to vector<32x32xbf16>
    %cst_10 = arith.constant dense<0.000000e+00> : vector<16x32xf32>
    %24 = tpu.matmul %21, %23, %cst_10 {dimension_numbers = #tpu.dot_dimension_numbers<[1], [0], [0], [1], [0, 0, 1, 1], [], []>} : vector<16x32xbf16>, vector<32x32xbf16>, vector<16x32xf32> -> vector<16x32xf32>
    %c0_11 = arith.constant 0 : index
    %c0_12 = arith.constant 0 : index
    %25 = vector.load %arg5[%c0_11, %c0_12] : memref<1x32xf32, #tpu.memory_space<vmem>>, vector<1x32xf32>
    %26 = vector.broadcast %25 : vector<1x32xf32> to vector<16x32xf32>
    %27 = arith.addf %24, %26 : vector<16x32xf32>
    %28 = vector.shape_cast %27 : vector<16x32xf32> to vector<2x8x32xf32>
    %cst_13 = arith.constant 0.000000e+00 : f32
    %29 = vector.broadcast %cst_13 : f32 to vector<2x8x32xf32>
    %30 = arith.maximumf %28, %29 : vector<2x8x32xf32>
    %31 = arith.truncf %30 : vector<2x8x32xf32> to vector<2x8x32xbf16>
    "tpu.trace_start"() <{level = 10 : i32, message = "bnm,bmf->bnf"}> : () -> ()
    %cst_14 = arith.constant dense<0.000000e+00> : vector<2x8x32xf32>
    %32 = tpu.matmul %14, %31, %cst_14 {dimension_numbers = #tpu.dot_dimension_numbers<[2], [1], [1], [2], [0, 0, 0, 1, 1, 2], [0], [0]>} : vector<2x8x8xbf16>, vector<2x8x32xbf16>, vector<2x8x32xf32> -> vector<2x8x32xf32>
    "tpu.trace_stop"() : () -> ()
    %33 = vector.broadcast %13 : vector<2x8x1xf32> to vector<2x8x32xf32>
    %34 = arith.mulf %32, %33 : vector<2x8x32xf32>
    %35 = vector.shape_cast %34 : vector<2x8x32xf32> to vector<16x32xf32>
    %36 = arith.truncf %35 : vector<16x32xf32> to vector<16x32xbf16>
    %c0_15 = arith.constant 0 : index
    %c0_16 = arith.constant 0 : index
    %37 = vector.load %arg6[%c0_15, %c0_16] : memref<32x2xf32, #tpu.memory_space<vmem>>, vector<32x2xf32>
    %38 = arith.truncf %37 : vector<32x2xf32> to vector<32x2xbf16>
    %cst_17 = arith.constant dense<0.000000e+00> : vector<16x2xf32>
    %39 = tpu.matmul %36, %38, %cst_17 {dimension_numbers = #tpu.dot_dimension_numbers<[1], [0], [0], [1], [0, 0, 1, 1], [], []>} : vector<16x32xbf16>, vector<32x2xbf16>, vector<16x2xf32> -> vector<16x2xf32>
    %c0_18 = arith.constant 0 : index
    %c0_19 = arith.constant 0 : index
    %40 = vector.load %arg7[%c0_18, %c0_19] : memref<1x2xf32, #tpu.memory_space<vmem>>, vector<1x2xf32>
    %41 = vector.broadcast %40 : vector<1x2xf32> to vector<16x2xf32>
    %42 = arith.addf %39, %41 : vector<16x2xf32>
    %43 = vector.shape_cast %42 : vector<16x2xf32> to vector<2x8x2xf32>
    %cst_20 = arith.constant 0.000000e+00 : f32
    %44 = vector.broadcast %cst_20 : f32 to vector<2x8x2xf32>
    %45 = arith.maximumf %43, %44 : vector<2x8x2xf32>
    %46 = vector.shape_cast %30 : vector<2x8x32xf32> to vector<16x32xf32>
    %47 = arith.truncf %46 : vector<16x32xf32> to vector<16x32xbf16>
    %c0_21 = arith.constant 0 : index
    %c0_22 = arith.constant 0 : index
    %48 = vector.load %arg8[%c0_21, %c0_22] : memref<32x2xf32, #tpu.memory_space<vmem>>, vector<32x2xf32>
    %49 = arith.truncf %48 : vector<32x2xf32> to vector<32x2xbf16>
    %cst_23 = arith.constant dense<0.000000e+00> : vector<16x2xf32>
    %50 = tpu.matmul %47, %49, %cst_23 {dimension_numbers = #tpu.dot_dimension_numbers<[1], [0], [0], [1], [0, 0, 1, 1], [], []>} : vector<16x32xbf16>, vector<32x2xbf16>, vector<16x2xf32> -> vector<16x2xf32>
    %51 = vector.shape_cast %45 : vector<2x8x2xf32> to vector<16x2xf32>
    %52 = arith.truncf %51 : vector<16x2xf32> to vector<16x2xbf16>
    %c0_24 = arith.constant 0 : index
    %c0_25 = arith.constant 0 : index
    %53 = vector.load %arg9[%c0_24, %c0_25] : memref<2x2xf32, #tpu.memory_space<vmem>>, vector<2x2xf32>
    %54 = arith.truncf %53 : vector<2x2xf32> to vector<2x2xbf16>
    %cst_26 = arith.constant dense<0.000000e+00> : vector<16x2xf32>
    %55 = tpu.matmul %52, %54, %cst_26 {dimension_numbers = #tpu.dot_dimension_numbers<[1], [0], [0], [1], [0, 0, 1, 1], [], []>} : vector<16x2xbf16>, vector<2x2xbf16>, vector<16x2xf32> -> vector<16x2xf32>
    %56 = arith.addf %50, %55 : vector<16x2xf32>
    %c0_27 = arith.constant 0 : index
    %c0_28 = arith.constant 0 : index
    %57 = vector.load %arg10[%c0_27, %c0_28] : memref<1x2xf32, #tpu.memory_space<vmem>>, vector<1x2xf32>
    %58 = vector.broadcast %57 : vector<1x2xf32> to vector<16x2xf32>
    %59 = arith.addf %56, %58 : vector<16x2xf32>
    %60 = vector.shape_cast %59 : vector<16x2xf32> to vector<2x8x2xf32>
    %61 = arith.truncf %15 : vector<2x8x32xf32> to vector<2x8x32xbf16>
    "tpu.trace_start"() <{level = 10 : i32, message = "bnm,bmf->bnf"}> : () -> ()
    %cst_29 = arith.constant dense<0.000000e+00> : vector<2x8x32xf32>
    %62 = tpu.matmul %14, %61, %cst_29 {dimension_numbers = #tpu.dot_dimension_numbers<[2], [1], [1], [2], [0, 0, 0, 1, 1, 2], [0], [0]>} : vector<2x8x8xbf16>, vector<2x8x32xbf16>, vector<2x8x32xf32> -> vector<2x8x32xf32>
    "tpu.trace_stop"() : () -> ()
    %63 = vector.broadcast %13 : vector<2x8x1xf32> to vector<2x8x32xf32>
    %64 = arith.mulf %62, %63 : vector<2x8x32xf32>
    %65 = vector.shape_cast %64 : vector<2x8x32xf32> to vector<16x32xf32>
    %66 = arith.truncf %65 : vector<16x32xf32> to vector<16x32xbf16>
    %c0_30 = arith.constant 0 : index
    %c0_31 = arith.constant 0 : index
    %67 = vector.load %arg11[%c0_30, %c0_31] : memref<32x32xf32, #tpu.memory_space<vmem>>, vector<32x32xf32>
    %68 = arith.truncf %67 : vector<32x32xf32> to vector<32x32xbf16>
    %cst_32 = arith.constant dense<0.000000e+00> : vector<16x32xf32>
    %69 = tpu.matmul %66, %68, %cst_32 {dimension_numbers = #tpu.dot_dimension_numbers<[1], [0], [0], [1], [0, 0, 1, 1], [], []>} : vector<16x32xbf16>, vector<32x32xbf16>, vector<16x32xf32> -> vector<16x32xf32>
    %c0_33 = arith.constant 0 : index
    %c0_34 = arith.constant 0 : index
    %70 = vector.load %arg12[%c0_33, %c0_34] : memref<1x32xf32, #tpu.memory_space<vmem>>, vector<1x32xf32>
    %71 = vector.broadcast %70 : vector<1x32xf32> to vector<16x32xf32>
    %72 = arith.addf %69, %71 : vector<16x32xf32>
    %73 = vector.shape_cast %72 : vector<16x32xf32> to vector<2x8x32xf32>
    %cst_35 = arith.constant 0.000000e+00 : f32
    %74 = vector.broadcast %cst_35 : f32 to vector<2x8x32xf32>
    %75 = arith.maximumf %73, %74 : vector<2x8x32xf32>
    %76 = arith.truncf %75 : vector<2x8x32xf32> to vector<2x8x32xbf16>
    "tpu.trace_start"() <{level = 10 : i32, message = "bnm,bmf->bnf"}> : () -> ()
    %cst_36 = arith.constant dense<0.000000e+00> : vector<2x8x32xf32>
    %77 = tpu.matmul %14, %76, %cst_36 {dimension_numbers = #tpu.dot_dimension_numbers<[2], [1], [1], [2], [0, 0, 0, 1, 1, 2], [0], [0]>} : vector<2x8x8xbf16>, vector<2x8x32xbf16>, vector<2x8x32xf32> -> vector<2x8x32xf32>
    "tpu.trace_stop"() : () -> ()
    %78 = vector.broadcast %13 : vector<2x8x1xf32> to vector<2x8x32xf32>
    %79 = arith.mulf %77, %78 : vector<2x8x32xf32>
    %80 = vector.shape_cast %79 : vector<2x8x32xf32> to vector<16x32xf32>
    %81 = arith.truncf %80 : vector<16x32xf32> to vector<16x32xbf16>
    %c0_37 = arith.constant 0 : index
    %c0_38 = arith.constant 0 : index
    %82 = vector.load %arg13[%c0_37, %c0_38] : memref<32x32xf32, #tpu.memory_space<vmem>>, vector<32x32xf32>
    %83 = arith.truncf %82 : vector<32x32xf32> to vector<32x32xbf16>
    %cst_39 = arith.constant dense<0.000000e+00> : vector<16x32xf32>
    %84 = tpu.matmul %81, %83, %cst_39 {dimension_numbers = #tpu.dot_dimension_numbers<[1], [0], [0], [1], [0, 0, 1, 1], [], []>} : vector<16x32xbf16>, vector<32x32xbf16>, vector<16x32xf32> -> vector<16x32xf32>
    %c0_40 = arith.constant 0 : index
    %c0_41 = arith.constant 0 : index
    %85 = vector.load %arg14[%c0_40, %c0_41] : memref<1x32xf32, #tpu.memory_space<vmem>>, vector<1x32xf32>
    %86 = vector.broadcast %85 : vector<1x32xf32> to vector<16x32xf32>
    %87 = arith.addf %84, %86 : vector<16x32xf32>
    %88 = vector.shape_cast %87 : vector<16x32xf32> to vector<2x8x32xf32>
    %cst_42 = arith.constant 0.000000e+00 : f32
    %89 = vector.broadcast %cst_42 : f32 to vector<2x8x32xf32>
    %90 = arith.maximumf %88, %89 : vector<2x8x32xf32>
    %91 = vector.shape_cast %75 : vector<2x8x32xf32> to vector<16x32xf32>
    %92 = arith.truncf %91 : vector<16x32xf32> to vector<16x32xbf16>
    %c0_43 = arith.constant 0 : index
    %c0_44 = arith.constant 0 : index
    %93 = vector.load %arg15[%c0_43, %c0_44] : memref<32x32xf32, #tpu.memory_space<vmem>>, vector<32x32xf32>
    %94 = arith.truncf %93 : vector<32x32xf32> to vector<32x32xbf16>
    %cst_45 = arith.constant dense<0.000000e+00> : vector<16x32xf32>
    %95 = tpu.matmul %92, %94, %cst_45 {dimension_numbers = #tpu.dot_dimension_numbers<[1], [0], [0], [1], [0, 0, 1, 1], [], []>} : vector<16x32xbf16>, vector<32x32xbf16>, vector<16x32xf32> -> vector<16x32xf32>
    %96 = vector.shape_cast %90 : vector<2x8x32xf32> to vector<16x32xf32>
    %97 = arith.truncf %96 : vector<16x32xf32> to vector<16x32xbf16>
    %c0_46 = arith.constant 0 : index
    %c0_47 = arith.constant 0 : index
    %98 = vector.load %arg16[%c0_46, %c0_47] : memref<32x32xf32, #tpu.memory_space<vmem>>, vector<32x32xf32>
    %99 = arith.truncf %98 : vector<32x32xf32> to vector<32x32xbf16>
    %cst_48 = arith.constant dense<0.000000e+00> : vector<16x32xf32>
    %100 = tpu.matmul %97, %99, %cst_48 {dimension_numbers = #tpu.dot_dimension_numbers<[1], [0], [0], [1], [0, 0, 1, 1], [], []>} : vector<16x32xbf16>, vector<32x32xbf16>, vector<16x32xf32> -> vector<16x32xf32>
    %101 = arith.addf %95, %100 : vector<16x32xf32>
    %c0_49 = arith.constant 0 : index
    %c0_50 = arith.constant 0 : index
    %102 = vector.load %arg17[%c0_49, %c0_50] : memref<1x32xf32, #tpu.memory_space<vmem>>, vector<1x32xf32>
    %103 = vector.broadcast %102 : vector<1x32xf32> to vector<16x32xf32>
    %104 = arith.addf %101, %103 : vector<16x32xf32>
    %105 = vector.shape_cast %104 : vector<16x32xf32> to vector<2x8x32xf32>
    %cst_51 = arith.constant 0.000000e+00 : f32
    %106 = vector.broadcast %cst_51 : f32 to vector<2x8x32xf32>
    %107 = arith.maximumf %105, %106 : vector<2x8x32xf32>
    %cst_52 = arith.constant dense<0.000000e+00> : vector<2x32xf32>
    %108 = vector.multi_reduction <add>, %107, %cst_52 [1] : vector<2x8x32xf32> to vector<2x32xf32>
    %109 = vector.shape_cast %108 : vector<2x32xf32> to vector<2x1x32xf32>
    %cst_53 = arith.constant 1.250000e-01 : f32
    %110 = vector.broadcast %cst_53 : f32 to vector<2x1x32xf32>
    %111 = arith.mulf %109, %110 : vector<2x1x32xf32>
    %c0_54 = arith.constant 0 : index
    %c0_55 = arith.constant 0 : index
    %c0_56 = arith.constant 0 : index
    %112 = vector.load %arg18[%c0_54, %c0_55, %c0_56] : memref<2x1x32xf32, #tpu.memory_space<vmem>>, vector<2x1x32xf32>
    tpu.vector_store %arg18[%c0_54, %c0_55, %c0_56], %111 {strides = array<i32>} : memref<2x1x32xf32, #tpu.memory_space<vmem>>, vector<2x1x32xf32>,
    %cst_57 = arith.constant dense<0xFF800000> : vector<2x8xf32>
    %113 = vector.multi_reduction <maximumf>, %60, %cst_57 [2] : vector<2x8x2xf32> to vector<2x8xf32>
    %114 = vector.shape_cast %113 : vector<2x8xf32> to vector<2x8x1xf32>
    %115 = vector.broadcast %114 : vector<2x8x1xf32> to vector<2x8x2xf32>
    %116 = arith.subf %60, %115 : vector<2x8x2xf32>
    %117 = math.exp %116 : vector<2x8x2xf32>
    %cst_58 = arith.constant dense<0.000000e+00> : vector<2x8xf32>
    %118 = vector.multi_reduction <add>, %117, %cst_58 [2] : vector<2x8x2xf32> to vector<2x8xf32>
    %119 = vector.shape_cast %118 : vector<2x8xf32> to vector<2x8x1xf32>
    %120 = tpu.reciprocal %119 {approx = true} : vector<2x8x1xf32> -> vector<2x8x1xf32>
    %121 = vector.broadcast %120 : vector<2x8x1xf32> to vector<2x8x2xf32>
    %122 = arith.mulf %117, %121 : vector<2x8x2xf32>
    %123 = arith.truncf %122 : vector<2x8x2xf32> to vector<2x8x2xbf16>
    %124 = tpu.transpose %123, [0, 2, 1] : vector<2x8x2xbf16> -> vector<2x2x8xbf16>
    %125 = arith.truncf %107 : vector<2x8x32xf32> to vector<2x8x32xbf16>
    "tpu.trace_start"() <{level = 10 : i32, message = "bcn,bnh->bch"}> : () -> ()
    %cst_59 = arith.constant dense<0.000000e+00> : vector<2x2x32xf32>
    %126 = tpu.matmul %124, %125, %cst_59 {dimension_numbers = #tpu.dot_dimension_numbers<[2], [1], [1], [2], [0, 0, 0, 1, 1, 2], [0], [0]>} : vector<2x2x8xbf16>, vector<2x8x32xbf16>, vector<2x2x32xf32> -> vector<2x2x32xf32>
    "tpu.trace_stop"() : () -> ()
    %c0_60 = arith.constant 0 : index
    %c0_61 = arith.constant 0 : index
    %c0_62 = arith.constant 0 : index
    %127 = vector.load %arg19[%c0_60, %c0_61, %c0_62] : memref<2x2x32xf32, #tpu.memory_space<vmem>>, vector<2x2x32xf32>
    tpu.vector_store %arg19[%c0_60, %c0_61, %c0_62], %126 {strides = array<i32>} : memref<2x2x32xf32, #tpu.memory_space<vmem>>, vector<2x2x32xf32>,
    %128 = arith.truncf %0 : vector<2x8x8xf32> to vector<2x8x8xbf16>
    "tpu.trace_start"() <{level = 10 : i32, message = "bcn,bnm->bcm"}> : () -> ()
    %cst_63 = arith.constant dense<0.000000e+00> : vector<2x2x8xf32>
    %129 = tpu.matmul %124, %128, %cst_63 {dimension_numbers = #tpu.dot_dimension_numbers<[2], [1], [1], [2], [0, 0, 0, 1, 1, 2], [0], [0]>} : vector<2x2x8xbf16>, vector<2x8x8xbf16>, vector<2x2x8xf32> -> vector<2x2x8xf32>
    "tpu.trace_stop"() : () -> ()
    %130 = arith.truncf %129 : vector<2x2x8xf32> to vector<2x2x8xbf16>
    "tpu.trace_start"() <{level = 10 : i32, message = "bcm,bmk->bck"}> : () -> ()
    %cst_64 = arith.constant dense<0.000000e+00> : vector<2x2x2xf32>
    %131 = tpu.matmul %130, %123, %cst_64 {dimension_numbers = #tpu.dot_dimension_numbers<[2], [1], [1], [2], [0, 0, 0, 1, 1, 2], [0], [0]>} : vector<2x2x8xbf16>, vector<2x8x2xbf16>, vector<2x2x2xf32> -> vector<2x2x2xf32>
    "tpu.trace_stop"() : () -> ()
    %c0_65 = arith.constant 0 : index
    %c0_66 = arith.constant 0 : index
    %c0_67 = arith.constant 0 : index
    %132 = vector.load %arg20[%c0_65, %c0_66, %c0_67] : memref<2x2x2xf32, #tpu.memory_space<vmem>>, vector<2x2x2xf32>
    tpu.vector_store %arg20[%c0_65, %c0_66, %c0_67], %131 {strides = array<i32>} : memref<2x2x2xf32, #tpu.memory_space<vmem>>, vector<2x2x2xf32>,
    return
  }
  func.func @transform_0(%arg0: i32) -> (i32, i32, i32) {
    %c0_i32 = arith.constant 0 : i32
    %c0_i32_0 = arith.constant 0 : i32
    %c0_i32_1 = arith.constant 0 : i32
    return %arg0, %c0_i32, %c0_i32_0 : i32, i32, i32
  }
  func.func @transform_1(%arg0: i32) -> (i32, i32, i32) {
    %c0_i32 = arith.constant 0 : i32
    %c0_i32_0 = arith.constant 0 : i32
    %c0_i32_1 = arith.constant 0 : i32
    return %arg0, %c0_i32, %c0_i32_0 : i32, i32, i32
  }
  func.func @transform_2(%arg0: i32) -> (i32, i32, i32) {
    %c0_i32 = arith.constant 0 : i32
    %c0_i32_0 = arith.constant 0 : i32
    %c0_i32_1 = arith.constant 0 : i32
    return %arg0, %c0_i32, %c0_i32_0 : i32, i32, i32
  }
  func.func @transform_3(%arg0: i32) -> (i32, i32) {
    %c0_i32 = arith.constant 0 : i32
    %c0_i32_0 = arith.constant 0 : i32
    %c0_i32_1 = arith.constant 0 : i32
    return %c0_i32, %c0_i32_0 : i32, i32
  }
  func.func @transform_4(%arg0: i32) -> (i32, i32) {
    %c0_i32 = arith.constant 0 : i32
    %c0_i32_0 = arith.constant 0 : i32
    %c0_i32_1 = arith.constant 0 : i32
    return %c0_i32, %c0_i32_0 : i32, i32
  }
  func.func @transform_5(%arg0: i32) -> (i32, i32) {
    %c0_i32 = arith.constant 0 : i32
    %c0_i32_0 = arith.constant 0 : i32
    %c0_i32_1 = arith.constant 0 : i32
    return %c0_i32, %c0_i32_0 : i32, i32
  }
  func.func @transform_6(%arg0: i32) -> (i32, i32) {
    %c0_i32 = arith.constant 0 : i32
    %c0_i32_0 = arith.constant 0 : i32
    %c0_i32_1 = arith.constant 0 : i32
    return %c0_i32, %c0_i32_0 : i32, i32
  }
  func.func @transform_7(%arg0: i32) -> (i32, i32) {
    %c0_i32 = arith.constant 0 : i32
    %c0_i32_0 = arith.constant 0 : i32
    %c0_i32_1 = arith.constant 0 : i32
    return %c0_i32, %c0_i32_0 : i32, i32
  }
  func.func @transform_8(%arg0: i32) -> (i32, i32) {
    %c0_i32 = arith.constant 0 : i32
    %c0_i32_0 = arith.constant 0 : i32
    %c0_i32_1 = arith.constant 0 : i32
    return %c0_i32, %c0_i32_0 : i32, i32
  }
  func.func @transform_9(%arg0: i32) -> (i32, i32) {
    %c0_i32 = arith.constant 0 : i32
    %c0_i32_0 = arith.constant 0 : i32
    %c0_i32_1 = arith.constant 0 : i32
    return %c0_i32, %c0_i32_0 : i32, i32
  }
  func.func @transform_10(%arg0: i32) -> (i32, i32) {
    %c0_i32 = arith.constant 0 : i32
    %c0_i32_0 = arith.constant 0 : i32
    %c0_i32_1 = arith.constant 0 : i32
    return %c0_i32, %c0_i32_0 : i32, i32
  }
  func.func @transform_11(%arg0: i32) -> (i32, i32) {
    %c0_i32 = arith.constant 0 : i32
    %c0_i32_0 = arith.constant 0 : i32
    %c0_i32_1 = arith.constant 0 : i32
    return %c0_i32, %c0_i32_0 : i32, i32
  }
  func.func @transform_12(%arg0: i32) -> (i32, i32) {
    %c0_i32 = arith.constant 0 : i32
    %c0_i32_0 = arith.constant 0 : i32
    %c0_i32_1 = arith.constant 0 : i32
    return %c0_i32, %c0_i32_0 : i32, i32
  }
  func.func @transform_13(%arg0: i32) -> (i32, i32) {
    %c0_i32 = arith.constant 0 : i32
    %c0_i32_0 = arith.constant 0 : i32
    %c0_i32_1 = arith.constant 0 : i32
    return %c0_i32, %c0_i32_0 : i32, i32
  }
  func.func @transform_14(%arg0: i32) -> (i32, i32) {
    %c0_i32 = arith.constant 0 : i32
    %c0_i32_0 = arith.constant 0 : i32
    %c0_i32_1 = arith.constant 0 : i32
    return %c0_i32, %c0_i32_0 : i32, i32
  }
  func.func @transform_15(%arg0: i32) -> (i32, i32) {
    %c0_i32 = arith.constant 0 : i32
    %c0_i32_0 = arith.constant 0 : i32
    %c0_i32_1 = arith.constant 0 : i32
    return %c0_i32, %c0_i32_0 : i32, i32
  }
  func.func @transform_16(%arg0: i32) -> (i32, i32) {
    %c0_i32 = arith.constant 0 : i32
    %c0_i32_0 = arith.constant 0 : i32
    %c0_i32_1 = arith.constant 0 : i32
    return %c0_i32, %c0_i32_0 : i32, i32
  }
  func.func @transform_17(%arg0: i32) -> (i32, i32, i32) {
    %c0_i32 = arith.constant 0 : i32
    %c0_i32_0 = arith.constant 0 : i32
    %c0_i32_1 = arith.constant 0 : i32
    return %arg0, %c0_i32, %c0_i32_0 : i32, i32, i32
  }
  func.func @transform_18(%arg0: i32) -> (i32, i32, i32) {
    %c0_i32 = arith.constant 0 : i32
    %c0_i32_0 = arith.constant 0 : i32
    %c0_i32_1 = arith.constant 0 : i32
    return %arg0, %c0_i32, %c0_i32_0 : i32, i32, i32
  }
  func.func @transform_19(%arg0: i32) -> (i32, i32, i32) {
    %c0_i32 = arith.constant 0 : i32
    %c0_i32_0 = arith.constant 0 : i32
    %c0_i32_1 = arith.constant 0 : i32
    return %arg0, %c0_i32, %c0_i32_0 : i32, i32, i32
  }
}

</mosaic_0001>

<bundles_post_ra>
// kernel: diffpool_forward.3
= control target key start
LH: loop header
LB: loop body
LE: loop exit
PB: predicated region body
PF: predicated region fallthrough
CT: control target
= control target key end

     0   :  { %s2877_s0 = inlined_call_operand.vmem [shape: f32[4,8,32], index: 0, kind: input, shape index: {}]   ;;  %s2878_s1 = inlined_call_operand.vmem [shape: f32[4,8,8], index: 1, kind: input, shape index: {}]   ;;  %s2879_s2 = inlined_call_operand.vmem [shape: f32[4,8,1], index: 2, kind: input, shape index: {}]   ;;  %s2880_s3 = inlined_call_operand.vmem [shape: f32[32,32], index: 3, kind: input, shape index: {}]   ;;  %s2881_s4 = inlined_call_operand.vmem [shape: f32[1,32], index: 4, kind: input, shape index: {}]   ;;  %s2882_s5 = inlined_call_operand.vmem [shape: f32[32,2], index: 5, kind: input, shape index: {}]   ;;  %s2883_s6 = inlined_call_operand.vmem [shape: f32[1,2], index: 6, kind: input, shape index: {}]   ;;  %s2884_s7 = inlined_call_operand.vmem [shape: f32[32,2], index: 7, kind: input, shape index: {}]   ;;  %s2885_s8 = inlined_call_operand.vmem [shape: f32[2,2], index: 8, kind: input, shape index: {}]   ;;  %s2886_s9 = inlined_call_operand.vmem [shape: f32[1,2], index: 9, kind: input, shape index: {}]   ;;  %s2887_s10 = inlined_call_operand.vmem [shape: f32[32,32], index: 10, kind: input, shape index: {}]   ;;  %s2888_s11 = inlined_call_operand.vmem [shape: f32[1,32], index: 11, kind: input, shape index: {}]   ;;  %s2889_s12 = inlined_call_operand.vmem [shape: f32[32,32], index: 12, kind: input, shape index: {}]   ;;  %s2890_s13 = inlined_call_operand.vmem [shape: f32[1,32], index: 13, kind: input, shape index: {}]   ;;  %s2891_s14 = inlined_call_operand.vmem [shape: f32[32,32], index: 14, kind: input, shape index: {}]   ;;  %s2892_s15 = inlined_call_operand.vmem [shape: f32[32,32], index: 15, kind: input, shape index: {}]   ;;  %s2893_s16 = inlined_call_operand.vmem [shape: f32[1,32], index: 16, kind: input, shape index: {}]   ;;  %s2894_s17 = inlined_call_operand.vmem [shape: f32[4,1,32], index: 17, kind: output, shape index: {0}]   ;;  %s2895_s18 = inlined_call_operand.hbm [shape: f32[4,2,32], index: 18, kind: output, shape index: {1}]   ;;  %s2896_s19 = inlined_call_operand.hbm [shape: f32[4,2,2], index: 19, kind: output, shape index: {2}]  }
   0x1   :  { %2904 = sst [smem:[#allocation12_spill]] %s2877_s0 }
   0x2   :  { %2905 = sst [smem:[#allocation13_spill]] %s2878_s1 }
   0x3   :  { %2906 = sst [smem:[#allocation14_spill]] %s2880_s3 }
   0x4   :  { %2907 = sst [smem:[#allocation15_spill]] %s2881_s4 }
   0x5   :  { %2908 = sst [smem:[#allocation16_spill]] %s2882_s5 }
   0x6   :  { %2909 = sst [smem:[#allocation17_spill]] %s2883_s6 }
   0x7   :  { %2910 = sst [smem:[#allocation18_spill]] %s2884_s7 }
   0x8   :  { %25 = vsyncpa [#allocation3], 0 }
   0x9   :  { %27 = vsyncpa [#allocation3 + $0x1], 0 }
   0xa   :  { %28 = vsyncpa [#allocation5], 0 }
   0xb   :  { %30 = vsyncpa [#allocation5 + $0x1], 0  ;;  %s2462_s0 = smov 0   ;;  %s2464_s30 = smov 0  }
   0xc   :  { %s2466_s20 = smov 0   ;;  %s2468_s21 = smov 0  }
   0xd LB: > { %2911 = sst [smem:[#allocation8_spill]] %s2350_s20  ;;  %s2483_s1 = sadd.s32 4294967295, %s2354_s21   ;;  %s2354_s21 = sphi %s2468_s21, %s2928_s21   ;;  %s2350_s20 = sphi %s2466_s20, %s2930_s20   ;;  %s2346_s30 = sphi %s2464_s30, %s2932_s30   ;;  %s2342_s0 = sphi %s2462_s0, %s2931_s0  }
   0xe   : > { %s1975_s22 = sadd.s32 4294967294, %s2354_s21   ;;  %s2487_s23 = sadd.s32 1, %s2354_s21  }
   0xf   : > { %2912 = sst [smem:[#allocation9_spill]] %s2487_s23  ;;  %s441_s2 = sadd.s32 1, %s2350_s20 }
  0x10   : > { %s438_s24 = ssub.s32 %s2354_s21, %s2487_s23  ;;  %p451_p0 = scmp.ne.s32.totalorder %s2350_s20, %s2346_s30 }
  0x11   : > { %p439_p1 = scmp.eq.s32.totalorder %s438_s24, 0  ;;  %p452_p2 = scmp.eq.s32.totalorder %s2483_s1, 1 }
  0x12   : > { %p457_p3 = scmp.ne.s32.totalorder %s2346_s30, %s2342_s0  ;;  %p458_p4 = scmp.eq.s32.totalorder %s1975_s22, 1 }
  0x13   : > { %s2498_s25 = scalar_select %p439_p1, %s2350_s20, %s441_s2  }
  0x14   : > { %p2500_p5 = por %p452_p2, %p451_p0  ;;  %p2504_p6 = por %p458_p4, %p457_p3 }
  0x15   : > { %2913 = sst [smem:[#allocation10_spill]] %s2498_s25  ;;  %p1978_p7 = scmp.ge.s32.totalorder %s2354_s21, 1 }
  0x16   : > { %s2915_s26 = scalar_select %p2504_p6, 1, 0 }
  0x17   : > { %p571_p8 = scmp.lt.s32.totalorder %s2354_s21, 3 }
  0x18   : > { %2916 = sst [smem:[#allocation11_spill]] %s2915_s26 }
  0x19   : > { %p572_p9 = pnand %p1978_p7, %p571_p8 }
  0x1a   : > { %s1981_s27 = sshll.u32 (!%p572_p9), %s2483_s1, 1  ;;  %s2917_s2 = sld [smem:[#allocation12_spill]] (!%p572_p9) }
  0x1b   : > { %575 = sbr.rel (%p572_p9) target bundleno = 2084 (0x824), region = 88  ;;  %p647_p10 = scmp.lt.s32.totalorder (!%p572_p9), %s1981_s27, 3 }
  0x1c   : > { %s2918_s23 = sld [smem:[#allocation13_spill]] (!%p572_p9)  ;;  %s2903_s29 = sshll.u32 (!%p572_p9), %s2483_s1, 6 }
  0x1d   : > { %s2919_s25 = sld [smem:[#allocation14_spill]] (!%p572_p9) }
  0x1e   : > { %s2920_s4 = sld [smem:[#allocation15_spill]] (!%p572_p9) }
  0x1f   : > { %s2921_s5 = sld [smem:[#allocation16_spill]] (!%p572_p9) }
  0x20   : > { %v674_v0 = vlaneseq  ;;  %v2356_v1 = vmov 0.0   ;;  %vm2357_vm0 = vmmov 0   ;;  %s2934_s27 = smov (!%p647_p10, %s1981_s27), 3  ;;  %vm703_vm2 = vcmask 1043456   ;;  %s2922_s7 = sld [smem:[#allocation18_spill]] }
  0x21   : > { %2069 = vmatprep.subr.bf16.mxu0 %v2356_v1  ;;  %2075 = vmatprep.subr.bf16.mxu1 %v2356_v1  ;;  %s1982_s28 = sshll.u32 %s2934_s27, 3  ;;  %vm683_vm3 = vcmask 64512   ;;  %vm809_vm4 = vcmask 261120   ;;  %vm1020_vm5 = vcmask 1040384   ;;  %s2923_s6 = sld [smem:[#allocation17_spill]]  ;;  %vm1016_vm6 = vcmask 15360  }
  0x22   : > { %v675_v2 = vshrl.u32 %v674_v0, 7  ;;  %v677_v3 = vand.u32 127, %v674_v0  ;;  %2071 = vmatprep.mubr.msk.bf16.mxu0 %vm2357_vm0, %v2356_v1  ;;  %2077 = vmatprep.mubr.msk.bf16.mxu1 %vm2357_vm0, %v2356_v1  ;;  %s650_s24 = scalar_lea.vmem %s2917_s2, %s1982_s28  ;;  %s656_s26 = scalar_lea.vmem %s2918_s23, %s1982_s28  ;;  %vm1453_vm7 = vcmask 253952   ;;  %vm1606_vm8 = vcmask 254976  }
  0x23   : > { %v2526_v4 = vld [vmem:[%s656_s26] sm:$0xff]  ;;  %v2528_v5 = vld [vmem:[%s656_s26 + $0x8] sm:$0xff]  ;;  %v798_v18 = vld [vmem:[%s2919_s25 + $0x10] sm:$0xff]  ;;  %s667_s20 = scalar_lea.vmem %s2894_s17, %s2934_s27  ;;  %s2782_s27 = sand.u32 1, %s2346_s30  }
  0x24   : > { %vm678_vm1 = vcmp.eq.s32.totalorder %v675_v2, %v677_v3  ;;  %v696_v6 = vld [vmem:[%s650_s24] sm:$0xff]  ;;  %v697_v10 = vld [vmem:[%s650_s24 + $0x8] sm:$0xff]  ;;  %v799_v19 = vld [vmem:[%s2919_s25 + $0x18] sm:$0xff]  ;;  %s2902_s23 = sshll.u32 %s2782_s27, 2  ;;  %s2797_s24 = scalar_lea.hbm %s2895_s18, %s2903_s29 }
  0x25   : > { %v681_v7 = vsel %vm678_vm1, 1.0, %v2526_v4  ;;  %v682_v8 = vsel %vm678_vm1, 1.0, %v2528_v5  ;;  %v698_v9 = vpack.c.bf16 %v696_v6, %v696_v6  ;;  %v699_v11 = vpack.c.bf16 %v697_v10, %v697_v10  ;;  %v796_v21 = vld [vmem:[%s2919_s25] sm:$0xff]  ;;  %v797_v22 = vld [vmem:[%s2919_s25 + $0x8] sm:$0xff]  ;;  %v949_v55 = vld [vmem:[%s2921_s5 + $0x10] sm:$0xff]  ;;  %s638_s26 = scalar_lea.vmem [#allocation2], %s2902_s23 }
  0x26   : > { %v684_v12 = vsel %vm683_vm3, %v681_v7, 0.0  ;;  %v2534_v14 = vpack.c.bf16 %v681_v7, %v681_v7  ;;  %v2537_v16 = vpack.c.bf16 %v682_v8, %v682_v8  ;;  %v687_v17 = vsel %vm683_vm3, %v682_v8, 0.0  ;;  %v1988_v41 = vld [vmem:[%s2920_s4] ss:$0 sm:$0xff]  ;;  %v950_v56 = vld [vmem:[%s2921_s5 + $0x18] sm:$0xff]  ;;  %v948_v59 = vld [vmem:[%s2921_s5 + $0x8] sm:$0xff] }
  0x27   : > { %v705_v13 = vsel %vm703_vm2, %v698_v9, 0  ;;  %685 = vadd.xlane.f32.xlu0 %v684_v12  ;;  %v751_v15 = vsel %vm703_vm2, %v699_v11, 0  ;;  %v801_v20 = vpack.c.bf16 %v799_v19, %v798_v18  ;;  %v800_v23 = vpack.c.bf16 %v797_v22, %v796_v21  ;;  %v947_v58 = vld [vmem:[%s2921_s5] sm:$0xff]  ;;  %v1009_v63 = vld [vmem:[%s2922_s7 + $0x10] sm:$0xff]  ;;  %v1010_v0 = vld [vmem:[%s2922_s7 + $0x18] sm:$0xff]  ;;  %s1821_s28 = sshll.u32 %s638_s26, 4  ;;  %s2789_s28 = int_to_ptr.vmem [resolvable:$true] %s1821_s28 }
  0x28   : > { %2070 = vmatpush3.bf16.msra.mxu0 %v705_v13  ;;  %2076 = vmatpush3.bf16.msra.mxu1 %v751_v15  ;;  %v952_v57 = vpack.c.bf16 %v950_v56, %v949_v55  ;;  %v951_v60 = vpack.c.bf16 %v948_v59, %v947_v58  ;;  %v1012_v10 = vpack.c.bf16 %v1010_v0, %v1009_v63  ;;  %v1007_v12 = vld [vmem:[%s2922_s7] sm:$0xff]  ;;  %v1008_v13 = vld [vmem:[%s2922_s7 + $0x8] sm:$0xff]  ;;  %s2264_s23 = scalar_lea.vmem %s2789_s28, 64  ;;  %s2358_s4 = smov [#allocation2]  }
  0x29   : > { %2081 = vmatprep.subr.bf16.mxu0 %v2356_v1  ;;  %2089 = vmatprep.subr.bf16.mxu1 %v2356_v1  ;;  %v1011_v18 = vpack.c.bf16 %v1008_v13, %v1007_v12  ;;  %v1014_v19 = vld [vmem:[%s2885_s8] sm:$0x3]  ;;  %p2265_p11 = scmp.ne.s32.totalorder %s2789_s28, %s2264_s23 }
  0x2a   : > { %v1992_v22 = vld [vmem:[%s2923_s6] ss:$0 sm:$0xff] }
  0x2b   : > { %2072 = vmatmul.mubr.msk.bf16.vlgmr.msra.gmra.mxu0 %vm683_vm3, %v2534_v14  ;;  %688 = vadd.xlane.f32.xlu0 %v687_v17  ;;  %p2266_p12 = pnand %p2265_p11, %p2500_p5 }
  0x2c   : > { %2078 = vmatmul.mubr.msk.bf16.vlgmr.msra.gmra.mxu1 %vm683_vm3, %v2537_v16  ;;  %2085 = vmatprep.mubr.msk.bf16.mxu0 %vm2357_vm0, %v2356_v1 }
  0x2d   : > { %2091 = vmatprep.mubr.msk.bf16.mxu1 %vm2357_vm0, %v2356_v1  ;;  %2082 = vmatpush3.bf16.msra.mxu0 %v801_v20  ;;  %v1015_v20 = vpack.c.bf16 %v1014_v19, %v1014_v19  ;;  %p2267_p13 = pneg %p2266_p12 }
  0x2e   : > { %2083 = vmatprep.subr.bf16.mxu0 %v2356_v1 }
  0x2f   : > { %v1022_v21 = vsel %vm1020_vm5, %v1015_v20, 0 }
  0x31   : > { %2084 = vmatpush3.bf16.msra.mxu0 %v800_v23 }
  0x32   : > { %2095 = vmatprep.subr.bf16.mxu0 %v2356_v1 }
  0xb0   : > { %v686_v24 = vpop.xlane.xlu0 %685 }
  0xb1   : > { %v690_v27 = vmax.f32 %v686_v24, 1.0 }
  0xb4   : > { %v689_v25 = vpop.xlane.xlu0 %688 }
  0xb5   : > { %v691_v26 = vmax.f32 %v689_v25, 1.0 }
  0xb7   : > { %2252 = vrcp.f32 %v691_v26 }
  0xb8   : > { %2254 = vrcp.f32 %v690_v27 }
  0xc4   : > { %v2564_v28 = vpop.eup %2252 }
  0xc5   : > { %v2566_v29 = vpop.eup %2254 }
  0xeb   : > { %v741_v30 = vpop.f32.mrf.mxu0 }
  0xec   : > { %v793_v31 = vmul.f32 %v2566_v29, %v741_v30  ;;  %v787_v32 = vpop.f32.mrf.mxu1  ;;  %v1120_v30 = vld [vmem:[%s2887_s10 + $0x10] sm:$0xff] }
  0xed   : > { %v794_v33 = vmul.f32 %v2564_v28, %v787_v32  ;;  %v2073_v34 = vpop.f32.mrf.mxu0 }
  0xee   : > { %v2079_v35 = vpop.f32.mrf.mxu1 }
  0xef   : > { %v2570_v36 = vpack.c.bf16 %v794_v33, %v793_v31  ;;  %v744_v37 = vpop.f32.mrf.mxu0  ;;  %v1121_v31 = vld [vmem:[%s2887_s10 + $0x18] sm:$0xff] }
  0xf0   : > { %v790_v38 = vpop.f32.mrf.mxu1  ;;  %v1123_v37 = vpack.c.bf16 %v1121_v31, %v1120_v30 }
  0xf1   : > { %2086 = vmatmul.mubr.msk.bf16.vlgmr.msra.gmra.mxu0 %vm809_vm4, %v2570_v36  ;;  %v2074_v39 = vpop.f32.mrf.mxu0 }
  0xf2   : > { %v2080_v40 = vpop.f32.mrf.mxu1  ;;  %2097 = vmatprep.mubr.msk.bf16.mxu0 %vm2357_vm0, %v2356_v1  ;;  %v1118_v39 = vld [vmem:[%s2887_s10] sm:$0xff] }
  0xf3   : > { %v1119_v40 = vld [vmem:[%s2887_s10 + $0x8] sm:$0xff] }
 0x1b1   : > { %v847_v42 = vpop.f32.mrf.mxu0 }
 0x1b2   : > { %v848_v43 = vadd.f32 %v1988_v41, %v847_v42 }
 0x1b3   : > { %v2087_v44 = vpop.f32.mrf.mxu0 }
 0x1b4   : > { %v854_v45 = vmax.f32 %v848_v43, 0.0  ;;  %v1122_v43 = vpack.c.bf16 %v1119_v40, %v1118_v39  ;;  %v1325_v39 = vld [vmem:[%s2891_s14] sm:$0xff]  ;;  %v1326_v40 = vld [vmem:[%s2891_s14 + $0x8] sm:$0xff] }
 0x1b5   : > { %v850_v46 = vpop.f32.mrf.mxu0 }
 0x1b6   : > { %v856_v47 = vpack.c.bf16 %v854_v45, %v854_v45  ;;  %v851_v48 = vadd.f32 %v1988_v41, %v850_v46  ;;  %v1996_v46 = vld [vmem:[%s2886_s9] ss:$0 sm:$0xff] }
 0x1b7   : > { %v2088_v49 = vpop.f32.mrf.mxu0 }
 0x1b8   : > { %v855_v50 = vmax.f32 %v851_v48, 0.0  ;;  %v859_v51 = vsel %vm703_vm2, %v856_v47, 0 }
 0x1b9   : > { %2090 = vmatpush3.bf16.msra.mxu1 %v859_v51 }
 0x1ba   : > { %v857_v52 = vpack.c.bf16 %v855_v50, %v855_v50  ;;  %v1006_v53 = vpack.c.bf16 %v855_v50, %v854_v45  ;;  %2101 = vmatprep.subr.bf16.mxu1 %v2356_v1 }
 0x1bc   : > { %2092 = vmatmul.mubr.msk.bf16.vlgmr.msra.gmra.mxu1 %vm683_vm3, %v2534_v14  ;;  %v902_v54 = vsel %vm703_vm2, %v857_v52, 0 }
 0x1bd   : > { %2096 = vmatpush3.bf16.msra.mxu0 %v902_v54  ;;  %2105 = vmatprep.mubr.msk.bf16.mxu1 %vm2357_vm0, %v2356_v1 }
 0x1be   : > { %2109 = vmatprep.subr.bf16.mxu0 %v2356_v1  ;;  %2102 = vmatpush3.bf16.msra.mxu1 %v952_v57 }
 0x1bf   : > { %2103 = vmatprep.subr.bf16.mxu1 %v2356_v1 }
 0x1c0   : > { %2098 = vmatmul.mubr.msk.bf16.vlgmr.msra.gmra.mxu0 %vm683_vm3, %v2537_v16 }
 0x1c1   : > { %2111 = vmatprep.mubr.msk.bf16.mxu0 %vm2357_vm0, %v2356_v1  ;;  %2110 = vmatpush3.bf16.msra.mxu0 %v1022_v21 }
 0x1c2   : > { %2104 = vmatpush3.bf16.msra.mxu1 %v951_v60  ;;  %2123 = vmatprep.subr.bf16.mxu0 %v2356_v1 }
 0x1c3   : > { %2115 = vmatprep.subr.bf16.mxu1 %v2356_v1 }
 0x27c   : > { %v895_v61 = vpop.f32.mrf.mxu1 }
 0x27d   : > { %v944_v6 = vmul.f32 %v2566_v29, %v895_v61 }
 0x27e   : > { %v2093_v62 = vpop.f32.mrf.mxu1 }
 0x280   : > { %v898_v2 = vpop.f32.mrf.mxu1  ;;  %v938_v3 = vpop.f32.mrf.mxu0 }
 0x281   : > { %v945_v7 = vmul.f32 %v2564_v28, %v938_v3 }
 0x282   : > { %v2094_v8 = vpop.f32.mrf.mxu1  ;;  %v2099_v9 = vpop.f32.mrf.mxu0 }
 0x283   : > { %v946_v11 = vpack.c.bf16 %v945_v7, %v944_v6  ;;  %v1267_v8 = vld [vmem:[%s2889_s12 + $0x10] sm:$0xff] }
 0x284   : > { %v941_v15 = vpop.f32.mrf.mxu0 }
 0x285   : > { %2106 = vmatmul.mubr.msk.bf16.vlgmr.msra.gmra.mxu1 %vm809_vm4, %v946_v11 }
 0x286   : > { %v2100_v17 = vpop.f32.mrf.mxu0  ;;  %2116 = vmatpush3.bf16.msra.mxu1 %v1012_v10  ;;  %2119 = vmatprep.mubr.msk.bf16.mxu1 %vm2357_vm0, %v2356_v1  ;;  %v1265_v10 = vld [vmem:[%s2889_s12] sm:$0xff] }
 0x287   : > { %2117 = vmatprep.subr.bf16.mxu1 %v2356_v1 }
 0x28a   : > { %2118 = vmatpush3.bf16.msra.mxu1 %v1011_v18 }
 0x28b   : > { %2131 = vmatprep.subr.bf16.mxu1 %v2356_v1 }
 0x28d   : > { %2120 = vmatmul.mubr.msk.bf16.vlgmr.msra.gmra.mxu1 %vm809_vm4, %v1006_v53 }
 0x28e   : > { %2133 = vmatprep.mubr.msk.bf16.mxu1 %vm2357_vm0, %v2356_v1 }
 0x345   : > { %v997_v23 = vpop.f32.mrf.mxu1 }
 0x346   : > { %v998_v25 = vadd.f32 %v1992_v22, %v997_v23 }
 0x347   : > { %v2107_v24 = vpop.f32.mrf.mxu1 }
 0x348   : > { %v1004_v33 = vmax.f32 %v998_v25, 0.0 }
 0x349   : > { %v1000_v26 = vpop.f32.mrf.mxu1 }
 0x34a   : > { %v1001_v27 = vadd.f32 %v1992_v22, %v1000_v26  ;;  %v1327_v26 = vld [vmem:[%s2891_s14 + $0x10] sm:$0xff] }
 0x34b   : > { %v2108_v32 = vpop.f32.mrf.mxu1 }
 0x34c   : > { %v1005_v34 = vmax.f32 %v1001_v27, 0.0  ;;  %v1328_v27 = vld [vmem:[%s2891_s14 + $0x18] sm:$0xff] }
 0x34d   : > { %v1102_v35 = vpop.f32.mrf.mxu1 }
 0x34e   : > { %v1013_v38 = vpack.c.bf16 %v1005_v34, %v1004_v33 }
 0x34f   : > { %v2121_v41 = vpop.f32.mrf.mxu1 }
 0x350   : > { %2112 = vmatmul.mubr.msk.bf16.vlgmr.msra.gmra.mxu0 %vm1016_vm6, %v1013_v38 }
 0x351   : > { %v1105_v42 = vpop.f32.mrf.mxu1  ;;  %2124 = vmatpush3.bf16.msra.mxu0 %v1123_v37  ;;  %2127 = vmatprep.mubr.msk.bf16.mxu0 %vm2357_vm0, %v2356_v1  ;;  %v1330_v37 = vpack.c.bf16 %v1328_v27, %v1327_v26 }
 0x352   : > { %2125 = vmatprep.subr.bf16.mxu0 %v2356_v1 }
 0x353   : > { %v2122_v44 = vpop.f32.mrf.mxu1 }
 0x355   : > { %2126 = vmatpush3.bf16.msra.mxu0 %v1122_v43  ;;  %v1335_v43 = vld [vmem:[%s2892_s15 + $0x18] sm:$0xff] }
 0x356   : > { %2137 = vmatprep.subr.bf16.mxu0 %v2356_v1 }
 0x358   : > { %2128 = vmatmul.mubr.msk.bf16.vlgmr.msra.gmra.mxu0 %vm809_vm4, %v2570_v36  ;;  %v1997_v36 = vld [vmem:[%s2888_s11] ss:$0 sm:$0xff] }
 0x359   : > { %2139 = vmatprep.mubr.msk.bf16.mxu0 %vm2357_vm0, %v2356_v1 }
 0x410   : > { %v1058_v45 = vpop.f32.mrf.mxu0 }
 0x411   : > { %v1103_v47 = vadd.f32 %v1102_v35, %v1058_v45  ;;  %v1332_v45 = vld [vmem:[%s2892_s15] sm:$0xff] }
 0x412   : > { %v2113_v48 = vpop.f32.mrf.mxu0 }
 0x413   : > { %v1116_v49 = vadd.f32 %v1996_v46, %v1103_v47 }
 0x414   : > { %v1061_v50 = vpop.f32.mrf.mxu0 }
 0x415   : > { %v1106_v51 = vadd.f32 %v1105_v42, %v1061_v50  ;;  %v1456_v52 = vsel %vm1016_vm6, %v1116_v49, -inf }
 0x416   : > { %1457 = vmax.xlane.f32.xlu1 %v1456_v52  ;;  %v2114_v53 = vpop.f32.mrf.mxu0 }
 0x417   : > { %v1117_v54 = vadd.f32 %v1996_v46, %v1106_v51  ;;  %v1333_v46 = vld [vmem:[%s2892_s15 + $0x8] sm:$0xff] }
 0x418   : > { %v1165_v55 = vpop.f32.mrf.mxu0  ;;  %v1336_v47 = vpack.c.bf16 %v1333_v46, %v1332_v45 }
 0x419   : > { %v1166_v56 = vadd.f32 %v1997_v36, %v1165_v55  ;;  %v1459_v57 = vsel %vm1016_vm6, %v1117_v54, -inf  ;;  %v2001_v55 = vld [vmem:[%s2890_s13] ss:$0 sm:$0xff] }
 0x41a   : > { %1460 = vmax.xlane.f32.xlu1 %v1459_v57  ;;  %v2129_v58 = vpop.f32.mrf.mxu0 }
 0x41b   : > { %v2663_v59 = vmax.f32 %v1166_v56, 0.0 }
 0x41c   : > { %v1168_v60 = vpop.f32.mrf.mxu0 }
 0x41d   : > { %v1174_v61 = vpack.c.bf16 %v2663_v59, %v2663_v59  ;;  %v1169_v62 = vadd.f32 %v1997_v36, %v1168_v60 }
 0x41e   : > { %v2130_v63 = vpop.f32.mrf.mxu0 }
 0x41f   : > { %v1173_v0 = vmax.f32 %v1169_v62, 0.0  ;;  %v1177_v2 = vsel %vm703_vm2, %v1174_v61, 0 }
 0x420   : > { %2132 = vmatpush3.bf16.msra.mxu1 %v1177_v2 }
 0x421   : > { %v1175_v3 = vpack.c.bf16 %v1173_v0, %v1173_v0  ;;  %v1324_v6 = vpack.c.bf16 %v1173_v0, %v2663_v59  ;;  %2143 = vmatprep.subr.bf16.mxu1 %v2356_v1 }
 0x423   : > { %2134 = vmatmul.mubr.msk.bf16.vlgmr.msra.gmra.mxu1 %vm683_vm3, %v2534_v14  ;;  %v1220_v7 = vsel %vm703_vm2, %v1175_v3, 0  ;;  %v1268_v14 = vld [vmem:[%s2889_s12 + $0x18] sm:$0xff] }
 0x424   : > { %2138 = vmatpush3.bf16.msra.mxu0 %v1220_v7  ;;  %2147 = vmatprep.mubr.msk.bf16.mxu1 %vm2357_vm0, %v2356_v1  ;;  %v1270_v9 = vpack.c.bf16 %v1268_v14, %v1267_v8  ;;  %v2005_v14 = vld [vmem:[%s2893_s16] ss:$0 sm:$0xff] }
 0x425   : > { %2151 = vmatprep.subr.bf16.mxu0 %v2356_v1 }
 0x426   : > { %2144 = vmatpush3.bf16.msra.mxu1 %v1270_v9 }
 0x427   : > { %2140 = vmatmul.mubr.msk.bf16.vlgmr.msra.gmra.mxu0 %vm683_vm3, %v2537_v16  ;;  %2145 = vmatprep.subr.bf16.mxu1 %v2356_v1  ;;  %v1266_v16 = vld [vmem:[%s2889_s12 + $0x8] sm:$0xff] }
 0x428   : > { %2155 = vmatprep.mubr.msk.bf16.mxu0 %vm2357_vm0, %v2356_v1  ;;  %v1269_v11 = vpack.c.bf16 %v1266_v16, %v1265_v10 }
 0x42a   : > { %2146 = vmatpush3.bf16.msra.mxu1 %v1269_v11 }
 0x42b   : > { %2159 = vmatprep.subr.bf16.mxu1 %v2356_v1 }
 0x49f   : > { %v1458_v12 = vpop.xlane.xlu1 %1457 }
 0x4a0   : > { %v1462_v13 = vsub.f32 %v1116_v49, %v1458_v12 }
 0x4a2   : > { %v1464_v15 = vmul.f32 1.442695, %v1462_v13 }
 0x4a3   : > { %v1461_v17 = vpop.xlane.xlu1 %1460 }
 0x4a4   : > { %2256 = vpow2.f32 %v1464_v15  ;;  %v1463_v18 = vsub.f32 %v1117_v54, %v1461_v17 }
 0x4a6   : > { %v1466_v19 = vmul.f32 1.442695, %v1463_v18 }
 0x4a8   : > { %2258 = vpow2.f32 %v1466_v19 }
 0x4b1   : > { %v2257_v20 = vpop.eup %2256 }
 0x4b2   : > { %v1468_v21 = vsel %vm1016_vm6, %v2257_v20, 0.0 }
 0x4b3   : > { %1469 = vadd.xlane.f32.xlu0 %v1468_v21 }
 0x4b5   : > { %v2259_v22 = vpop.eup %2258 }
 0x4b6   : > { %v1471_v23 = vsel %vm1016_vm6, %v2259_v22, 0.0 }
 0x4b7   : > { %1472 = vadd.xlane.f32.xlu1 %v1471_v23 }
 0x4e3   : > { %v1213_v24 = vpop.f32.mrf.mxu1 }
 0x4e4   : > { %v1262_v32 = vmul.f32 %v2566_v29, %v1213_v24  ;;  %v1329_v29 = vpack.c.bf16 %v1326_v40, %v1325_v39 }
 0x4e5   : > { %v2135_v25 = vpop.f32.mrf.mxu1 }
 0x4e7   : > { %v1216_v30 = vpop.f32.mrf.mxu1  ;;  %v1256_v31 = vpop.f32.mrf.mxu0 }
 0x4e8   : > { %v1263_v33 = vmul.f32 %v2564_v28, %v1256_v31  ;;  %v1334_v28 = vld [vmem:[%s2892_s15 + $0x10] sm:$0xff]  ;;  %v1610_v31 = vpack.c.bf16 %v2528_v5, %v2528_v5 }
 0x4e9   : > { %v2136_v34 = vpop.f32.mrf.mxu1  ;;  %v2141_v35 = vpop.f32.mrf.mxu0  ;;  %v1337_v44 = vpack.c.bf16 %v1335_v43, %v1334_v28 }
 0x4ea   : > { %v1264_v38 = vpack.c.bf16 %v1263_v33, %v1262_v32 }
 0x4eb   : > { %v1259_v41 = vpop.f32.mrf.mxu0  ;;  %2152 = vmatpush3.bf16.msra.mxu0 %v1337_v44 }
 0x4ec   : > { %2148 = vmatmul.mubr.msk.bf16.vlgmr.msra.gmra.mxu1 %vm809_vm4, %v1264_v38  ;;  %2153 = vmatprep.subr.bf16.mxu0 %v2356_v1  ;;  %v1655_v38 = vsel %vm703_vm2, %v1610_v31, 0 }
 0x4ed   : > { %v2142_v42 = vpop.f32.mrf.mxu0  ;;  %2160 = vmatpush3.bf16.msra.mxu1 %v1330_v37  ;;  %2163 = vmatprep.mubr.msk.bf16.mxu1 %vm2357_vm0, %v2356_v1 }
 0x4ee   : > { %2161 = vmatprep.subr.bf16.mxu1 %v2356_v1 }
 0x4ef   : > { %2154 = vmatpush3.bf16.msra.mxu0 %v1336_v47 }
 0x4f0   : > { %2167 = vmatprep.subr.bf16.mxu0 %v2356_v1 }
 0x4f1   : > { %2162 = vmatpush3.bf16.msra.mxu1 %v1329_v29 }
 0x4f2   : > { %2173 = vmatprep.subr.bf16.mxu1 %v2356_v1 }
 0x4f4   : > { %2164 = vmatmul.mubr.msk.bf16.vlgmr.msra.gmra.mxu1 %vm809_vm4, %v1324_v6 }
 0x4f5   : > { %2175 = vmatprep.mubr.msk.bf16.mxu1 %vm2357_vm0, %v2356_v1 }
 0x53c   : > { %v1470_v48 = vpop.xlane.xlu0 %1469 }
 0x53d   : > { %2260 = vrcp.f32 %v1470_v48 }
 0x540   : > { %v1473_v49 = vpop.xlane.xlu1 %1472 }
 0x541   : > { %2262 = vrcp.f32 %v1473_v49 }
 0x54a   : > { %v2261_v50 = vpop.eup %2260 }
 0x54b   : > { %v1476_v51 = vmul.f32 %v2261_v50, %v2257_v20  ;;  %v1609_v20 = vpack.c.bf16 %v2526_v4, %v2526_v4 }
 0x54d   : > { %v2732_v52 = vpack.c.bf16 %v1476_v51, %v1476_v51  ;;  %v1612_v30 = vsel %vm703_vm2, %v1609_v20, 0 }
 0x54e   : > { %v2263_v53 = vpop.eup %2262 }
 0x54f   : > { %1480 = vxpose.xlu0.c.b16.start.end [1/1] (short) (narrow) %v2732_v52, 16  ;;  %v1477_v36 = vmul.f32 %v2263_v53, %v2259_v22  ;;  %v1703_v28 = vsel %vm703_vm2, %v2732_v52, 0 }
 0x551   : > { %v2735_v54 = vpack.c.bf16 %v1477_v36, %v1477_v36 }
 0x553   : > { %1496 = vxpose.xlu1.c.b16.start.end [1/1] (short) (narrow) %v2735_v54, 16  ;;  %v1749_v45 = vsel %vm703_vm2, %v2735_v54, 0 }
 0x5ac   : > { %v1315_v56 = vpop.f32.mrf.mxu1 }
 0x5ad   : > { %v1316_v58 = vadd.f32 %v2001_v55, %v1315_v56 }
 0x5ae   : > { %v2149_v57 = vpop.f32.mrf.mxu1 }
 0x5af   : > { %v1322_v62 = vmax.f32 %v1316_v58, 0.0 }
 0x5b0   : > { %v1318_v59 = vpop.f32.mrf.mxu1 }
 0x5b1   : > { %v1319_v60 = vadd.f32 %v2001_v55, %v1318_v59  ;;  %v1488_v25 = vpop.trf.xlu0 }
 0x5b2   : > { %v2150_v61 = vpop.f32.mrf.mxu1 }
 0x5b3   : > { %v1323_v63 = vmax.f32 %v1319_v60, 0.0 }
 0x5b4   : > { %v1419_v0 = vpop.f32.mrf.mxu1 }
 0x5b5   : > { %v1331_v2 = vpack.c.bf16 %v1323_v63, %v1322_v62  ;;  %v1504_v37 = vpop.trf.xlu1 }
 0x5b6   : > { %v2165_v3 = vpop.f32.mrf.mxu1 }
 0x5b7   : > { %2156 = vmatmul.mubr.msk.bf16.vlgmr.msra.gmra.mxu0 %vm809_vm4, %v1331_v2 }
 0x5b8   : > { %v1422_v6 = vpop.f32.mrf.mxu1  ;;  %2169 = vmatprep.mubr.msk.bf16.mxu0 %vm2357_vm0, %v2356_v1 }
 0x5ba   : > { %v2166_v7 = vpop.f32.mrf.mxu1 }
 0x677   : > { %v1375_v8 = vpop.f32.mrf.mxu0 }
 0x678   : > { %v1420_v9 = vadd.f32 %v1419_v0, %v1375_v8 }
 0x679   : > { %v2157_v10 = vpop.f32.mrf.mxu0 }
 0x67a   : > { %v1433_v16 = vadd.f32 %v2005_v14, %v1420_v9 }
 0x67b   : > { %v1378_v11 = vpop.f32.mrf.mxu0 }
 0x67c   : > { %v1435_v12 = vmax.f32 %v1433_v16, 0.0  ;;  %v1423_v13 = vadd.f32 %v1422_v6, %v1378_v11 }
 0x67d   : > { %v2158_v15 = vpop.f32.mrf.mxu0 }
 0x67e   : > { %v1437_v17 = vsel %vm809_vm4, %v1435_v12, 0.0  ;;  %v1512_v18 = vpack.c.bf16 %v1435_v12, %v1435_v12  ;;  %v1434_v19 = vadd.f32 %v2005_v14, %v1423_v13 }
 0x67f   : > { %v1438_v21 = vrot.slane %v1437_v17, 4 }
 0x680   : > { %v1436_v22 = vmax.f32 %v1434_v19, 0.0  ;;  %v1518_v23 = vsel %vm703_vm2, %v1512_v18, 0 }
 0x681   : > { %v1439_v24 = vadd.f32 %v1438_v21, %v1437_v17  ;;  %2168 = vmatpush3.bf16.msra.mxu0 %v1518_v23 }
 0x682   : > { %v1444_v26 = vsel %vm809_vm4, %v1436_v22, 0.0  ;;  %v1513_v27 = vpack.c.bf16 %v1436_v22, %v1436_v22  ;;  %2179 = vmatprep.subr.bf16.mxu0 %v2356_v1 }
 0x683   : > { %v1440_v32 = vrot.slane %v1439_v24, 2  ;;  %v1445_v33 = vrot.slane %v1444_v26, 4 }
 0x684   : > { %2170 = vmatmul.mubr.msk.bf16.vlgmr.msra.gmra.mxu0 %vm683_vm3, %v1488_v25  ;;  %v1564_v4 = vsel %vm703_vm2, %v1513_v27, 0 }
 0x685   : > { %v1441_v34 = vadd.f32 %v1440_v32, %v1439_v24  ;;  %v1446_v35 = vadd.f32 %v1445_v33, %v1444_v26  ;;  %2174 = vmatpush3.bf16.msra.mxu1 %v1564_v4  ;;  %2180 = vmatpush3.bf16.msra.mxu0 %v1612_v30 }
 0x686   : > { %2181 = vmatprep.mubr.msk.bf16.mxu0 %vm2357_vm0, %v2356_v1  ;;  %2185 = vmatprep.subr.bf16.mxu1 %v2356_v1 }
 0x687   : > { %v1442_v5 = vrot.slane %v1441_v34, 1  ;;  %v1447_v39 = vrot.slane %v1446_v35, 2  ;;  %2191 = vmatprep.subr.bf16.mxu0 %v2356_v1 }
 0x688   : > { %2176 = vmatmul.mubr.msk.bf16.vlgmr.msra.gmra.mxu1 %vm683_vm3, %v1504_v37 }
 0x689   : > { %v1443_v40 = vadd.f32 %v1442_v5, %v1441_v34  ;;  %v1448_v41 = vadd.f32 %v1447_v39, %v1446_v35  ;;  %2186 = vmatpush3.bf16.msra.mxu1 %v1655_v38  ;;  %2187 = vmatprep.mubr.msk.bf16.mxu1 %vm2357_vm0, %v2356_v1 }
 0x68a   : > { %2197 = vmatprep.subr.bf16.mxu1 %v2356_v1 }
 0x68b   : > { %v1451_v42 = vmul.f32 0.125, %v1443_v40  ;;  %v1449_v29 = vrot.slane %v1448_v41, 1 }
 0x68c   : > { %2182 = vmatmul.mubr.msk.bf16.vlgmr.msra.gmra.mxu0 %vm683_vm3, %v1488_v25 }
 0x68d   : > { %1454 = vst.msk [vmem:[%s667_s20] sm:$0x1] %vm1453_vm7, %v1451_v42  ;;  %v1450_v43 = vadd.f32 %v1449_v29, %v1448_v41  ;;  %2192 = vmatpush3.bf16.msra.mxu0 %v1703_v28  ;;  %2193 = vmatprep.mubr.msk.bf16.mxu0 %vm2357_vm0, %v2356_v1 }
 0x68f   : > { %v1452_v44 = vmul.f32 0.125, %v1450_v43 }
 0x690   : > { %2188 = vmatmul.mubr.msk.bf16.vlgmr.msra.gmra.mxu1 %vm683_vm3, %v1504_v37 }
 0x691   : > { %1455 = vst.msk [vmem:[%s667_s20 + $0x1] sm:$0x1] %vm1453_vm7, %v1452_v44  ;;  %2198 = vmatpush3.bf16.msra.mxu1 %v1749_v45  ;;  %2199 = vmatprep.mubr.msk.bf16.mxu1 %vm2357_vm0, %v2356_v1 }
 0x744   : > { %v1554_v46 = vpop.f32.mrf.mxu0 }
 0x745   : > { %1607 = vst.msk [vmem:[%s638_s26] sm:$0x3] %vm1606_vm8, %v1554_v46 }
 0x746   : > { %v2171_v47 = vpop.f32.mrf.mxu0 }
 0x748   : > { %v1557_v48 = vpop.f32.mrf.mxu0  ;;  %v1600_v49 = vpop.f32.mrf.mxu1 }
 0x749   : > { %1608 = vst.msk [vmem:[%s638_s26 + $0x2] sm:$0x3] %vm1606_vm8, %v1600_v49  ;;  %s2268_s26 = sshll.u32 %s2358_s4, 4  ;;  %s2269_s26 = int_to_ptr.vmem [resolvable:$false] %s2268_s26 }
 0x74a   : > { %v2172_v50 = vpop.f32.mrf.mxu0  ;;  %v2177_v51 = vpop.f32.mrf.mxu1  ;;  %s2270_s5 = scalar_lea.vmem %s2269_s26, 128  ;;  %p2271_p0 = scmp.lt.s32.totalorder %s2789_s28, %s2269_s26 }
 0x74b   : > { %p2272_p1 = scmp.lt.s32.totalorder %s2270_s5, %s2264_s23 }
 0x74c   : > { %v1603_v52 = vpop.f32.mrf.mxu1  ;;  %v1648_v53 = vpop.f32.mrf.mxu0 }
 0x74d   : > { %v1697_v1 = vpack.c.bf16 %v1648_v53, %v1648_v53  ;;  %p2273_p2 = por %p2272_p1, %p2271_p0 }
 0x74e   : > { %v2178_v36 = vpop.f32.mrf.mxu1  ;;  %v2183_v54 = vpop.f32.mrf.mxu0 }
 0x74f   : > { %2194 = vmatmul.mubr.msk.bf16.vlgmr.msra.gmra.mxu0 %vm683_vm3, %v1697_v1  ;;  %p2274_p3 = pnand %p2273_p2, %p2267_p13 }
 0x750   : > { %v1651_v55 = vpop.f32.mrf.mxu0  ;;  %v1691_v56 = vpop.f32.mrf.mxu1 }
 0x751   : > { %v1698_v57 = vpack.c.bf16 %v1691_v56, %v1691_v56 }
 0x752   : > { %v2184_v58 = vpop.f32.mrf.mxu0  ;;  %v2189_v59 = vpop.f32.mrf.mxu1 }
 0x753   : > { %2200 = vmatmul.mubr.msk.bf16.vlgmr.msra.gmra.mxu1 %vm683_vm3, %v1698_v57 }
 0x754   : > { %v1694_v60 = vpop.f32.mrf.mxu1 }
 0x756   : > { %v2190_v61 = vpop.f32.mrf.mxu1 }
 0x757   : > { %2277 = shalt.err (!%p2274_p3)
}
 0x758   : > { %s2278_s22 = scalar_lea.hbm %s2797_s24, 64  ;;  %s2282_s4 = scalar_lea.hbm %s2895_s18, 128 }
 0x759   : > { %p2279_p4 = scmp.ne.s32.totalorder %s2797_s24, %s2278_s22  ;;  %p2283_p9 = scmp.lt.s32.totalorder %s2797_s24, %s2895_s18 }
 0x75a   : > { %p2284_p10 = scmp.lt.s32.totalorder %s2282_s4, %s2278_s22 }
 0x75b   : > { %p2280_p7 = pnand %p2279_p4, %p2500_p5 }
 0x75c   : > { %p2285_p11 = por %p2284_p10, %p2283_p9 }
 0x75d   : > { %p2281_p8 = pneg %p2280_p7 }
 0x75f   : > { %p2286_p12 = pnand %p2285_p11, %p2281_p8 }
 0x761   : > { %2289 = shalt.err (!%p2286_p12)
}
 0x762   : > { %s2359_s5 = smov 32   ;;  %s2360_s23 = smov 2   ;;  %vm1791_vm9 = vcmask 9216  }
 0x763   : > { %s2924_s29 = scalar_lea.sflag [#allocation3], %s2782_s27  ;;  %s2925_s6 = sshll.u32 %s2782_s27, 2 }
 0x764   : > { %2203 = dma.vmem_to_hbm [thread:$0]  (%p2500_p5), %s2789_s28, 64, %s2797_s24, %s2924_s29, %s2359_s5, %s2359_s5, %s2360_s23  }
 0x765   : > { %s645_s20 = scalar_lea.vmem [#allocation4], %s2925_s6  ;;  %s2926_s22 = sshll.u32 %s2483_s1, 6 }
 0x766   : > { %s1837_s26 = sshll.u32 %s645_s20, 4  ;;  %s2834_s7 = scalar_lea.hbm %s2896_s19, %s2926_s22  ;;  %s2827_s26 = int_to_ptr.vmem [resolvable:$true] %s1837_s26 }
 0x767   : > { %s1804_s28 = scalar_lea.sflag [#allocation5], %s2782_s27  ;;  %s2290_s24 = scalar_lea.vmem %s2827_s26, 64 }
 0x768   : > { %p2291_p13 = scmp.ne.s32.totalorder %s2827_s26, %s2290_s24  ;;  %s2361_s1 = smov [#allocation4]  }
 0x769   : > { %s2294_s29 = sshll.u32 %s2361_s1, 4  ;;  %s2295_s29 = int_to_ptr.vmem [resolvable:$false] %s2294_s29 }
 0x76a   : > { %p2292_p0 = pnand %p2291_p13, %p2500_p5  ;;  %s2296_s6 = scalar_lea.vmem %s2295_s29, 128 }
 0x76b   : > { %p2297_p2 = scmp.lt.s32.totalorder %s2827_s26, %s2295_s29  ;;  %p2298_p3 = scmp.lt.s32.totalorder %s2296_s6, %s2290_s24 }
 0x76c   : > { %p2293_p1 = pneg %p2292_p0 }
 0x76d   : > { %p2299_p4 = por %p2298_p3, %p2297_p2 }
 0x76f   : > { %p2300_p7 = pnand %p2299_p4, %p2293_p1 }
 0x80f   : > { %v1739_v62 = vpop.f32.mrf.mxu0 }
 0x810   : > { %1792 = vst.msk [vmem:[%s645_s20] sm:$0x3] %vm1791_vm9, %v1739_v62 }
 0x811   : > { %v2195_v63 = vpop.f32.mrf.mxu0 }
 0x813   : > { %v1742_v0 = vpop.f32.mrf.mxu0  ;;  %v1785_v2 = vpop.f32.mrf.mxu1 }
 0x814   : > { %1793 = vst.msk [vmem:[%s645_s20 + $0x2] sm:$0x3] %vm1791_vm9, %v1785_v2 }
 0x815   : > { %v2196_v3 = vpop.f32.mrf.mxu0  ;;  %v2201_v6 = vpop.f32.mrf.mxu1 }
 0x816   : > { %2303 = shalt.err (!%p2300_p7)
}
 0x817   : > { %s2304_s20 = scalar_lea.hbm %s2834_s7, 64  ;;  %s2308_s2 = scalar_lea.hbm %s2896_s19, 128 }
 0x818   : > { %p2305_p8 = scmp.ne.s32.totalorder %s2834_s7, %s2304_s20  ;;  %p2309_p11 = scmp.lt.s32.totalorder %s2834_s7, %s2896_s19 }
 0x819   : > { %p2310_p12 = scmp.lt.s32.totalorder %s2308_s2, %s2304_s20 }
 0x81a   : > { %p2306_p9 = pnand %p2305_p8, %p2500_p5 }
 0x81b   : > { %p2311_p13 = por %p2310_p12, %p2309_p11 }
 0x81c   : > { %p2307_p10 = pneg %p2306_p9 }
 0x81e   : > { %p2312_p0 = pnand %p2311_p13, %p2307_p10 }
 0x820   : > { %2315 = shalt.err (!%p2312_p0)
}
 0x821   : > { %2204 = dma.vmem_to_hbm [thread:$0]  (%p2500_p5), %s2827_s26, 64, %s2834_s7, %s1804_s28, %s2359_s5, %s2359_s5, %s2360_s23   ;;  %v1788_v7 = vpop.f32.mrf.mxu1 }
 0x823   : > { %v2202_v8 = vpop.f32.mrf.mxu1 }
 0x824 PF: > { %p2214_p1 = scmp.ge.s32.totalorder %s2354_s21, 2  ;;  %s1859_s29 = sand.u32 1, %s2342_s0  }
 0x825   : > { %s1860_s6 = scalar_lea.sflag [#allocation3], %s1859_s29 }
 0x826   : > { %p2208_p2 = pnand %p2214_p1, %p2504_p6 }
 0x828   : > { %p2209_p3 = pneg %p2208_p2 }
 0x82a   : > { %2333 = dma.done.wait (%p2209_p3), %s1860_s6, 64  }
 0x82b   : > { %2335 = vsyncadd (%p2209_p3), %s1860_s6, 4294967232  ;;  %s1869_s3 = scalar_lea.sflag [#allocation5], %s1859_s29 }
 0x82c   : > { %2337 = dma.done.wait (%p2209_p3), %s1869_s3, 64  }
 0x82d   : > { %2339 = vsyncadd (%p2209_p3), %s1869_s3, 4294967232  ;;  %s2928_s21 = sld [smem:[#allocation9_spill]]  ;;  %s2931_s0 = smov %s2346_s30 }
 0x82e   : > { %s2929_s7 = sld [smem:[#allocation8_spill]] }
 0x82f   : > { %s2930_s20 = sld [smem:[#allocation10_spill]] }
 0x833   : > { %p33_p5 = scmp.ge.s32.totalorder %s2928_s21, 4  }
 0x834   : > { %s2932_s30 = smov %s2929_s7 }
 0x835   :  { %35 = sbr.rel (!%p33_p5) target bundleno = 13 (0xd), region = 158 }
 0x83a   :  { %1874 = vsyncpa [#allocation3], 1 }
 0x83b   :  { %1876 = vsyncpa [#allocation3 + $0x1], 1 }
 0x83c   :  { %1877 = vsyncpa [#allocation5], 1 }
 0x83d   :  { %1879 = vsyncpa [#allocation5 + $0x1], 1 }

// kernel: diffpool_forward.2
= control target key start
LH: loop header
LB: loop body
LE: loop exit
PB: predicated region body
PF: predicated region fallthrough
CT: control target
= control target key end

     0   :  { %s3612_s0 = inlined_call_operand.vmem [shape: f32[4,32,16], index: 0, kind: input, shape index: {}]   ;;  %s3613_s1 = inlined_call_operand.vmem [shape: f32[4,32,32], index: 1, kind: input, shape index: {}]   ;;  %s3614_s2 = inlined_call_operand.vmem [shape: f32[4,32,1], index: 2, kind: input, shape index: {}]   ;;  %s3615_s3 = inlined_call_operand.vmem [shape: f32[16,32], index: 3, kind: input, shape index: {}]   ;;  %s3616_s4 = inlined_call_operand.vmem [shape: f32[1,32], index: 4, kind: input, shape index: {}]   ;;  %s3617_s5 = inlined_call_operand.vmem [shape: f32[32,8], index: 5, kind: input, shape index: {}]   ;;  %s3618_s6 = inlined_call_operand.vmem [shape: f32[1,8], index: 6, kind: input, shape index: {}]   ;;  %s3619_s7 = inlined_call_operand.vmem [shape: f32[32,8], index: 7, kind: input, shape index: {}]   ;;  %s3620_s8 = inlined_call_operand.vmem [shape: f32[8,8], index: 8, kind: input, shape index: {}]   ;;  %s3621_s9 = inlined_call_operand.vmem [shape: f32[1,8], index: 9, kind: input, shape index: {}]   ;;  %s3622_s10 = inlined_call_operand.vmem [shape: f32[16,32], index: 10, kind: input, shape index: {}]   ;;  %s3623_s11 = inlined_call_operand.vmem [shape: f32[1,32], index: 11, kind: input, shape index: {}]   ;;  %s3624_s12 = inlined_call_operand.vmem [shape: f32[32,32], index: 12, kind: input, shape index: {}]   ;;  %s3625_s13 = inlined_call_operand.vmem [shape: f32[1,32], index: 13, kind: input, shape index: {}]   ;;  %s3626_s14 = inlined_call_operand.vmem [shape: f32[32,32], index: 14, kind: input, shape index: {}]   ;;  %s3627_s15 = inlined_call_operand.vmem [shape: f32[32,32], index: 15, kind: input, shape index: {}]   ;;  %s3628_s16 = inlined_call_operand.vmem [shape: f32[1,32], index: 16, kind: input, shape index: {}]   ;;  %s3629_s17 = inlined_call_operand.vmem [shape: f32[4,1,32], index: 17, kind: output, shape index: {0}]   ;;  %s3630_s18 = inlined_call_operand.vmem [shape: f32[4,8,32], index: 18, kind: output, shape index: {1}]   ;;  %s3631_s19 = inlined_call_operand.vmem [shape: f32[4,8,8], index: 19, kind: output, shape index: {2}]  }
   0x1   :  { %3633 = sst [smem:[#allocation2_spill]] %s3612_s0  ;;  %s3068_s0 = smov 0  }
   0x2   :  { %3634 = sst [smem:[#allocation3_spill]] %s3613_s1 }
   0x3   :  { %3635 = sst [smem:[#allocation4_spill]] %s3614_s2 }
   0x4   :  { %3636 = sst [smem:[#allocation5_spill]] %s3615_s3 }
   0x5 LB: > { %s2540_s30 = sadd.s32 4294967295, %s2963_s0   ;;  %p2544_p0 = scmp.ge.s32.totalorder %s2963_s0, 1  ;;  %s2963_s0 = sphi %s3068_s0, %s30_s0  }
   0x6   : > { %p568_p1 = scmp.lt.s32.totalorder %s2963_s0, 3 }
   0x8   : > { %p569_p2 = pnand %p2544_p0, %p568_p1 }
   0x9   : > { %s2545_s20 = sshll.u32 (!%p569_p2), %s2540_s30, 1  ;;  %s3637_s2 = sld [smem:[#allocation2_spill]] (!%p569_p2) }
   0xa   : > { %572 = sbr.rel (%p569_p2) target bundleno = 2124 (0x84c), region = 88  ;;  %p647_p3 = scmp.lt.s32.totalorder (!%p569_p2), %s2545_s20, 3 }
   0xb   : > { %s3638_s3 = sld [smem:[#allocation3_spill]] (!%p569_p2) }
   0xc   : > { %s3639_s29 = sld [smem:[#allocation5_spill]] (!%p569_p2) }
   0xf   : > { %v693_v0 = vlaneseq  ;;  %s3642_s20 = smov (!%p647_p3, %s2545_s20), 3  ;;  %vm720_vm4 = vcmask 261120   ;;  %v2965_v51 = vmov 0   ;;  %vm917_vm5 = vcmask 130048  }
  0x10   : > { %s3079_s21 = sshll.u32 %s3642_s20, 5  ;;  %2906 = vset.pattern.permute.xlu1 %v2965_v51  ;;  %2905 = vset.pattern.permute.xlu0 %v2965_v51  ;;  %vm1296_vm6 = vcmask 1043456   ;;  %vm1283_vm7 = vcmask 64512   ;;  %vm2967_vm8 = vmmov 0   ;;  %s670_s30 = scalar_lea.vmem %s3629_s17, %s3642_s20  ;;  %vm1989_vm9 = vcmask 253952  }
  0x11   : > { %v694_v1 = vshrl.u32 %v693_v0, 7  ;;  %v699_v2 = vand.u32 127, %v693_v0  ;;  %s651_s23 = scalar_lea.vmem %s3637_s2, %s3079_s21  ;;  %s3089_s26 = scalar_lea.vmem %s3638_s3, %s3079_s21 }
  0x12   : > { %v775_v6 = vld [vmem:[%s651_s23 + $0x10] sm:$0xff]  ;;  %v776_v7 = vld [vmem:[%s651_s23 + $0x18] sm:$0xff]  ;;  %v773_v11 = vld [vmem:[%s651_s23] sm:$0xff] }
  0x13   : > { %v695_v3 = vadd.s32 8, %v694_v1  ;;  %v696_v4 = vadd.s32 16, %v694_v1  ;;  %v697_v5 = vadd.s32 24, %v694_v1  ;;  %v779_v8 = vld [vmem:[%s651_s23 + $0x30] sm:$0xff]  ;;  %vm700_vm0 = vcmp.eq.s32.totalorder %v694_v1, %v699_v2  ;;  %v780_v10 = vld [vmem:[%s651_s23 + $0x38] sm:$0xff]  ;;  %v774_v12 = vld [vmem:[%s651_s23 + $0x8] sm:$0xff] }
  0x14   : > { %v782_v9 = vpack.c.bf16 %v776_v7, %v775_v6  ;;  %v784_v13 = vpack.c.bf16 %v780_v10, %v779_v8  ;;  %v781_v14 = vpack.c.bf16 %v774_v12, %v773_v11  ;;  %v777_v15 = vld [vmem:[%s651_s23 + $0x20] sm:$0xff]  ;;  %v778_v16 = vld [vmem:[%s651_s23 + $0x28] sm:$0xff]  ;;  %v3100_v21 = vld [vmem:[%s3089_s26 + $0x10] sm:$0xff]  ;;  %s3640_s23 = sld [smem:[#allocation4_spill]] }
  0x15   : > { %vm701_vm1 = vcmp.eq.s32.totalorder %v695_v3, %v699_v2  ;;  %vm702_vm2 = vcmp.eq.s32.totalorder %v696_v4, %v699_v2  ;;  %vm703_vm3 = vcmp.eq.s32.totalorder %v697_v5, %v699_v2  ;;  %v3092_v17 = vld [vmem:[%s3089_s26] sm:$0xff]  ;;  %v783_v18 = vpack.c.bf16 %v778_v16, %v777_v15  ;;  %v3095_v19 = vld [vmem:[%s3089_s26 + $0x8] sm:$0xff]  ;;  %v3103_v22 = vld [vmem:[%s3089_s26 + $0x18] sm:$0xff] }
  0x16   : > { %2707 = vmatprep.subr.bf16.mxu0 %v782_v9  ;;  %v712_v20 = vsel %vm700_vm0, 1.0, %v3092_v17  ;;  %2715 = vmatprep.subr.bf16.mxu1 %v784_v13  ;;  %v713_v23 = vsel %vm701_vm1, 1.0, %v3095_v19  ;;  %v2224_v24 = vpack.c.bf16 %v3095_v19, %v3092_v17  ;;  %v714_v25 = vsel %vm702_vm2, 1.0, %v3100_v21  ;;  %v3114_v27 = vld [vmem:[%s3089_s26 + $0x20] sm:$0xff]  ;;  %v3117_v28 = vld [vmem:[%s3089_s26 + $0x28] sm:$0xff]  ;;  %v691_v29 = vld [vmem:[%s3089_s26 + $0x30] sm:$0xff] }
  0x17   : > { %2708 = vmatpush3.bf16.msra.mxu0 %v782_v9  ;;  %v715_v26 = vsel %vm703_vm3, 1.0, %v3103_v22  ;;  %2716 = vmatpush3.bf16.msra.mxu1 %v784_v13  ;;  %v3120_v30 = vpack.c.bf16 %v713_v23, %v712_v20  ;;  %v716_v31 = vsel %vm700_vm0, 1.0, %v3114_v27  ;;  %v717_v32 = vsel %vm701_vm1, 1.0, %v3117_v28  ;;  %v692_v33 = vld [vmem:[%s3089_s26 + $0x38] sm:$0xff]  ;;  %v907_v48 = vld [vmem:[%s3639_s29] sm:$0xff]  ;;  %v908_v49 = vld [vmem:[%s3639_s29 + $0x8] sm:$0xff] }
  0x18   : > { %2709 = vmatprep.subr.bf16.mxu0 %v781_v14  ;;  %2717 = vmatprep.subr.bf16.mxu1 %v783_v18  ;;  %v3127_v34 = vpack.c.bf16 %v717_v32, %v716_v31  ;;  %v2226_v35 = vpack.c.bf16 %v3117_v28, %v3114_v27  ;;  %v718_v36 = vsel %vm702_vm2, 1.0, %v691_v29  ;;  %v719_v37 = vsel %vm703_vm3, 1.0, %v692_v33  ;;  %v1780_v17 = vld [vmem:[%s3627_s15 + $0x10] sm:$0xff]  ;;  %v1781_v19 = vld [vmem:[%s3627_s15 + $0x18] sm:$0xff] }
  0x19   : > { %2711 = vmatprep.mubr.msk.bf16.mxu0 %vm720_vm4, %v3120_v30  ;;  %v3135_v38 = vpack.c.bf16 %v715_v26, %v714_v25  ;;  %v727_v39 = vsel %vm720_vm4, %v714_v25, 0.0  ;;  %v721_v40 = vsel %vm720_vm4, %v712_v20, 0.0  ;;  %v3141_v41 = vpack.c.bf16 %v719_v37, %v718_v36 }
  0x1a   : > { %2719 = vmatprep.mubr.msk.bf16.mxu1 %vm720_vm4, %v3127_v34  ;;  %728 = vadd.xlane.f32.xlu1 %v727_v39  ;;  %v730_v42 = vsel %vm720_vm4, %v715_v26, 0.0  ;;  %v724_v43 = vsel %vm720_vm4, %v713_v23, 0.0  ;;  %v736_v44 = vsel %vm720_vm4, %v717_v32, 0.0  ;;  %v733_v45 = vsel %vm720_vm4, %v716_v31, 0.0  ;;  %s665_s24 = scalar_lea.vmem %s3640_s23, %s3079_s21 }
  0x1b   : > { %2710 = vmatpush3.bf16.msra.mxu0 %v781_v14  ;;  %2718 = vmatpush3.bf16.msra.mxu1 %v783_v18  ;;  %v742_v46 = vsel %vm720_vm4, %v719_v37, 0.0  ;;  %v739_v47 = vsel %vm720_vm4, %v718_v36, 0.0  ;;  %v909_v50 = vpack.c.bf16 %v908_v49, %v907_v48  ;;  %v768_v52 = vld [vmem:[%s665_s24 + $0x18] sm:$0xff]  ;;  %v765_v53 = vld [vmem:[%s665_s24] sm:$0xff]  ;;  %v767_v54 = vld [vmem:[%s665_s24 + $0x10] sm:$0xff] }
  0x1c   : > { %722 = vadd.xlane.f32.xlu0 %v721_v40  ;;  %v766_v55 = vld [vmem:[%s665_s24 + $0x8] sm:$0xff]  ;;  %v771_v56 = vld [vmem:[%s665_s24 + $0x30] sm:$0xff]  ;;  %v772_v57 = vld [vmem:[%s665_s24 + $0x38] sm:$0xff] }
  0x1d   : > { %2723 = vmatprep.subr.bf16.mxu0 %v909_v50  ;;  %v769_v58 = vld [vmem:[%s665_s24 + $0x20] sm:$0xff]  ;;  %v770_v59 = vld [vmem:[%s665_s24 + $0x28] sm:$0xff] }
  0x1e   : > { %2712 = vmatmul.mubr.msk.bf16.vlgmr.msra.gmra.mxu0 %vm720_vm4, %v3135_v38  ;;  %2720 = vmatmul.mubr.msk.bf16.vlgmr.msra.gmra.mxu1 %vm720_vm4, %v3141_v41 }
  0x1f   : > { %731 = vadd.xlane.f32.xlu1 %v730_v42  ;;  %2737 = vmatprep.mubr.msk.bf16.mxu1 %vm720_vm4, %v3120_v30 }
  0x20   : > { %725 = vadd.xlane.f32.xlu0 %v724_v43  ;;  %2724 = vmatpush3.bf16.msra.mxu0 %v909_v50 }
  0x23   : > { %737 = vadd.xlane.f32.xlu1 %v736_v44 }
  0x24   : > { %734 = vadd.xlane.f32.xlu0 %v733_v45 }
  0x27   : > { %743 = vadd.xlane.f32.xlu1 %v742_v46 }
  0x28   : > { %740 = vadd.xlane.f32.xlu0 %v739_v47 }
  0x38   : > { %1012 = vperm.xlu1 %2906, %v768_v52  }
  0x3c   : > { %997 = vperm.xlu1 %2906, %v765_v53  }
  0x3e   : > { %1007 = vperm.xlu0 %2905, %v767_v54  }
  0x40   : > { %1002 = vperm.xlu1 %2906, %v766_v55  }
  0x44   : > { %1027 = vperm.xlu1 %2906, %v771_v56   ;;  %v2563_v56 = vld [vmem:[%s3616_s4] ss:$0 sm:$0xff] }
  0x48   : > { %1032 = vperm.xlu1 %2906, %v772_v57  }
  0x4c   : > { %1017 = vperm.xlu1 %2906, %v769_v58  }
  0x50   : > { %1022 = vperm.xlu1 %2906, %v770_v59  }
  0xa3   : > { %v729_v60 = vpop.xlane.xlu1 %728 }
  0xa4   : > { %v747_v0 = vmax.f32 %v729_v60, 1.0 }
  0xa5   : > { %v723_v61 = vpop.xlane.xlu0 %722 }
  0xa6   : > { %v745_v1 = vmax.f32 %v723_v61, 1.0  ;;  %2907 = vrcp.f32 %v747_v0 }
  0xa8   : > { %v732_v62 = vpop.xlane.xlu1 %731  ;;  %2909 = vrcp.f32 %v745_v1 }
  0xa9   : > { %v726_v63 = vpop.xlane.xlu0 %725  ;;  %v748_v3 = vmax.f32 %v732_v62, 1.0 }
  0xaa   : > { %v746_v6 = vmax.f32 %v726_v63, 1.0 }
  0xab   : > { %2911 = vrcp.f32 %v748_v3 }
  0xac   : > { %v738_v2 = vpop.xlane.xlu1 %737 }
  0xad   : > { %v735_v4 = vpop.xlane.xlu0 %734  ;;  %v750_v7 = vmax.f32 %v738_v2, 1.0 }
  0xae   : > { %v749_v5 = vmax.f32 %v735_v4, 1.0 }
  0xb0   : > { %2913 = vrcp.f32 %v749_v5  ;;  %v744_v8 = vpop.xlane.xlu1 %743 }
  0xb1   : > { %2915 = vrcp.f32 %v746_v6  ;;  %v741_v9 = vpop.xlane.xlu0 %740  ;;  %v752_v10 = vmax.f32 %v744_v8, 1.0 }
  0xb2   : > { %2917 = vrcp.f32 %v750_v7  ;;  %v751_v11 = vmax.f32 %v741_v9, 1.0 }
  0xb3   : > { %2919 = vrcp.f32 %v752_v10  ;;  %v3165_v12 = vpop.eup %2907 }
  0xb4   : > { %2921 = vrcp.f32 %v751_v11  ;;  %v3205_v52 = vpop.permute.xlu1 %1012 }
  0xb5   : > { %v3167_v14 = vpop.eup %2909 }
  0xb8   : > { %v3169_v16 = vpop.eup %2911  ;;  %v3207_v53 = vpop.permute.xlu1 %997 }
  0xb9   : > { %v3216_v59 = vpop.permute.xlu0 %1007 }
  0xbc   : > { %v3209_v54 = vpop.permute.xlu1 %1002 }
  0xbd   : > { %v3171_v20 = vpop.eup %2913 }
  0xbe   : > { %v3173_v25 = vpop.eup %2915 }
  0xbf   : > { %v3175_v29 = vpop.eup %2917 }
  0xc0   : > { %v3185_v45 = vpop.eup %2919  ;;  %v3211_v55 = vpop.permute.xlu1 %1027 }
  0xc1   : > { %v3191_v48 = vpop.eup %2921 }
  0xc4   : > { %v3218_v62 = vpop.permute.xlu1 %1032 }
  0xc8   : > { %v3224_v11 = vpop.permute.xlu1 %1017 }
  0xde   : > { %v2713_v13 = vpop.f32.mrf.mxu0  ;;  %v2721_v15 = vpop.f32.mrf.mxu1 }
  0xdf   : > { %v897_v42 = vmul.f32 %v3165_v12, %v2713_v13  ;;  %v901_v49 = vmul.f32 %v3191_v48, %v2721_v15 }
  0xe0   : > { %v825_v18 = vpop.f32.mrf.mxu0  ;;  %v880_v23 = vpop.f32.mrf.mxu1 }
  0xe1   : > { %v899_v33 = vmul.f32 %v3171_v20, %v880_v23  ;;  %v895_v37 = vmul.f32 %v3167_v14, %v825_v18 }
  0xe2   : > { %v2714_v26 = vpop.f32.mrf.mxu0  ;;  %v2722_v31 = vpop.f32.mrf.mxu1 }
  0xe3   : > { %v898_v32 = vmul.f32 %v3169_v16, %v2714_v26  ;;  %v902_v50 = vmul.f32 %v3185_v45, %v2722_v31 }
  0xe4   : > { %v828_v36 = vpop.f32.mrf.mxu0  ;;  %v883_v40 = vpop.f32.mrf.mxu1 }
  0xe5   : > { %v896_v39 = vmul.f32 %v3173_v25, %v828_v36  ;;  %v900_v43 = vmul.f32 %v3175_v29, %v883_v40  ;;  %v3187_v46 = vpack.c.bf16 %v898_v32, %v897_v42  ;;  %v3201_v51 = vpack.c.bf16 %v902_v50, %v901_v49 }
  0xe7   : > { %v3183_v44 = vpack.c.bf16 %v896_v39, %v895_v37  ;;  %v3189_v47 = vpack.c.bf16 %v900_v43, %v899_v33  ;;  %v3236_v43 = vpop.permute.xlu1 %1022 }
  0xe9   : > { %2725 = vmatprep.mubr.msk.bf16.mxu0 %vm917_vm5, %v3183_v44 }
  0xea   : > { %2726 = vmatmul.mubr.msk.bf16.vlgmr.msra.gmra.mxu0 %vm917_vm5, %v3187_v46 }
  0xeb   : > { %2729 = vmatprep.mubr.msk.bf16.mxu0 %vm917_vm5, %v3189_v47 }
  0xf2   : > { %2730 = vmatmul.mubr.msk.bf16.gmra.mxu0 %vm917_vm5, %v3201_v51 }
 0x1aa   : > { %v2727_v57 = vpop.f32.mrf.mxu0 }
 0x1ab   : > { %v973_v58 = vadd.f32 %v2727_v57, %v2563_v56 }
 0x1ac   : > { %v964_v60 = vpop.f32.mrf.mxu0 }
 0x1ad   : > { %v965_v61 = vadd.f32 %v2563_v56, %v964_v60  ;;  %v1037_v1 = vmul.f32 %v3216_v59, %v973_v58 }
 0x1ae   : > { %v2728_v63 = vpop.f32.mrf.mxu0 }
 0x1af   : > { %v976_v0 = vadd.f32 %v2728_v63, %v2563_v56  ;;  %v1035_v3 = vmul.f32 %v3207_v53, %v965_v61  ;;  %v1045_v10 = vmax.f32 %v1037_v1, 0.0 }
 0x1b0   : > { %v967_v2 = vpop.f32.mrf.mxu0 }
 0x1b1   : > { %v1038_v4 = vmul.f32 %v3205_v52, %v976_v0  ;;  %v968_v5 = vadd.f32 %v2563_v56, %v967_v2  ;;  %v1043_v15 = vmax.f32 %v1035_v3, 0.0  ;;  %v1168_v0 = vld [vmem:[%s3617_s5 + $0x18] sm:$0xff]  ;;  %v1165_v2 = vld [vmem:[%s3617_s5] sm:$0xff]  ;;  %v1166_v3 = vld [vmem:[%s3617_s5 + $0x8] sm:$0xff] }
 0x1b2   : > { %v2731_v6 = vpop.f32.mrf.mxu0 }
 0x1b3   : > { %v1046_v7 = vmax.f32 %v1038_v4, 0.0  ;;  %v1036_v8 = vmul.f32 %v3209_v54, %v968_v5  ;;  %v989_v9 = vadd.f32 %v2731_v6, %v2563_v56  ;;  %v1169_v4 = vpack.c.bf16 %v1166_v3, %v1165_v2  ;;  %v1273_v5 = vld [vmem:[%s3619_s7 + $0x10] sm:$0xff]  ;;  %v1274_v6 = vld [vmem:[%s3619_s7 + $0x18] sm:$0xff]  ;;  %v1281_v3 = vld [vmem:[%s3620_s8] sm:$0xff] }
 0x1b4   : > { %v980_v13 = vpop.f32.mrf.mxu0 }
 0x1b5   : > { %v1044_v18 = vmax.f32 %v1036_v8, 0.0  ;;  %v981_v23 = vadd.f32 %v2563_v56, %v980_v13  ;;  %v3226_v26 = vpack.c.bf16 %v1046_v7, %v1045_v10  ;;  %v1041_v32 = vmul.f32 %v3211_v55, %v989_v9 }
 0x1b6   : > { %v2732_v31 = vpop.f32.mrf.mxu0  ;;  %v1276_v7 = vpack.c.bf16 %v1274_v6, %v1273_v5 }
 0x1b7   : > { %v992_v33 = vadd.f32 %v2732_v31, %v2563_v56  ;;  %2733 = vmatprep.subr.bf16.mxu1 %v3226_v26  ;;  %v3230_v36 = vpack.c.bf16 %v1044_v18, %v1043_v15  ;;  %v1039_v39 = vmul.f32 %v3224_v11, %v981_v23  ;;  %v1049_v49 = vmax.f32 %v1041_v32, 0.0  ;;  %v1271_v31 = vld [vmem:[%s3619_s7] sm:$0xff]  ;;  %v1272_v32 = vld [vmem:[%s3619_s7 + $0x8] sm:$0xff] }
 0x1b8   : > { %v983_v37 = vpop.f32.mrf.mxu0  ;;  %2734 = vmatpush3.bf16.msra.mxu1 %v3226_v26 }
 0x1b9   : > { %v1042_v40 = vmul.f32 %v3218_v62, %v992_v33  ;;  %v984_v42 = vadd.f32 %v2563_v56, %v983_v37  ;;  %2735 = vmatprep.subr.bf16.mxu1 %v3230_v36  ;;  %v1047_v58 = vmax.f32 %v1039_v39, 0.0  ;;  %v1167_v56 = vld [vmem:[%s3617_s5 + $0x10] sm:$0xff] }
 0x1ba   : > { %v1170_v1 = vpack.c.bf16 %v1168_v0, %v1167_v56 }
 0x1bb   : > { %v1050_v50 = vmax.f32 %v1042_v40, 0.0  ;;  %v1040_v57 = vmul.f32 %v3236_v43, %v984_v42 }
 0x1bc   : > { %2736 = vmatpush3.bf16.msra.mxu1 %v3230_v36  ;;  %2749 = vmatprep.subr.bf16.mxu0 %v1170_v1 }
 0x1bd   : > { %v1048_v60 = vmax.f32 %v1040_v57, 0.0  ;;  %v1054_v61 = vpack.c.bf16 %v1050_v50, %v1049_v49  ;;  %2750 = vmatpush3.bf16.msra.mxu0 %v1170_v1  ;;  %v1275_v49 = vpack.c.bf16 %v1272_v32, %v1271_v31 }
 0x1be   : > { %2751 = vmatprep.subr.bf16.mxu0 %v1169_v4 }
 0x1bf   : > { %2738 = vmatmul.mubr.msk.bf16.vlgmr.msra.gmra.mxu1 %vm720_vm4, %v3135_v38  ;;  %2741 = vmatprep.subr.bf16.mxu1 %v1054_v61  ;;  %v1053_v63 = vpack.c.bf16 %v1048_v60, %v1047_v58 }
 0x1c0   : > { %2742 = vmatpush3.bf16.msra.mxu1 %v1054_v61  ;;  %2745 = vmatprep.mubr.msk.bf16.mxu1 %vm720_vm4, %v3127_v34 }
 0x1c1   : > { %2743 = vmatprep.subr.bf16.mxu1 %v1053_v63  ;;  %2752 = vmatpush3.bf16.msra.mxu0 %v1169_v4  ;;  %v1282_v4 = vpack.c.bf16 %v1281_v3, %v1281_v3 }
 0x1c2   : > { %2771 = vmatprep.subr.bf16.mxu0 %v1276_v7 }
 0x1c3   : > { %v1298_v5 = vsel %vm1296_vm6, %v1282_v4, 0 }
 0x1c4   : > { %2744 = vmatpush3.bf16.msra.mxu1 %v1053_v63 }
 0x1c5   : > { %2893 = vmatprep.subr.msk.bf16.mxu1 %vm1296_vm6, %v1282_v4 }
 0x1c7   : > { %2746 = vmatmul.mubr.msk.bf16.vlgmr.msra.gmra.mxu1 %vm720_vm4, %v3141_v41 }
 0x1c8   : > { %2762 = vmatpush3.bf16.msra.mxu1 %v1298_v5 }
 0x27f   : > { %v2739_v8 = vpop.f32.mrf.mxu1 }
 0x280   : > { %v1155_v33 = vmul.f32 %v3165_v12, %v2739_v8 }
 0x281   : > { %v1089_v9 = vpop.f32.mrf.mxu1 }
 0x282   : > { %v1153_v18 = vmul.f32 %v3167_v14, %v1089_v9 }
 0x283   : > { %v2740_v10 = vpop.f32.mrf.mxu1 }
 0x284   : > { %v1156_v13 = vmul.f32 %v3169_v16, %v2740_v10 }
 0x285   : > { %v1092_v15 = vpop.f32.mrf.mxu1 }
 0x286   : > { %v1154_v23 = vmul.f32 %v3173_v25, %v1092_v15  ;;  %v1162_v40 = vpack.c.bf16 %v1156_v13, %v1155_v33 }
 0x287   : > { %v2747_v37 = vpop.f32.mrf.mxu1 }
 0x288   : > { %v1161_v39 = vpack.c.bf16 %v1154_v23, %v1153_v18  ;;  %v1159_v0 = vmul.f32 %v3191_v48, %v2747_v37 }
 0x289   : > { %v1138_v42 = vpop.f32.mrf.mxu1 }
 0x28a   : > { %2753 = vmatprep.mubr.msk.bf16.mxu0 %vm720_vm4, %v1161_v39  ;;  %v1157_v60 = vmul.f32 %v3171_v20, %v1138_v42 }
 0x28b   : > { %v2748_v50 = vpop.f32.mrf.mxu1  ;;  %2754 = vmatmul.mubr.msk.bf16.vlgmr.msra.gmra.mxu0 %vm720_vm4, %v1162_v40 }
 0x28c   : > { %2772 = vmatpush3.bf16.msra.mxu0 %v1276_v7  ;;  %v1160_v57 = vmul.f32 %v3185_v45, %v2748_v50 }
 0x28d   : > { %v1141_v58 = vpop.f32.mrf.mxu1  ;;  %2773 = vmatprep.subr.bf16.mxu0 %v1275_v49 }
 0x28e   : > { %v1158_v56 = vmul.f32 %v3175_v29, %v1141_v58  ;;  %v1164_v2 = vpack.c.bf16 %v1160_v57, %v1159_v0 }
 0x290   : > { %v1163_v1 = vpack.c.bf16 %v1158_v56, %v1157_v60  ;;  %2774 = vmatpush3.bf16.msra.mxu0 %v1275_v49 }
 0x292   : > { %2757 = vmatprep.mubr.msk.bf16.mxu0 %vm720_vm4, %v1163_v1 }
 0x293   : > { %2758 = vmatmul.mubr.msk.bf16.gmra.mxu0 %vm720_vm4, %v1164_v2 }
 0x294   : > { %2775 = vmatprep.mubr.msk.bf16.mxu0 %vm720_vm4, %v3230_v36  ;;  %v1458_v36 = vld [vmem:[%s3622_s10 + $0x8] sm:$0xff] }
 0x29b   : > { %2776 = vmatmul.mubr.msk.bf16.vlgmr.msra.gmra.mxu0 %vm720_vm4, %v3226_v26  ;;  %v1457_v26 = vld [vmem:[%s3622_s10] sm:$0xff] }
 0x29c   : > { %2779 = vmatprep.mubr.msk.bf16.mxu0 %vm720_vm4, %v1053_v63  ;;  %v2572_v63 = vld [vmem:[%s3618_s6] ss:$0 sm:$0xff] }
 0x2a3   : > { %2780 = vmatmul.mubr.msk.bf16.gmra.mxu0 %vm720_vm4, %v1054_v61  ;;  %v1459_v61 = vpack.c.bf16 %v1458_v36, %v1457_v26 }
 0x2a4   : > { %2797 = vmatprep.mubr.msk.bf16.mxu0 %vm720_vm4, %v3120_v30 }
 0x2a5   : > { %2783 = vmatprep.subr.bf16.mxu1 %v1459_v61 }
 0x34b   : > { %v2755_v30 = vpop.f32.mrf.mxu0 }
 0x34c   : > { %v1233_v8 = vadd.f32 %v2755_v30, %v2572_v63 }
 0x34d   : > { %v1224_v6 = vpop.f32.mrf.mxu0 }
 0x34e   : > { %v1225_v7 = vadd.f32 %v2572_v63, %v1224_v6  ;;  %v1257_v31 = vmul.f32 %v1233_v8, %v3216_v59 }
 0x34f   : > { %v2756_v9 = vpop.f32.mrf.mxu0 }
 0x350   : > { %v1236_v10 = vadd.f32 %v2756_v9, %v2572_v63  ;;  %v1255_v15 = vmul.f32 %v1225_v7, %v3207_v53  ;;  %v1265_v50 = vmax.f32 %v1257_v31, 0.0 }
 0x351   : > { %v1227_v13 = vpop.f32.mrf.mxu0 }
 0x352   : > { %v1258_v18 = vmul.f32 %v1236_v10, %v3205_v52  ;;  %v1228_v23 = vadd.f32 %v2572_v63, %v1227_v13  ;;  %v1263_v40 = vmax.f32 %v1255_v15, 0.0 }
 0x353   : > { %v2759_v32 = vpop.f32.mrf.mxu0 }
 0x354   : > { %v1256_v33 = vmul.f32 %v1228_v23, %v3209_v54  ;;  %v1266_v37 = vmax.f32 %v1258_v18, 0.0  ;;  %v1249_v57 = vadd.f32 %v2759_v32, %v2572_v63 }
 0x355   : > { %v1240_v39 = vpop.f32.mrf.mxu0 }
 0x356   : > { %v1264_v42 = vmax.f32 %v1256_v33, 0.0  ;;  %v1241_v49 = vadd.f32 %v2572_v63, %v1240_v39  ;;  %v1278_v0 = vpack.c.bf16 %v1266_v37, %v1265_v50  ;;  %v1261_v5 = vmul.f32 %v1249_v57, %v3211_v55 }
 0x357   : > { %v2760_v58 = vpop.f32.mrf.mxu0 }
 0x358   : > { %v1277_v60 = vpack.c.bf16 %v1264_v42, %v1263_v40  ;;  %v1252_v56 = vadd.f32 %v2760_v58, %v2572_v63  ;;  %v1259_v2 = vmul.f32 %v1241_v49, %v3224_v11  ;;  %v1269_v7 = vmax.f32 %v1261_v5, 0.0  ;;  %v2586_v5 = vld [vmem:[%s3623_s11] ss:$0 sm:$0xff] }
 0x359   : > { %v1243_v1 = vpop.f32.mrf.mxu0 }
 0x35a   : > { %v1262_v3 = vmul.f32 %v1252_v56, %v3218_v62  ;;  %v1244_v4 = vadd.f32 %v2572_v63, %v1243_v1  ;;  %2763 = vmatprep.mubr.msk.bf16.mxu1 %vm1283_vm7, %v1277_v60  ;;  %v1267_v30 = vmax.f32 %v1259_v2, 0.0 }
 0x35b   : > { %2764 = vmatmul.mubr.msk.bf16.vlgmr.msra.gmra.mxu1 %vm1283_vm7, %v1278_v0 }
 0x35c   : > { %v1260_v26 = vmul.f32 %v1244_v4, %v3236_v43  ;;  %2784 = vmatpush3.bf16.msra.mxu1 %v1459_v61  ;;  %v1270_v36 = vmax.f32 %v1262_v3, 0.0  ;;  %v2777_v61 = vpop.f32.mrf.mxu0 }
 0x35e   : > { %v1268_v6 = vmax.f32 %v1260_v26, 0.0  ;;  %v1280_v9 = vpack.c.bf16 %v1270_v36, %v1269_v7  ;;  %v1411_v63 = vpop.f32.mrf.mxu0 }
 0x360   : > { %v1279_v8 = vpack.c.bf16 %v1268_v6, %v1267_v30  ;;  %v2778_v10 = vpop.f32.mrf.mxu0 }
 0x362   : > { %2767 = vmatprep.mubr.msk.bf16.mxu1 %vm1283_vm7, %v1279_v8  ;;  %v1414_v13 = vpop.f32.mrf.mxu0 }
 0x363   : > { %2768 = vmatmul.mubr.msk.bf16.gmra.mxu1 %vm1283_vm7, %v1280_v9 }
 0x364   : > { %2785 = vmatprep.mubr.msk.bf16.mxu1 %vm917_vm5, %v3183_v44  ;;  %v2781_v18 = vpop.f32.mrf.mxu0 }
 0x36b   : > { %2786 = vmatmul.mubr.msk.bf16.vlgmr.msra.gmra.mxu1 %vm917_vm5, %v3187_v46  ;;  %v2585_v46 = vld [vmem:[%s3621_s9] ss:$0 sm:$0xff] }
 0x36c   : > { %2789 = vmatprep.mubr.msk.bf16.mxu1 %vm917_vm5, %v3189_v47 }
 0x373   : > { %2790 = vmatmul.mubr.msk.bf16.gmra.mxu1 %vm917_vm5, %v3201_v51  ;;  %v1427_v51 = vpop.f32.mrf.mxu0 }
 0x374   : > { %2805 = vmatprep.mubr.msk.bf16.mxu1 %vm720_vm4, %v3127_v34 }
 0x375   : > { %v2782_v50 = vpop.f32.mrf.mxu0 }
 0x377   : > { %v1430_v2 = vpop.f32.mrf.mxu0 }
 0x41b   : > { %v2765_v15 = vpop.f32.mrf.mxu1 }
 0x41c   : > { %v1420_v37 = vadd.f32 %v2777_v61, %v2765_v15 }
 0x41d   : > { %v1334_v23 = vpop.f32.mrf.mxu1 }
 0x41e   : > { %v1412_v44 = vadd.f32 %v1411_v63, %v1334_v23  ;;  %v3339_v0 = vadd.f32 %v2585_v46, %v1420_v37 }
 0x41f   : > { %v2766_v31 = vpop.f32.mrf.mxu1 }
 0x420   : > { %v1423_v47 = vadd.f32 %v2778_v10, %v2766_v31  ;;  %v3327_v32 = vadd.f32 %v2585_v46, %v1412_v44  ;;  %v1998_v30 = vsel %vm1283_vm7, %v3339_v0, -inf }
 0x421   : > { %v1337_v33 = vpop.f32.mrf.mxu1 }
 0x422   : > { %v1415_v34 = vadd.f32 %v1414_v13, %v1337_v33  ;;  %v1992_v39 = vsel %vm1283_vm7, %v3327_v32, -inf  ;;  %v3331_v40 = vadd.f32 %v2585_v46, %v1423_v47 }
 0x423   : > { %1993 = vmax.xlane.f32.xlu1 %v1992_v39  ;;  %v2769_v42 = vpop.f32.mrf.mxu1 }
 0x424   : > { %v3333_v49 = vadd.f32 %v2585_v46, %v1415_v34  ;;  %v2001_v56 = vsel %vm1283_vm7, %v3331_v40, -inf  ;;  %v1436_v3 = vadd.f32 %v2781_v18, %v2769_v42 }
 0x425   : > { %v1350_v57 = vpop.f32.mrf.mxu1 }
 0x426   : > { %v1428_v58 = vadd.f32 %v1427_v51, %v1350_v57  ;;  %v1995_v60 = vsel %vm1283_vm7, %v3333_v49, -inf  ;;  %v3350_v63 = vadd.f32 %v2585_v46, %v1436_v3 }
 0x427   : > { %1996 = vmax.xlane.f32.xlu0 %v1995_v60  ;;  %2002 = vmax.xlane.f32.xlu1 %v2001_v56  ;;  %v2770_v1 = vpop.f32.mrf.mxu1 }
 0x428   : > { %v1439_v26 = vadd.f32 %v2782_v50, %v2770_v1  ;;  %v3346_v6 = vadd.f32 %v2585_v46, %v1428_v58  ;;  %v2010_v51 = vsel %vm1283_vm7, %v3350_v63, -inf }
 0x429   : > { %v1353_v4 = vpop.f32.mrf.mxu1 }
 0x42a   : > { %v1431_v36 = vadd.f32 %v1430_v2, %v1353_v4  ;;  %v2004_v13 = vsel %vm1283_vm7, %v3346_v6, -inf  ;;  %v3356_v18 = vadd.f32 %v2585_v46, %v1439_v26 }
 0x42b   : > { %1999 = vmax.xlane.f32.xlu0 %v1998_v30  ;;  %v2787_v7 = vpop.f32.mrf.mxu1 }
 0x42c   : > { %v1510_v8 = vadd.f32 %v2787_v7, %v2586_v5  ;;  %v3348_v9 = vadd.f32 %v2585_v46, %v1431_v36  ;;  %v2013_v39 = vsel %vm1283_vm7, %v3356_v18, -inf }
 0x42d   : > { %v1501_v61 = vpop.f32.mrf.mxu1 }
 0x42e   : > { %v1502_v10 = vadd.f32 %v2586_v5, %v1501_v61  ;;  %v2007_v15 = vsel %vm1283_vm7, %v3348_v9, -inf  ;;  %v1534_v44 = vmul.f32 %v1510_v8, %v3216_v59 }
 0x42f   : > { %2005 = vmax.xlane.f32.xlu0 %v2004_v13  ;;  %v2788_v23 = vpop.f32.mrf.mxu1  ;;  %2008 = vmax.xlane.f32.xlu1 %v2007_v15 }
 0x430   : > { %v1513_v31 = vadd.f32 %v2788_v23, %v2586_v5  ;;  %v1532_v33 = vmul.f32 %v1502_v10, %v3207_v53  ;;  %v1542_v42 = vmax.f32 %v1534_v44, 0.0 }
 0x431   : > { %v1504_v47 = vpop.f32.mrf.mxu1 }
 0x432   : > { %v1535_v37 = vmul.f32 %v1513_v31, %v3205_v52  ;;  %v1505_v34 = vadd.f32 %v2586_v5, %v1504_v47  ;;  %v1540_v56 = vmax.f32 %v1532_v33, 0.0 }
 0x433   : > { %2011 = vmax.xlane.f32.xlu0 %v2010_v51  ;;  %v2791_v46 = vpop.f32.mrf.mxu1  ;;  %2014 = vmax.xlane.f32.xlu1 %v2013_v39  ;;  %v1770_v39 = vld [vmem:[%s3626_s14 + $0x10] sm:$0xff] }
 0x434   : > { %v1543_v50 = vmax.f32 %v1535_v37, 0.0  ;;  %v1533_v57 = vmul.f32 %v1505_v34, %v3209_v54  ;;  %v1526_v58 = vadd.f32 %v2791_v46, %v2586_v5  ;;  %v1662_v37 = vld [vmem:[%s3624_s12] sm:$0xff]  ;;  %v1663_v34 = vld [vmem:[%s3624_s12 + $0x8] sm:$0xff]  ;;  %v1771_v46 = vld [vmem:[%s3626_s14 + $0x18] sm:$0xff] }
 0x435   : > { %v1517_v60 = vpop.f32.mrf.mxu1 }
 0x436   : > { %v1541_v1 = vmax.f32 %v1533_v57, 0.0  ;;  %v1518_v2 = vadd.f32 %v2586_v5, %v1517_v60  ;;  %v3366_v3 = vpack.c.bf16 %v1543_v50, %v1542_v42  ;;  %v1538_v26 = vmul.f32 %v1526_v58, %v3211_v55 }
 0x437   : > { %v2792_v4 = vpop.f32.mrf.mxu1  ;;  %v3408_v42 = vpack.c.bf16 %v1771_v46, %v1770_v39 }
 0x438   : > { %v1529_v36 = vadd.f32 %v2792_v4, %v2586_v5  ;;  %2793 = vmatprep.subr.bf16.mxu0 %v3366_v3  ;;  %v3370_v30 = vpack.c.bf16 %v1541_v1, %v1540_v56  ;;  %v1536_v8 = vmul.f32 %v1518_v2, %v3224_v11  ;;  %v1546_v13 = vmax.f32 %v1538_v26, 0.0 }
 0x439   : > { %v1520_v7 = vpop.f32.mrf.mxu1  ;;  %2794 = vmatpush3.bf16.msra.mxu0 %v3366_v3 }
 0x43a   : > { %v1539_v61 = vmul.f32 %v1529_v36, %v3218_v62  ;;  %v1521_v10 = vadd.f32 %v2586_v5, %v1520_v7  ;;  %2795 = vmatprep.subr.bf16.mxu0 %v3370_v30  ;;  %v1544_v44 = vmax.f32 %v1536_v8, 0.0  ;;  %v1664_v5 = vld [vmem:[%s3624_s12 + $0x10] sm:$0xff] }
 0x43c   : > { %v1547_v15 = vmax.f32 %v1539_v61, 0.0  ;;  %v1537_v23 = vmul.f32 %v1521_v10, %v3236_v43 }
 0x43d   : > { %2796 = vmatpush3.bf16.msra.mxu0 %v3370_v30 }
 0x43e   : > { %v1545_v31 = vmax.f32 %v1537_v23, 0.0  ;;  %v3378_v47 = vpack.c.bf16 %v1547_v15, %v1546_v13 }
 0x440   : > { %2798 = vmatmul.mubr.msk.bf16.vlgmr.msra.gmra.mxu0 %vm720_vm4, %v3135_v38  ;;  %2801 = vmatprep.subr.bf16.mxu1 %v3378_v47  ;;  %v3383_v51 = vpack.c.bf16 %v1545_v31, %v1544_v44  ;;  %v1665_v38 = vld [vmem:[%s3624_s12 + $0x18] sm:$0xff] }
 0x441   : > { %2802 = vmatpush3.bf16.msra.mxu1 %v3378_v47  ;;  %v1667_v33 = vpack.c.bf16 %v1665_v38, %v1664_v5 }
 0x442   : > { %2803 = vmatprep.subr.bf16.mxu1 %v3383_v51 }
 0x443   : > { %2809 = vmatprep.subr.bf16.mxu0 %v1667_v33 }
 0x444   : > { %2810 = vmatpush3.bf16.msra.mxu0 %v1667_v33 }
 0x445   : > { %2804 = vmatpush3.bf16.msra.mxu1 %v3383_v51 }
 0x448   : > { %2806 = vmatmul.mubr.msk.bf16.vlgmr.msra.gmra.mxu1 %vm720_vm4, %v3141_v41  ;;  %v1666_v41 = vpack.c.bf16 %v1663_v34, %v1662_v37 }
 0x44a   : > { %2811 = vmatprep.subr.bf16.mxu0 %v1666_v41 }
 0x44b   : > { %2812 = vmatpush3.bf16.msra.mxu0 %v1666_v41 }
 0x44c   : > { %2833 = vmatprep.subr.bf16.mxu0 %v3408_v42 }
 0x4ac   : > { %v1994_v50 = vpop.xlane.xlu1 %1993 }
 0x4ad   : > { %v2016_v57 = vsub.f32 %v3327_v32, %v1994_v50 }
 0x4af   : > { %v2024_v58 = vmul.f32 1.442695, %v2016_v57 }
 0x4b0   : > { %v1997_v60 = vpop.xlane.xlu0 %1996  ;;  %v2003_v56 = vpop.xlane.xlu1 %2002 }
 0x4b1   : > { %2923 = vpow2.f32 %v2024_v58  ;;  %v2017_v1 = vsub.f32 %v3333_v49, %v1997_v60  ;;  %v2019_v2 = vsub.f32 %v3331_v40, %v2003_v56 }
 0x4b3   : > { %v2026_v4 = vmul.f32 1.442695, %v2017_v1  ;;  %v2030_v26 = vmul.f32 1.442695, %v2019_v2 }
 0x4b4   : > { %v2000_v36 = vpop.xlane.xlu0 %1999 }
 0x4b5   : > { %2925 = vpow2.f32 %v2026_v4  ;;  %v2018_v7 = vsub.f32 %v3339_v0, %v2000_v36 }
 0x4b6   : > { %2927 = vpow2.f32 %v2030_v26 }
 0x4b7   : > { %v2028_v8 = vmul.f32 1.442695, %v2018_v7 }
 0x4b8   : > { %v2006_v61 = vpop.xlane.xlu0 %2005  ;;  %v2009_v10 = vpop.xlane.xlu1 %2008 }
 0x4b9   : > { %2929 = vpow2.f32 %v2028_v8  ;;  %v2020_v32 = vsub.f32 %v3346_v6, %v2006_v61  ;;  %v2021_v13 = vsub.f32 %v3348_v9, %v2009_v10  ;;  %v1768_v61 = vld [vmem:[%s3626_s14] sm:$0xff]  ;;  %v1769_v10 = vld [vmem:[%s3626_s14 + $0x8] sm:$0xff] }
 0x4bb   : > { %v2032_v15 = vmul.f32 1.442695, %v2020_v32  ;;  %v2034_v23 = vmul.f32 1.442695, %v2021_v13 }
 0x4bc   : > { %v2012_v49 = vpop.xlane.xlu0 %2011  ;;  %v2015_v44 = vpop.xlane.xlu1 %2014 }
 0x4bd   : > { %2931 = vpow2.f32 %v2032_v15  ;;  %v2022_v40 = vsub.f32 %v3350_v63, %v2012_v49  ;;  %v2023_v31 = vsub.f32 %v3356_v18, %v2015_v44 }
 0x4be   : > { %v3419_v5 = vpop.eup %2923  ;;  %2933 = vpow2.f32 %v2034_v23 }
 0x4bf   : > { %v2036_v0 = vmul.f32 1.442695, %v2022_v40  ;;  %v2038_v38 = vmul.f32 1.442695, %v2023_v31  ;;  %v2040_v33 = vsel %vm1283_vm7, %v3419_v5, 0.0 }
 0x4c0   : > { %2041 = vadd.xlane.f32.xlu0 %v2040_v33  ;;  %v2966_v33 = vmov 0.0  }
 0x4c1   : > { %2935 = vpow2.f32 %v2036_v0 }
 0x4c2   : > { %v3423_v6 = vpop.eup %2925  ;;  %2937 = vpow2.f32 %v2038_v38 }
 0x4c3   : > { %v2043_v9 = vsel %vm1283_vm7, %v3423_v6, 0.0  ;;  %v3427_v37 = vpop.eup %2927 }
 0x4c4   : > { %2044 = vadd.xlane.f32.xlu1 %v2043_v9  ;;  %v2049_v34 = vsel %vm1283_vm7, %v3427_v37, 0.0 }
 0x4c6   : > { %v3429_v63 = vpop.eup %2929 }
 0x4c7   : > { %v2046_v18 = vsel %vm1283_vm7, %v3429_v63, 0.0 }
 0x4c8   : > { %2047 = vadd.xlane.f32.xlu0 %v2046_v18  ;;  %2050 = vadd.xlane.f32.xlu1 %v2049_v34 }
 0x4ca   : > { %v3435_v41 = vpop.eup %2931 }
 0x4cb   : > { %v3437_v39 = vpop.eup %2933  ;;  %v2052_v46 = vsel %vm1283_vm7, %v3435_v41, 0.0 }
 0x4cc   : > { %2053 = vadd.xlane.f32.xlu0 %v2052_v46  ;;  %v2055_v50 = vsel %vm1283_vm7, %v3437_v39, 0.0 }
 0x4cd   : > { %2056 = vadd.xlane.f32.xlu1 %v2055_v50 }
 0x4ce   : > { %v3443_v57 = vpop.eup %2935 }
 0x4cf   : > { %v3445_v58 = vpop.eup %2937  ;;  %v2058_v60 = vsel %vm1283_vm7, %v3443_v57, 0.0 }
 0x4d0   : > { %2059 = vadd.xlane.f32.xlu0 %v2058_v60  ;;  %v2061_v56 = vsel %vm1283_vm7, %v3445_v58, 0.0 }
 0x4d1   : > { %2062 = vadd.xlane.f32.xlu1 %v2061_v56 }
 0x500   : > { %v2799_v1 = vpop.f32.mrf.mxu0 }
 0x501   : > { %v1652_v32 = vmul.f32 %v3165_v12, %v2799_v1 }
 0x502   : > { %v1586_v2 = vpop.f32.mrf.mxu0 }
 0x503   : > { %v1650_v7 = vmul.f32 %v3167_v14, %v1586_v2 }
 0x504   : > { %v2800_v4 = vpop.f32.mrf.mxu0 }
 0x505   : > { %v1653_v26 = vmul.f32 %v3169_v16, %v2800_v4  ;;  %v1772_v16 = vpack.c.bf16 %v1769_v10, %v1768_v61 }
 0x506   : > { %v1589_v36 = vpop.f32.mrf.mxu0 }
 0x507   : > { %v1651_v8 = vmul.f32 %v3173_v25, %v1589_v36  ;;  %v1659_v23 = vpack.c.bf16 %v1653_v26, %v1652_v32 }
 0x508   : > { %v2807_v13 = vpop.f32.mrf.mxu1 }
 0x509   : > { %v1658_v15 = vpack.c.bf16 %v1651_v8, %v1650_v7  ;;  %v1656_v31 = vmul.f32 %v3191_v48, %v2807_v13 }
 0x50a   : > { %v1635_v49 = vpop.f32.mrf.mxu1 }
 0x50b   : > { %2813 = vmatprep.mubr.msk.bf16.mxu0 %vm720_vm4, %v1658_v15  ;;  %v1654_v40 = vmul.f32 %v3171_v20, %v1635_v49  ;;  %v2225_v20 = vpack.c.bf16 %v3103_v22, %v3100_v21 }
 0x50c   : > { %v2808_v14 = vpop.f32.mrf.mxu1  ;;  %2814 = vmatmul.mubr.msk.bf16.vlgmr.msra.gmra.mxu0 %vm720_vm4, %v1659_v23 }
 0x50d   : > { %2834 = vmatpush3.bf16.msra.mxu0 %v3408_v42  ;;  %v1657_v25 = vmul.f32 %v3185_v45, %v2808_v14 }
 0x50e   : > { %v1638_v44 = vpop.f32.mrf.mxu1  ;;  %2835 = vmatprep.subr.bf16.mxu0 %v1772_v16 }
 0x50f   : > { %v1655_v12 = vmul.f32 %v3175_v29, %v1638_v44  ;;  %v1661_v38 = vpack.c.bf16 %v1657_v25, %v1656_v31 }
 0x511   : > { %v1660_v0 = vpack.c.bf16 %v1655_v12, %v1654_v40  ;;  %2836 = vmatpush3.bf16.msra.mxu0 %v1772_v16 }
 0x512   : > { %2861 = vmatprep.subr.bf16.mxu0 %v2966_v33 }
 0x513   : > { %2817 = vmatprep.mubr.msk.bf16.mxu0 %vm720_vm4, %v1660_v0 }
 0x514   : > { %2818 = vmatmul.mubr.msk.bf16.gmra.mxu0 %vm720_vm4, %v1661_v38 }
 0x515   : > { %2837 = vmatprep.mubr.msk.bf16.mxu0 %vm720_vm4, %v3370_v30 }
 0x51c   : > { %2838 = vmatmul.mubr.msk.bf16.vlgmr.msra.gmra.mxu0 %vm720_vm4, %v3366_v3 }
 0x51d   : > { %2841 = vmatprep.mubr.msk.bf16.mxu0 %vm720_vm4, %v3383_v51  ;;  %2862 = vmatpush3.bf16.msra.mxu0 %v2225_v20  ;;  %v1779_v51 = vld [vmem:[%s3627_s15 + $0x8] sm:$0xff] }
 0x51e   : > { %2863 = vmatprep.subr.bf16.mxu0 %v2966_v33 }
 0x521   : > { %2864 = vmatpush3.bf16.msra.mxu0 %v2224_v24  ;;  %v1783_v24 = vpack.c.bf16 %v1781_v19, %v1780_v17 }
 0x522   : > { %2877 = vmatprep.subr.bf16.mxu0 %v2966_v33 }
 0x523   : > { %2821 = vmatprep.subr.bf16.mxu1 %v1783_v24 }
 0x524   : > { %2842 = vmatmul.mubr.msk.bf16.gmra.mxu0 %vm720_vm4, %v3378_v47  ;;  %2822 = vmatpush3.bf16.msra.mxu1 %v1783_v24  ;;  %v1778_v47 = vld [vmem:[%s3627_s15] sm:$0xff] }
 0x525   : > { %2865 = vmatprep.mubr.msk.bf16.mxu0 %vm2967_vm8, %v2966_v33  ;;  %v1782_v42 = vpack.c.bf16 %v1779_v51, %v1778_v47 }
 0x527   : > { %2823 = vmatprep.subr.bf16.mxu1 %v1782_v42 }
 0x528   : > { %2824 = vmatpush3.bf16.msra.mxu1 %v1782_v42 }
 0x529   : > { %2845 = vmatprep.subr.bf16.mxu1 %v2966_v33 }
 0x549   : > { %v2042_v21 = vpop.xlane.xlu0 %2041 }
 0x54a   : > { %2939 = vrcp.f32 %v2042_v21 }
 0x54d   : > { %v2045_v22 = vpop.xlane.xlu1 %2044 }
 0x54e   : > { %2941 = vrcp.f32 %v2045_v22 }
 0x551   : > { %v2048_v29 = vpop.xlane.xlu0 %2047  ;;  %v2051_v45 = vpop.xlane.xlu1 %2050 }
 0x552   : > { %2943 = vrcp.f32 %v2048_v29 }
 0x553   : > { %2945 = vrcp.f32 %v2051_v45 }
 0x555   : > { %v2054_v48 = vpop.xlane.xlu0 %2053 }
 0x556   : > { %2947 = vrcp.f32 %v2054_v48  ;;  %v2057_v3 = vpop.xlane.xlu1 %2056 }
 0x557   : > { %v2940_v30 = vpop.eup %2939  ;;  %2949 = vrcp.f32 %v2057_v3 }
 0x558   : > { %v2072_v34 = vmul.f32 %v2940_v30, %v3419_v5 }
 0x559   : > { %v2060_v9 = vpop.xlane.xlu0 %2059 }
 0x55a   : > { %2951 = vrcp.f32 %v2060_v9  ;;  %v2063_v18 = vpop.xlane.xlu1 %2062  ;;  %v2080_v60 = vmul.f32 %v2072_v34, %v3207_v53 }
 0x55b   : > { %v2942_v46 = vpop.eup %2941  ;;  %2953 = vrcp.f32 %v2063_v18 }
 0x55c   : > { %v2073_v50 = vmul.f32 %v2942_v46, %v3423_v6 }
 0x55e   : > { %v2081_v56 = vmul.f32 %v2073_v50, %v3209_v54 }
 0x55f   : > { %v2944_v1 = vpop.eup %2943 }
 0x560   : > { %v2946_v2 = vpop.eup %2945  ;;  %v2096_v4 = vpack.c.bf16 %v2081_v56, %v2080_v60  ;;  %v2074_v26 = vmul.f32 %v2944_v1, %v3429_v63 }
 0x561   : > { %v2075_v36 = vmul.f32 %v2946_v2, %v3427_v37 }
 0x562   : > { %2100 = vxpose.xlu0.c.b16.start [1/2] (short) (narrow) %v2096_v4, 16  ;;  %v2082_v5 = vmul.f32 %v2074_v26, %v3216_v59 }
 0x563   : > { %v2948_v7 = vpop.eup %2947  ;;  %v2083_v8 = vmul.f32 %v2075_v36, %v3205_v52 }
 0x564   : > { %v2950_v6 = vpop.eup %2949  ;;  %v2076_v61 = vmul.f32 %v2948_v7, %v3435_v41 }
 0x565   : > { %v2097_v10 = vpack.c.bf16 %v2083_v8, %v2082_v5  ;;  %v2077_v32 = vmul.f32 %v2950_v6, %v3437_v39 }
 0x566   : > { %v2084_v13 = vmul.f32 %v2076_v61, %v3224_v11 }
 0x567   : > { %v2952_v15 = vpop.eup %2951  ;;  %2101 = vxpose.xlu0.c.b16.end [2/2] (short) (narrow) %v2097_v10, 16  ;;  %v2085_v63 = vmul.f32 %v2077_v32, %v3236_v43 }
 0x568   : > { %v2954_v23 = vpop.eup %2953  ;;  %v2078_v37 = vmul.f32 %v2952_v15, %v3443_v57  ;;  %v2608_v15 = vld [vmem:[%s3628_s16] ss:$0 sm:$0xff] }
 0x569   : > { %v3514_v49 = vpack.c.bf16 %v2085_v63, %v2084_v13  ;;  %v2079_v16 = vmul.f32 %v2954_v23, %v3445_v58  ;;  %v2595_v58 = vld [vmem:[%s3625_s13] ss:$0 sm:$0xff] }
 0x56a   : > { %v2086_v14 = vmul.f32 %v2078_v37, %v3211_v55 }
 0x56b   : > { %2116 = vxpose.xlu1.c.b16.start [1/2] (short) (narrow) %v3514_v49, 16  ;;  %v2087_v41 = vmul.f32 %v2079_v16, %v3218_v62 }
 0x56d   : > { %v3520_v39 = vpack.c.bf16 %v2087_v41, %v2086_v14 }
 0x56f   : > { %2117 = vxpose.xlu1.c.b16.end [2/2] (short) (narrow) %v3520_v39, 16 }
 0x5c5   : > { %v3523_v25 = vpop.trf.xlu0 }
 0x5c6   : > { %2866 = vmatmul.mubr.msk.bf16.vlgmr.msra.gmra.mxu0 %vm720_vm4, %v3523_v25 }
 0x5c7   : > { %2878 = vmatpush3.bf16.msra.mxu0 %v2097_v10  ;;  %2881 = vmatprep.mubr.msk.bf16.mxu0 %vm2967_vm8, %v2966_v33 }
 0x5c8   : > { %2879 = vmatprep.subr.bf16.mxu0 %v2966_v33 }
 0x5cb   : > { %2880 = vmatpush3.bf16.msra.mxu0 %v2096_v4 }
 0x5cc   : > { %v2815_v57 = vpop.f32.mrf.mxu0 }
 0x5cd   : > { %v1730_v12 = vadd.f32 %v2815_v57, %v2595_v58 }
 0x5ce   : > { %v1721_v44 = vpop.f32.mrf.mxu0 }
 0x5cf   : > { %v1722_v40 = vadd.f32 %v2595_v58, %v1721_v44  ;;  %v1754_v29 = vmul.f32 %v1730_v12, %v3216_v59 }
 0x5d0   : > { %v2816_v31 = vpop.f32.mrf.mxu0 }
 0x5d1   : > { %v1733_v0 = vadd.f32 %v2816_v31, %v2595_v58  ;;  %v1752_v20 = vmul.f32 %v1722_v40, %v3207_v53  ;;  %v1762_v47 = vmax.f32 %v1754_v29, 0.0 }
 0x5d2   : > { %v1724_v38 = vpop.f32.mrf.mxu0 }
 0x5d3   : > { %v1755_v21 = vmul.f32 %v1733_v0, %v3205_v52  ;;  %v1725_v22 = vadd.f32 %v2595_v58, %v1724_v38  ;;  %v1760_v48 = vmax.f32 %v1752_v20, 0.0 }
 0x5d4   : > { %v2819_v45 = vpop.f32.mrf.mxu0 }
 0x5d5   : > { %v1753_v17 = vmul.f32 %v1725_v22, %v3209_v54  ;;  %v1763_v19 = vmax.f32 %v1755_v21, 0.0  ;;  %v1746_v51 = vadd.f32 %v2819_v45, %v2595_v58 }
 0x5d6   : > { %v1737_v24 = vpop.f32.mrf.mxu0 }
 0x5d7   : > { %v1761_v3 = vmax.f32 %v1753_v17, 0.0  ;;  %v1738_v30 = vadd.f32 %v2595_v58, %v1737_v24  ;;  %v1775_v34 = vpack.c.bf16 %v1763_v19, %v1762_v47  ;;  %v1758_v1 = vmul.f32 %v1746_v51, %v3211_v55 }
 0x5d8   : > { %v2820_v42 = vpop.f32.mrf.mxu0 }
 0x5d9   : > { %v1774_v9 = vpack.c.bf16 %v1761_v3, %v1760_v48  ;;  %v1749_v18 = vadd.f32 %v2820_v42, %v2595_v58  ;;  %v1756_v50 = vmul.f32 %v1738_v30, %v3224_v11  ;;  %v1766_v5 = vmax.f32 %v1758_v1, 0.0 }
 0x5da   : > { %v1740_v46 = vpop.f32.mrf.mxu0 }
 0x5db   : > { %v1759_v60 = vmul.f32 %v1749_v18, %v3218_v62  ;;  %v1741_v56 = vadd.f32 %v2595_v58, %v1740_v46  ;;  %2825 = vmatprep.mubr.msk.bf16.mxu1 %vm720_vm4, %v1774_v9  ;;  %v1764_v26 = vmax.f32 %v1756_v50, 0.0 }
 0x5dc   : > { %2826 = vmatmul.mubr.msk.bf16.vlgmr.msra.gmra.mxu1 %vm720_vm4, %v1775_v34  ;;  %v2839_v6 = vpop.f32.mrf.mxu0 }
 0x5dd   : > { %v1757_v2 = vmul.f32 %v1741_v56, %v3236_v43  ;;  %v1767_v4 = vmax.f32 %v1759_v60, 0.0 }
 0x5de   : > { %v1907_v61 = vpop.f32.mrf.mxu0 }
 0x5df   : > { %v1765_v36 = vmax.f32 %v1757_v2, 0.0  ;;  %v1777_v8 = vpack.c.bf16 %v1767_v4, %v1766_v5 }
 0x5e0   : > { %v2840_v10 = vpop.f32.mrf.mxu0 }
 0x5e1   : > { %v1776_v7 = vpack.c.bf16 %v1765_v36, %v1764_v26 }
 0x5e2   : > { %v1910_v32 = vpop.f32.mrf.mxu0 }
 0x5e3   : > { %2829 = vmatprep.mubr.msk.bf16.mxu1 %vm720_vm4, %v1776_v7 }
 0x5e4   : > { %2830 = vmatmul.mubr.msk.bf16.gmra.mxu1 %vm720_vm4, %v1777_v8  ;;  %v2843_v37 = vpop.f32.mrf.mxu0 }
 0x5e5   : > { %2849 = vmatprep.mubr.msk.bf16.mxu1 %vm2967_vm8, %v2966_v33 }
 0x5e6   : > { %v1923_v40 = vpop.f32.mrf.mxu0 }
 0x5e8   : > { %v2844_v17 = vpop.f32.mrf.mxu0 }
 0x5ea   : > { %v1926_v60 = vpop.f32.mrf.mxu0 }
 0x686   : > { %v2262_v27 = vpop.f32.mrf.mxu0 }
 0x687   : > { %v2308_v28 = vpack.c.bf16 %v2262_v27, %v2262_v27 }
 0x689   : > { %2882 = vmatmul.mubr.msk.bf16.vlgmr.msra.gmra.mxu0 %vm720_vm4, %v2308_v28 }
 0x69c   : > { %v2827_v13 = vpop.f32.mrf.mxu1 }
 0x69d   : > { %v1916_v63 = vadd.f32 %v2839_v6, %v2827_v13 }
 0x69e   : > { %v1830_v23 = vpop.f32.mrf.mxu1 }
 0x69f   : > { %v1947_v16 = vadd.f32 %v2608_v15, %v1916_v63  ;;  %v1908_v14 = vadd.f32 %v1907_v61, %v1830_v23 }
 0x6a0   : > { %v2828_v41 = vpop.f32.mrf.mxu1 }
 0x6a1   : > { %v1919_v57 = vadd.f32 %v2840_v10, %v2828_v41  ;;  %v1945_v58 = vadd.f32 %v2608_v15, %v1908_v14  ;;  %v1955_v12 = vmax.f32 %v1947_v16, 0.0 }
 0x6a2   : > { %v1833_v44 = vpop.f32.mrf.mxu1 }
 0x6a3   : > { %v1948_v31 = vadd.f32 %v2608_v15, %v1919_v57  ;;  %v1911_v0 = vadd.f32 %v1910_v32, %v1833_v44  ;;  %v1953_v22 = vmax.f32 %v1945_v58, 0.0  ;;  %v2090_v19 = vmul.f32 %v1955_v12, %v3216_v59  ;;  %v2124_v44 = vpop.trf.xlu1 }
 0x6a4   : > { %v2831_v38 = vpop.f32.mrf.mxu1 }
 0x6a5   : > { %v1956_v20 = vmax.f32 %v1948_v31, 0.0  ;;  %v1932_v21 = vadd.f32 %v2843_v37, %v2831_v38  ;;  %v1946_v29 = vadd.f32 %v2608_v15, %v1911_v0  ;;  %v1961_v9 = vsel %vm720_vm4, %v1953_v22, 0.0 }
 0x6a6   : > { %v1846_v45 = vpop.f32.mrf.mxu1  ;;  %v2088_v56 = vmul.f32 %v1953_v22, %v3207_v53 }
 0x6a7   : > { %v2091_v24 = vmul.f32 %v1956_v20, %v3205_v52  ;;  %v1924_v48 = vadd.f32 %v1923_v40, %v1846_v45  ;;  %v1954_v3 = vmax.f32 %v1946_v29, 0.0  ;;  %v1951_v30 = vadd.f32 %v2608_v15, %v1932_v21  ;;  %v2955_v40 = vld [vmem:[%s3089_s26 + $0x30] sm:$0xff] }
 0x6a8   : > { %v2832_v47 = vpop.f32.mrf.mxu1  ;;  %v1964_v52 = vsel %vm720_vm4, %v1955_v12, 0.0  ;;  %v1966_v5 = vsel %vm720_vm4, %v1956_v20, 0.0  ;;  %v2956_v12 = vld [vmem:[%s3089_s26 + $0x38] sm:$0xff]  ;;  %s2556_s26 = sshll.u32 %s3642_s20, 3 }
 0x6a9   : > { %v2133_v51 = vpack.c.bf16 %v2091_v24, %v2090_v19  ;;  %v1935_v42 = vadd.f32 %v2844_v17, %v2832_v47  ;;  %v1962_v18 = vsel %vm720_vm4, %v1954_v3, 0.0  ;;  %v2089_v34 = vmul.f32 %v1954_v3, %v3209_v54  ;;  %s676_s2 = scalar_lea.vmem %s3630_s18, %s2556_s26  ;;  %s682_s24 = scalar_lea.vmem %s3631_s19, %s2556_s26 }
 0x6aa   : > { %v1949_v46 = vadd.f32 %v2608_v15, %v1924_v48  ;;  %v1849_v50 = vpop.f32.mrf.mxu1  ;;  %v1963_v59 = vadd.f32 %v1962_v18, %v1961_v9  ;;  %v1959_v1 = vmax.f32 %v1951_v30, 0.0  ;;  %v2227_v31 = vpack.c.bf16 %v2956_v12, %v2955_v40 }
 0x6ab   : > { %2846 = vmatpush3.bf16.msra.mxu1 %v2133_v51  ;;  %v1952_v2 = vadd.f32 %v2608_v15, %v1935_v42  ;;  %v1927_v4 = vadd.f32 %v1926_v60, %v1849_v50  ;;  %v2132_v36 = vpack.c.bf16 %v2089_v34, %v2088_v56 }
 0x6ac   : > { %2847 = vmatprep.subr.bf16.mxu1 %v2966_v33  ;;  %v1965_v26 = vadd.f32 %v1964_v52, %v1963_v59  ;;  %v1957_v7 = vmax.f32 %v1949_v46, 0.0  ;;  %v2094_v53 = vmul.f32 %v1959_v1, %v3211_v55 }
 0x6ad   : > { %v1960_v54 = vmax.f32 %v1952_v2, 0.0  ;;  %v1950_v8 = vadd.f32 %v2608_v15, %v1927_v4 }
 0x6ae   : > { %v1967_v6 = vadd.f32 %v1966_v5, %v1965_v26  ;;  %v1974_v13 = vsel %vm720_vm4, %v1957_v7, 0.0  ;;  %v2092_v16 = vmul.f32 %v1957_v7, %v3224_v11 }
 0x6af   : > { %2848 = vmatpush3.bf16.msra.mxu1 %v2132_v36  ;;  %v2095_v61 = vmul.f32 %v1960_v54, %v3218_v62  ;;  %v1958_v10 = vmax.f32 %v1950_v8, 0.0  ;;  %v1977_v62 = vsel %vm720_vm4, %v1959_v1, 0.0 }
 0x6b0   : > { %2853 = vmatprep.subr.bf16.mxu1 %v2966_v33  ;;  %v1968_v32 = vrot.slane %v1967_v6, 4 }
 0x6b1   : > { %v2135_v63 = vpack.c.bf16 %v2095_v61, %v2094_v53  ;;  %v1975_v23 = vsel %vm720_vm4, %v1958_v10, 0.0  ;;  %v2093_v37 = vmul.f32 %v1958_v10, %v3236_v43  ;;  %v1979_v43 = vsel %vm720_vm4, %v1960_v54, 0.0 }
 0x6b2   : > { %2850 = vmatmul.mubr.msk.bf16.vlgmr.msra.gmra.mxu1 %vm720_vm4, %v3523_v25  ;;  %v1969_v15 = vadd.f32 %v1968_v32, %v1967_v6  ;;  %v1976_v55 = vadd.f32 %v1975_v23, %v1974_v13 }
 0x6b3   : > { %2857 = vmatprep.mubr.msk.bf16.mxu1 %vm2967_vm8, %v2966_v33  ;;  %2854 = vmatpush3.bf16.msra.mxu1 %v2135_v63  ;;  %v2134_v25 = vpack.c.bf16 %v2093_v37, %v2092_v16 }
 0x6b4   : > { %v1970_v14 = vrot.slane %v1969_v15, 2  ;;  %v1978_v41 = vadd.f32 %v1977_v62, %v1976_v55  ;;  %2855 = vmatprep.subr.bf16.mxu1 %v2966_v33 }
 0x6b6   : > { %v1971_v57 = vadd.f32 %v1970_v14, %v1969_v15  ;;  %v1980_v58 = vadd.f32 %v1979_v43, %v1978_v41 }
 0x6b7   : > { %2856 = vmatpush3.bf16.msra.mxu1 %v2134_v25 }
 0x6b8   : > { %v1972_v0 = vrot.slane %v1971_v57, 1  ;;  %v1981_v38 = vrot.slane %v1980_v58, 4  ;;  %2869 = vmatprep.subr.bf16.mxu1 %v2966_v33 }
 0x6ba   : > { %v1973_v11 = vadd.f32 %v1972_v0, %v1971_v57  ;;  %v1982_v20 = vadd.f32 %v1981_v38, %v1980_v58  ;;  %2858 = vmatmul.mubr.msk.bf16.vlgmr.msra.gmra.mxu1 %vm720_vm4, %v2124_v44 }
 0x6bb   : > { %2870 = vmatpush3.bf16.msra.mxu1 %v2227_v31  ;;  %2873 = vmatprep.mubr.msk.bf16.mxu1 %vm2967_vm8, %v2966_v33 }
 0x6bc   : > { %v1987_v21 = vmul.f32 0.03125, %v1973_v11  ;;  %v1983_v22 = vrot.slane %v1982_v20, 2  ;;  %2871 = vmatprep.subr.bf16.mxu1 %v2966_v33 }
 0x6be   : > { %1990 = vst.msk [vmem:[%s670_s30] sm:$0x1] %vm1989_vm9, %v1987_v21  ;;  %v1984_v29 = vadd.f32 %v1983_v22, %v1982_v20 }
 0x6bf   : > { %2872 = vmatpush3.bf16.msra.mxu1 %v2226_v35  ;;  %v2867_v35 = vpop.f32.mrf.mxu0 }
 0x6c0   : > { %v1985_v45 = vrot.slane %v1984_v29, 1  ;;  %2885 = vmatprep.subr.bf16.mxu1 %v2966_v33 }
 0x6c1   : > { %v2265_v24 = vpop.f32.mrf.mxu0 }
 0x6c2   : > { %v1986_v17 = vadd.f32 %v1985_v45, %v1984_v29  ;;  %2874 = vmatmul.mubr.msk.bf16.vlgmr.msra.gmra.mxu1 %vm720_vm4, %v2124_v44 }
 0x6c3   : > { %2886 = vmatpush3.bf16.msra.mxu1 %v3520_v39  ;;  %2889 = vmatprep.mubr.msk.bf16.mxu1 %vm2967_vm8, %v2966_v33  ;;  %v2868_v48 = vpop.f32.mrf.mxu0 }
 0x6c4   : > { %v1988_v19 = vmul.f32 0.03125, %v1986_v17  ;;  %2887 = vmatprep.subr.bf16.mxu1 %v2966_v33 }
 0x6c6   : > { %1991 = vst.msk [vmem:[%s670_s30 + $0x1] sm:$0x1] %vm1989_vm9, %v1988_v19 }
 0x6c7   : > { %2888 = vmatpush3.bf16.msra.mxu1 %v3514_v49 }
 0x749   : > { %v2347_v60 = vpop.f32.mrf.mxu0 }
 0x74a   : > { %2396 = vst.msk [vmem:[%s682_s24] sm:$0xff] %vm1283_vm7, %v2347_v60 }
 0x74b   : > { %v2883_v56 = vpop.f32.mrf.mxu0 }
 0x74d   : > { %v2350_v59 = vpop.f32.mrf.mxu0 }
 0x74f   : > { %v2884_v52 = vpop.f32.mrf.mxu0 }
 0x772   : > { %v2173_v39 = vpop.f32.mrf.mxu1 }
 0x773   : > { %2222 = vst.msk [vmem:[%s676_s2] sm:$0xff] %vm720_vm4, %v2173_v39 }
 0x774   : > { %v2851_v33 = vpop.f32.mrf.mxu1 }
 0x776   : > { %v2176_v3 = vpop.f32.mrf.mxu1 }
 0x778   : > { %v2852_v30 = vpop.f32.mrf.mxu1 }
 0x77a   : > { %v2216_v47 = vpop.f32.mrf.mxu1 }
 0x77b   : > { %2223 = vst.msk [vmem:[%s676_s2 + $0x8] sm:$0xff] %vm720_vm4, %v2216_v47 }
 0x77c   : > { %v2859_v49 = vpop.f32.mrf.mxu1 }
 0x77e   : > { %v2219_v51 = vpop.f32.mrf.mxu1 }
 0x780   : > { %v2860_v42 = vpop.f32.mrf.mxu1 }
 0x782   : > { %v2302_v9 = vpop.f32.mrf.mxu1 }
 0x783   : > { %v2309_v18 = vpack.c.bf16 %v2302_v9, %v2302_v9 }
 0x784   : > { %v2875_v34 = vpop.f32.mrf.mxu1 }
 0x785   : > { %2890 = vmatmul.mubr.msk.bf16.vlgmr.msra.gmra.mxu1 %vm720_vm4, %v2309_v18 }
 0x786   : > { %v2305_v46 = vpop.f32.mrf.mxu1 }
 0x788   : > { %v2876_v50 = vpop.f32.mrf.mxu1 }
 0x845   : > { %v2390_v1 = vpop.f32.mrf.mxu1 }
 0x846   : > { %2397 = vst.msk [vmem:[%s682_s24 + $0x8] sm:$0xff] %vm1283_vm7, %v2390_v1 }
 0x847   : > { %v2891_v2 = vpop.f32.mrf.mxu1 }
 0x849   : > { %v2393_v4 = vpop.f32.mrf.mxu1 }
 0x84b   : > { %v2892_v26 = vpop.f32.mrf.mxu1 }
 0x84c PF: > { %s30_s0 = sadd.s32 1, %s2963_s0  }
 0x84d   : > { %p27_p4 = scmp.ge.s32.totalorder %s30_s0, 4  }
 0x84f   :  { %29 = sbr.rel (!%p27_p4) target bundleno = 5 (0x5), region = 148 }

</bundles_post_ra>
